<compile_context>
chip_gen: v7x
topology: tpu7x:2x2x1
jax: 0.10.0
libtpu: 0.0.40
codegen_flags: <defaults>
</compile_context>

<pallas_src>
import functools

import jax
import jax.numpy as jnp
from jax.experimental import pallas as pl
from jax.experimental.pallas import tpu as pltpu


# ----------------------------- Pallas kernel ------------------------------

def _make_lstm_kernel(num_layers: int, hidden_dim: int, batch_pad: int,
                      seq_len: int, mxu_dtype):
    """Stacked-LSTM forward; activations/states resident in VMEM.

    Ref order (all batch dims already padded to batch_pad):
      inputs : x (T*B, Din) f32,
               W_ih0 (Din, 4H) f32, W_hh0 (H, 4H) mxu_dtype, b0 (1, 4H) f32,
               b_l (1, 4H) f32 for l = 1..L-1,
               W_stk_l ([W_ih; W_hh] -> (2H, 4H)) mxu_dtype in HBM for l>=1.
      outputs: out (T*B, H), h_n (L, B, H), c_n (L, B, H)   (f32)
      scratch: pg (T*B, 4H) f32; if L>1: W_stk VMEM buffer + DMA semaphores.
    Gate columns are pre-permuted to [i, f, o, g].
    """
    H, B, L, T = hidden_dim, batch_pad, num_layers, seq_len

    def kernel(*refs):
        x_ref = refs[0]
        wih0_ref, whh0_ref, b0_ref = refs[1], refs[2], refs[3]
        b_refs = refs[4:4 + (L - 1)]
        wstk_hbm_refs = refs[4 + (L - 1):4 + 2 * (L - 1)]
        out_ref, h_ref, c_ref = refs[4 + 2 * (L - 1):7 + 2 * (L - 1)]
        scratch = refs[7 + 2 * (L - 1):]
        pg_ref = scratch[0]
        if L > 1:
            wstk_vmem_ref, wstk_sem = scratch[1], scratch[2]

        # (a) Start the layer>=1 stacked-weight DMAs immediately so the
        #     HBM->VMEM transfer overlaps the pre-gate matmul + first layer-0
        #     step instead of serializing before the body (v5e win).
        copies = []
        for l in range(L - 1):
            cp = pltpu.make_async_copy(wstk_hbm_refs[l], wstk_vmem_ref.at[l],
                                       wstk_sem.at[l])
            cp.start()
            copies.append(cp)

        # (b) Batched layer-0 input projection over ALL timesteps: one MXU
        #     matmul + one bias add, off the serial recurrence.  Kept f32.
        pg_ref[...] = (
            jnp.dot(x_ref[...], wih0_ref[...],
                    preferred_element_type=jnp.float32)
            + b0_ref[...]
        )

        # (c) Hoist layer>=1 bias broadcasts out of the unrolled loop.
        b_full = [jnp.broadcast_to(b_refs[l][...], (B, 4 * H))
                  for l in range(L - 1)]

        def cell(gates, c_prev):
            # gate columns are [i, f, o, g]: one contiguous sigmoid slab and
            # one tanh slab => 2 EUP pushes per step.
            sig = jax.nn.sigmoid(gates[:, :3 * H])
            i_g = sig[:, 0 * H:1 * H]
            f_g = sig[:, 1 * H:2 * H]
            o_g = sig[:, 2 * H:3 * H]
            g_g = jnp.tanh(gates[:, 3 * H:])
            c_new = f_g * c_prev + i_g * g_g
            h_new = o_g * jnp.tanh(c_new)
            return h_new, c_new

        h = [jnp.zeros((B, H), jnp.float32) for _ in range(L)]
        c = [jnp.zeros((B, H), jnp.float32) for _ in range(L)]
        outs = []

        # (d) Fused, fully-unrolled time loop (T is small and static):
        #     one recurrent matmul per layer per step.
        for t in range(T):
            # layer 0: aligned (8-sublane) pre-gate read + recurrent matmul.
            g0 = pg_ref[t * B:(t + 1) * B, :] + jnp.dot(
                h[0].astype(mxu_dtype), whh0_ref[...],
                preferred_element_type=jnp.float32)
            h[0], c[0] = cell(g0, c[0])

            # layers >= 1: single matmul on concat([x_t, h]) x [W_ih; W_hh].
            for l in range(1, L):
                if t == 0:
                    copies[l - 1].wait()   # weight DMA must have landed
                xin = jnp.concatenate([h[l - 1], h[l]],
                                      axis=1).astype(mxu_dtype)
                gl = jnp.dot(xin, wstk_vmem_ref[l - 1],
                             preferred_element_type=jnp.float32) + b_full[l - 1]
                h[l], c[l] = cell(gl, c[l])

            outs.append(h[L - 1])

        # (e) One full-tile, unmasked store for all T step outputs.
        out_ref[...] = jnp.concatenate(outs, axis=0)
        for l in range(L):
            h_ref[l] = h[l]
            c_ref[l] = c[l]

    return kernel


# ------------------------------ JAX wrapper -------------------------------

def lstm_encoder(x, params, *, hidden_dim: int, mxu_dtype=jnp.float32):
    """x: (B, T, Din) float32.
    params: list of (W_ih, W_hh, b_ih, b_hh) per layer with PyTorch shapes
    W_ih=(4H, Din_or_H), W_hh=(4H, H), b_*=(4H,).
    mxu_dtype: dtype of the recurrent-matmul operands (jnp.bfloat16 on
    v6e/v7x for faster MXU; f32 accumulation and gate math regardless)."""
    B, T, Din = x.shape
    L = len(params)
    H = hidden_dim
    B_pad = ((B + 7) // 8) * 8     # sublane-align the batch dimension

    def reorder(w):
        # columns in PyTorch gate order [i, f, g, o] -> [i, f, o, g]
        return jnp.concatenate(
            [w[..., :2 * H], w[..., 3 * H:4 * H], w[..., 2 * H:3 * H]], axis=-1)

    # time-major, batch zero-padded to B_pad, flattened for the batched
    # layer-0 projection.
    x_tm = jnp.transpose(x, (1, 0, 2)).astype(jnp.float32)      # (T, B, Din)
    x_tm = jnp.pad(x_tm, ((0, 0), (0, B_pad - B), (0, 0)))      # (T, B_pad, Din)
    x_flat = x_tm.reshape(T * B_pad, Din)

    # layer 0: separate input / recurrent weights (input part precomputed).
    w_ih0, w_hh0, b_ih0, b_hh0 = params[0]
    vmem_args = [
        reorder(jnp.asarray(w_ih0, jnp.float32).T),                     # (Din,4H) f32
        reorder(jnp.asarray(w_hh0, jnp.float32).T).astype(mxu_dtype),   # (H,4H)
        reorder((jnp.asarray(b_ih0, jnp.float32)
                 + jnp.asarray(b_hh0, jnp.float32))[None, :]),          # (1,4H) f32
    ]
    # layers >= 1: stacked [W_ih; W_hh] kept in HBM (manually DMA'd), bias in VMEM.
    hbm_args = []
    for (w_ih, w_hh, b_ih, b_hh) in params[1:]:
        vmem_args.append(reorder((jnp.asarray(b_ih, jnp.float32)
                                  + jnp.asarray(b_hh, jnp.float32))[None, :]))
        w_stk = jnp.concatenate([jnp.asarray(w_ih, jnp.float32).T,
                                 jnp.asarray(w_hh, jnp.float32).T], axis=0)
        hbm_args.append(reorder(w_stk).astype(mxu_dtype))               # (2H,4H)

    kernel = _make_lstm_kernel(L, H, B_pad, T, mxu_dtype)
    vmem = pl.BlockSpec(memory_space=pltpu.MemorySpace.VMEM)
    hbm = pl.BlockSpec(memory_space=pl.ANY)

    scratch_shapes = [pltpu.VMEM((T * B_pad, 4 * H), jnp.float32)]      # pre-gates
    if L > 1:
        scratch_shapes += [
            pltpu.VMEM((L - 1, 2 * H, 4 * H), mxu_dtype),               # W_stk buffer
            pltpu.SemaphoreType.DMA((L - 1,)),
        ]

    out_flat, h_n, c_n = pl.pallas_call(
        kernel,
        out_shape=(
            jax.ShapeDtypeStruct((T * B_pad, H), jnp.float32),   # outputs (time-major)
            jax.ShapeDtypeStruct((L, B_pad, H), jnp.float32),    # hidden
            jax.ShapeDtypeStruct((L, B_pad, H), jnp.float32),    # cell
        ),
        in_specs=[vmem] * (1 + len(vmem_args)) + [hbm] * len(hbm_args),
        out_specs=(vmem, vmem, vmem),
        scratch_shapes=scratch_shapes,
    )(x_flat, *vmem_args, *hbm_args)

    out = out_flat.reshape(T, B_pad, H)[:, :B, :]        # drop batch padding
    outputs = jnp.transpose(out, (1, 0, 2))              # back to (B, T, H)
    return outputs, (h_n[:, :B, :], c_n[:, :B, :])


# --------------------------- pure-JAX reference ----------------------------

def lstm_encoder_ref(x, params):
    B, T, _ = x.shape
    layer_in = x
    hs, cs = [], []
    for (w_ih, w_hh, b_ih, b_hh) in params:
        H = w_hh.shape[1]
        h = jnp.zeros((B, H), jnp.float32)
        c = jnp.zeros((B, H), jnp.float32)
        outs = []
        for t in range(T):
            g = layer_in[:, t, :] @ w_ih.T + b_ih + h @ w_hh.T + b_hh
            i, f, gg, o = jnp.split(g, 4, axis=1)
            i, f, gg, o = (jax.nn.sigmoid(i), jax.nn.sigmoid(f),
                           jnp.tanh(gg), jax.nn.sigmoid(o))
            c = f * c + i * gg
            h = o * jnp.tanh(c)
            outs.append(h)
        layer_in = jnp.stack(outs, axis=1)
        hs.append(h)
        cs.append(c)
    return layer_in, (jnp.stack(hs), jnp.stack(cs))


# --------------------------------- main ------------------------------------

if __name__ == "__main__":
    # Small shapes consistent with the module: (batch, seq, input_dim)
    batch, seq, input_dim, hidden_dim, num_layers = 2, 8, 23, 128, 2

    key = jax.random.PRNGKey(0)
    key, kx = jax.random.split(key)
    x = jax.random.normal(kx, (batch, seq, input_dim), jnp.float32)

    # Deterministic parameter init, same shapes/distribution as nn.LSTM
    # (uniform(-1/sqrt(H), 1/sqrt(H))).
    bound = 1.0 / jnp.sqrt(jnp.float32(hidden_dim))
    params = []
    for layer in range(num_layers):
        in_dim = input_dim if layer == 0 else hidden_dim
        key, k1, k2, k3, k4 = jax.random.split(key, 5)
        w_ih = jax.random.uniform(k1, (4 * hidden_dim, in_dim), jnp.float32,
                                  -bound, bound)
        w_hh = jax.random.uniform(k2, (4 * hidden_dim, hidden_dim), jnp.float32,
                                  -bound, bound)
        b_ih = jax.random.uniform(k3, (4 * hidden_dim,), jnp.float32, -bound, bound)
        b_hh = jax.random.uniform(k4, (4 * hidden_dim,), jnp.float32, -bound, bound)
        params.append((w_ih, w_hh, b_ih, b_hh))

    # f32 MXU operands by default for exact parity with the f32 reference;
    # pass mxu_dtype=jnp.bfloat16 on v6e/v7x (relax tolerance to ~1e-2).
    run = jax.jit(functools.partial(lstm_encoder, hidden_dim=hidden_dim))
    outputs, (hidden, cell) = run(x, params)
    jax.block_until_ready((outputs, hidden, cell))

    # sanity check against pure-JAX reference
    ref_out, (ref_h, ref_c) = lstm_encoder_ref(x, params)
    assert outputs.shape == (batch, seq, hidden_dim)
    assert hidden.shape == (num_layers, batch, hidden_dim)
    assert cell.shape == (num_layers, batch, hidden_dim)
    assert jnp.allclose(outputs, ref_out, atol=1e-4, rtol=1e-4)
    assert jnp.allclose(hidden, ref_h, atol=1e-4, rtol=1e-4)
    assert jnp.allclose(cell, ref_c, atol=1e-4, rtol=1e-4)

    print("KERNEL_OK")
</pallas_src>

<mosaic_0001>
module attributes {stable_mosaic.version = 11 : i64} {
  func.func @kernel(%arg0: memref<64x23xf32, #tpu.memory_space<vmem>>, %arg1: memref<23x512xf32, #tpu.memory_space<vmem>>, %arg2: memref<128x512xf32, #tpu.memory_space<vmem>>, %arg3: memref<1x512xf32, #tpu.memory_space<vmem>>, %arg4: memref<1x512xf32, #tpu.memory_space<vmem>>, %arg5: memref<256x512xf32, #tpu.memory_space<any>>, %arg6: memref<64x128xf32, #tpu.memory_space<vmem>>, %arg7: memref<2x8x128xf32, #tpu.memory_space<vmem>>, %arg8: memref<2x8x128xf32, #tpu.memory_space<vmem>>, %arg9: memref<64x512xf32, #tpu.memory_space<vmem>>, %arg10: memref<1x256x512xf32, #tpu.memory_space<vmem>>, %arg11: memref<1x!tpu.dma_semaphore, #tpu.memory_space<semaphore_mem>>) attributes {dimension_semantics = [], scalar_prefetch = 0 : i64, scratch_operands = 3 : i64, tpu.core_type = #tpu.core_type<tc>} {
    %c0_i32 = arith.constant 0 : i32
    %c0_i32_0 = arith.constant 0 : i32
    %c0_i32_1 = arith.constant 0 : i32
    %c0_i32_2 = arith.constant 0 : i32
    %0 = tpu.memref_slice %arg10[%c0_i32, %c0_i32_1, %c0_i32_2] : memref<1x256x512xf32, #tpu.memory_space<vmem>> -> memref<1x256x512xf32, #tpu.memory_space<vmem>>
    %1 = tpu.memref_squeeze %0 : memref<1x256x512xf32, #tpu.memory_space<vmem>> -> memref<256x512xf32, #tpu.memory_space<vmem>>
    %2 = tpu.memref_slice %arg11[%c0_i32_0] : memref<1x!tpu.dma_semaphore, #tpu.memory_space<semaphore_mem>> -> memref<1x!tpu.dma_semaphore, #tpu.memory_space<semaphore_mem>>
    %3 = tpu.memref_squeeze %2 : memref<1x!tpu.dma_semaphore, #tpu.memory_space<semaphore_mem>> -> memref<!tpu.dma_semaphore, #tpu.memory_space<semaphore_mem>>
    tpu.enqueue_dma source(%arg5 : memref<256x512xf32, #tpu.memory_space<any>>) target(%1 : memref<256x512xf32, #tpu.memory_space<vmem>>) target_semaphore(%3 : memref<!tpu.dma_semaphore, #tpu.memory_space<semaphore_mem>>)
    %c0 = arith.constant 0 : index
    %c0_3 = arith.constant 0 : index
    %4 = vector.load %arg0[%c0, %c0_3] : memref<64x23xf32, #tpu.memory_space<vmem>>, vector<64x23xf32>
    %c0_4 = arith.constant 0 : index
    %c0_5 = arith.constant 0 : index
    %5 = vector.load %arg1[%c0_4, %c0_5] : memref<23x512xf32, #tpu.memory_space<vmem>>, vector<23x512xf32>
    %cst = arith.constant dense<0.000000e+00> : vector<64x512xf32>
    %6 = tpu.matmul %4, %5, %cst {dimension_numbers = #tpu.dot_dimension_numbers<[1], [0], [0], [1], [0, 0, 1, 1], [], []>} : vector<64x23xf32>, vector<23x512xf32>, vector<64x512xf32> -> vector<64x512xf32>
    %c0_6 = arith.constant 0 : index
    %c0_7 = arith.constant 0 : index
    %7 = vector.load %arg3[%c0_6, %c0_7] : memref<1x512xf32, #tpu.memory_space<vmem>>, vector<1x512xf32>
    %8 = vector.broadcast %7 : vector<1x512xf32> to vector<64x512xf32>
    %9 = arith.addf %6, %8 : vector<64x512xf32>
    %c0_8 = arith.constant 0 : index
    %c0_9 = arith.constant 0 : index
    %10 = vector.load %arg9[%c0_8, %c0_9] : memref<64x512xf32, #tpu.memory_space<vmem>>, vector<64x512xf32>
    tpu.vector_store %arg9[%c0_8, %c0_9], %9 {strides = array<i32>} : memref<64x512xf32, #tpu.memory_space<vmem>>, vector<64x512xf32>,
    %c0_10 = arith.constant 0 : index
    %c0_11 = arith.constant 0 : index
    %11 = vector.load %arg4[%c0_10, %c0_11] : memref<1x512xf32, #tpu.memory_space<vmem>>, vector<1x512xf32>
    %12 = vector.shape_cast %11 : vector<1x512xf32> to vector<1x512xf32>
    %13 = vector.broadcast %12 : vector<1x512xf32> to vector<8x512xf32>
    %cst_12 = arith.constant 0.000000e+00 : f32
    %14 = vector.broadcast %cst_12 : f32 to vector<8x128xf32>
    %cst_13 = arith.constant 0.000000e+00 : f32
    %15 = vector.broadcast %cst_13 : f32 to vector<8x128xf32>
    %cst_14 = arith.constant 0.000000e+00 : f32
    %16 = vector.broadcast %cst_14 : f32 to vector<8x128xf32>
    %cst_15 = arith.constant 0.000000e+00 : f32
    %17 = vector.broadcast %cst_15 : f32 to vector<8x128xf32>
    %c0_16 = arith.constant 0 : index
    %c0_17 = arith.constant 0 : index
    %18 = vector.load %arg9[%c0_16, %c0_17] : memref<64x512xf32, #tpu.memory_space<vmem>>, vector<8x512xf32>
    %c0_18 = arith.constant 0 : index
    %c0_19 = arith.constant 0 : index
    %19 = vector.load %arg2[%c0_18, %c0_19] : memref<128x512xf32, #tpu.memory_space<vmem>>, vector<128x512xf32>
    %cst_20 = arith.constant dense<0.000000e+00> : vector<8x512xf32>
    %20 = tpu.matmul %14, %19, %cst_20 {dimension_numbers = #tpu.dot_dimension_numbers<[1], [0], [0], [1], [0, 0, 1, 1], [], []>} : vector<8x128xf32>, vector<128x512xf32>, vector<8x512xf32> -> vector<8x512xf32>
    %21 = arith.addf %18, %20 : vector<8x512xf32>
    %22 = vector.extract_strided_slice %21 {offsets = [0, 0], sizes = [8, 384], strides = [1, 1]} : vector<8x512xf32> to vector<8x384xf32>
    %23 = arith.negf %22 : vector<8x384xf32>
    %24 = math.exp %23 : vector<8x384xf32>
    %cst_21 = arith.constant 1.000000e+00 : f32
    %25 = vector.broadcast %cst_21 : f32 to vector<8x384xf32>
    %26 = arith.addf %25, %24 : vector<8x384xf32>
    %27 = arith.divf %25, %26 : vector<8x384xf32>
    %28 = vector.extract_strided_slice %27 {offsets = [0, 0], sizes = [8, 128], strides = [1, 1]} : vector<8x384xf32> to vector<8x128xf32>
    %29 = vector.extract_strided_slice %27 {offsets = [0, 128], sizes = [8, 128], strides = [1, 1]} : vector<8x384xf32> to vector<8x128xf32>
    %30 = vector.extract_strided_slice %27 {offsets = [0, 256], sizes = [8, 128], strides = [1, 1]} : vector<8x384xf32> to vector<8x128xf32>
    %31 = vector.extract_strided_slice %21 {offsets = [0, 384], sizes = [8, 128], strides = [1, 1]} : vector<8x512xf32> to vector<8x128xf32>
    %32 = math.tanh %31 : vector<8x128xf32>
    %33 = arith.mulf %29, %16 : vector<8x128xf32>
    %34 = arith.mulf %28, %32 : vector<8x128xf32>
    %35 = arith.addf %33, %34 : vector<8x128xf32>
    %36 = math.tanh %35 : vector<8x128xf32>
    %37 = arith.mulf %30, %36 : vector<8x128xf32>
    %c0_i32_22 = arith.constant 0 : i32
    %c0_i32_23 = arith.constant 0 : i32
    %c0_i32_24 = arith.constant 0 : i32
    %c0_i32_25 = arith.constant 0 : i32
    %38 = tpu.memref_slice %arg10[%c0_i32_22, %c0_i32_24, %c0_i32_25] : memref<1x256x512xf32, #tpu.memory_space<vmem>> -> memref<1x256x512xf32, #tpu.memory_space<vmem>>
    %39 = tpu.memref_squeeze %38 : memref<1x256x512xf32, #tpu.memory_space<vmem>> -> memref<256x512xf32, #tpu.memory_space<vmem>>
    %40 = tpu.memref_slice %arg11[%c0_i32_23] : memref<1x!tpu.dma_semaphore, #tpu.memory_space<semaphore_mem>> -> memref<1x!tpu.dma_semaphore, #tpu.memory_space<semaphore_mem>>
    %41 = tpu.memref_squeeze %40 : memref<1x!tpu.dma_semaphore, #tpu.memory_space<semaphore_mem>> -> memref<!tpu.dma_semaphore, #tpu.memory_space<semaphore_mem>>
    tpu.wait_dma2 semaphore(%41 : memref<!tpu.dma_semaphore, #tpu.memory_space<semaphore_mem>>) src(%arg5 : memref<256x512xf32, #tpu.memory_space<any>>) dst(%39 : memref<256x512xf32, #tpu.memory_space<vmem>>)
    %42 = tpu.concatenate %37, %15 in 1 : vector<8x128xf32>, vector<8x128xf32> -> vector<8x256xf32>
    %c0_26 = arith.constant 0 : index
    %c0_27 = arith.constant 0 : index
    %c0_28 = arith.constant 0 : index
    %43 = vector.load %arg10[%c0_26, %c0_27, %c0_28] : memref<1x256x512xf32, #tpu.memory_space<vmem>>, vector<1x256x512xf32>
    %44 = vector.shape_cast %43 : vector<1x256x512xf32> to vector<256x512xf32>
    %cst_29 = arith.constant dense<0.000000e+00> : vector<8x512xf32>
    %45 = tpu.matmul %42, %44, %cst_29 {dimension_numbers = #tpu.dot_dimension_numbers<[1], [0], [0], [1], [0, 0, 1, 1], [], []>} : vector<8x256xf32>, vector<256x512xf32>, vector<8x512xf32> -> vector<8x512xf32>
    %46 = arith.addf %45, %13 : vector<8x512xf32>
    %47 = vector.extract_strided_slice %46 {offsets = [0, 0], sizes = [8, 384], strides = [1, 1]} : vector<8x512xf32> to vector<8x384xf32>
    %48 = arith.negf %47 : vector<8x384xf32>
    %49 = math.exp %48 : vector<8x384xf32>
    %cst_30 = arith.constant 1.000000e+00 : f32
    %50 = vector.broadcast %cst_30 : f32 to vector<8x384xf32>
    %51 = arith.addf %50, %49 : vector<8x384xf32>
    %52 = arith.divf %50, %51 : vector<8x384xf32>
    %53 = vector.extract_strided_slice %52 {offsets = [0, 0], sizes = [8, 128], strides = [1, 1]} : vector<8x384xf32> to vector<8x128xf32>
    %54 = vector.extract_strided_slice %52 {offsets = [0, 128], sizes = [8, 128], strides = [1, 1]} : vector<8x384xf32> to vector<8x128xf32>
    %55 = vector.extract_strided_slice %52 {offsets = [0, 256], sizes = [8, 128], strides = [1, 1]} : vector<8x384xf32> to vector<8x128xf32>
    %56 = vector.extract_strided_slice %46 {offsets = [0, 384], sizes = [8, 128], strides = [1, 1]} : vector<8x512xf32> to vector<8x128xf32>
    %57 = math.tanh %56 : vector<8x128xf32>
    %58 = arith.mulf %54, %17 : vector<8x128xf32>
    %59 = arith.mulf %53, %57 : vector<8x128xf32>
    %60 = arith.addf %58, %59 : vector<8x128xf32>
    %61 = math.tanh %60 : vector<8x128xf32>
    %62 = arith.mulf %55, %61 : vector<8x128xf32>
    %c8 = arith.constant 8 : index
    %c0_31 = arith.constant 0 : index
    %63 = vector.load %arg9[%c8, %c0_31] : memref<64x512xf32, #tpu.memory_space<vmem>>, vector<8x512xf32>
    %c0_32 = arith.constant 0 : index
    %c0_33 = arith.constant 0 : index
    %64 = vector.load %arg2[%c0_32, %c0_33] : memref<128x512xf32, #tpu.memory_space<vmem>>, vector<128x512xf32>
    %cst_34 = arith.constant dense<0.000000e+00> : vector<8x512xf32>
    %65 = tpu.matmul %37, %64, %cst_34 {dimension_numbers = #tpu.dot_dimension_numbers<[1], [0], [0], [1], [0, 0, 1, 1], [], []>} : vector<8x128xf32>, vector<128x512xf32>, vector<8x512xf32> -> vector<8x512xf32>
    %66 = arith.addf %63, %65 : vector<8x512xf32>
    %67 = vector.extract_strided_slice %66 {offsets = [0, 0], sizes = [8, 384], strides = [1, 1]} : vector<8x512xf32> to vector<8x384xf32>
    %68 = arith.negf %67 : vector<8x384xf32>
    %69 = math.exp %68 : vector<8x384xf32>
    %cst_35 = arith.constant 1.000000e+00 : f32
    %70 = vector.broadcast %cst_35 : f32 to vector<8x384xf32>
    %71 = arith.addf %70, %69 : vector<8x384xf32>
    %72 = arith.divf %70, %71 : vector<8x384xf32>
    %73 = vector.extract_strided_slice %72 {offsets = [0, 0], sizes = [8, 128], strides = [1, 1]} : vector<8x384xf32> to vector<8x128xf32>
    %74 = vector.extract_strided_slice %72 {offsets = [0, 128], sizes = [8, 128], strides = [1, 1]} : vector<8x384xf32> to vector<8x128xf32>
    %75 = vector.extract_strided_slice %72 {offsets = [0, 256], sizes = [8, 128], strides = [1, 1]} : vector<8x384xf32> to vector<8x128xf32>
    %76 = vector.extract_strided_slice %66 {offsets = [0, 384], sizes = [8, 128], strides = [1, 1]} : vector<8x512xf32> to vector<8x128xf32>
    %77 = math.tanh %76 : vector<8x128xf32>
    %78 = arith.mulf %74, %35 : vector<8x128xf32>
    %79 = arith.mulf %73, %77 : vector<8x128xf32>
    %80 = arith.addf %78, %79 : vector<8x128xf32>
    %81 = math.tanh %80 : vector<8x128xf32>
    %82 = arith.mulf %75, %81 : vector<8x128xf32>
    %83 = tpu.concatenate %82, %62 in 1 : vector<8x128xf32>, vector<8x128xf32> -> vector<8x256xf32>
    %c0_36 = arith.constant 0 : index
    %c0_37 = arith.constant 0 : index
    %c0_38 = arith.constant 0 : index
    %84 = vector.load %arg10[%c0_36, %c0_37, %c0_38] : memref<1x256x512xf32, #tpu.memory_space<vmem>>, vector<1x256x512xf32>
    %85 = vector.shape_cast %84 : vector<1x256x512xf32> to vector<256x512xf32>
    %cst_39 = arith.constant dense<0.000000e+00> : vector<8x512xf32>
    %86 = tpu.matmul %83, %85, %cst_39 {dimension_numbers = #tpu.dot_dimension_numbers<[1], [0], [0], [1], [0, 0, 1, 1], [], []>} : vector<8x256xf32>, vector<256x512xf32>, vector<8x512xf32> -> vector<8x512xf32>
    %87 = arith.addf %86, %13 : vector<8x512xf32>
    %88 = vector.extract_strided_slice %87 {offsets = [0, 0], sizes = [8, 384], strides = [1, 1]} : vector<8x512xf32> to vector<8x384xf32>
    %89 = arith.negf %88 : vector<8x384xf32>
    %90 = math.exp %89 : vector<8x384xf32>
    %cst_40 = arith.constant 1.000000e+00 : f32
    %91 = vector.broadcast %cst_40 : f32 to vector<8x384xf32>
    %92 = arith.addf %91, %90 : vector<8x384xf32>
    %93 = arith.divf %91, %92 : vector<8x384xf32>
    %94 = vector.extract_strided_slice %93 {offsets = [0, 0], sizes = [8, 128], strides = [1, 1]} : vector<8x384xf32> to vector<8x128xf32>
    %95 = vector.extract_strided_slice %93 {offsets = [0, 128], sizes = [8, 128], strides = [1, 1]} : vector<8x384xf32> to vector<8x128xf32>
    %96 = vector.extract_strided_slice %93 {offsets = [0, 256], sizes = [8, 128], strides = [1, 1]} : vector<8x384xf32> to vector<8x128xf32>
    %97 = vector.extract_strided_slice %87 {offsets = [0, 384], sizes = [8, 128], strides = [1, 1]} : vector<8x512xf32> to vector<8x128xf32>
    %98 = math.tanh %97 : vector<8x128xf32>
    %99 = arith.mulf %95, %60 : vector<8x128xf32>
    %100 = arith.mulf %94, %98 : vector<8x128xf32>
    %101 = arith.addf %99, %100 : vector<8x128xf32>
    %102 = math.tanh %101 : vector<8x128xf32>
    %103 = arith.mulf %96, %102 : vector<8x128xf32>
    %c16 = arith.constant 16 : index
    %c0_41 = arith.constant 0 : index
    %104 = vector.load %arg9[%c16, %c0_41] : memref<64x512xf32, #tpu.memory_space<vmem>>, vector<8x512xf32>
    %c0_42 = arith.constant 0 : index
    %c0_43 = arith.constant 0 : index
    %105 = vector.load %arg2[%c0_42, %c0_43] : memref<128x512xf32, #tpu.memory_space<vmem>>, vector<128x512xf32>
    %cst_44 = arith.constant dense<0.000000e+00> : vector<8x512xf32>
    %106 = tpu.matmul %82, %105, %cst_44 {dimension_numbers = #tpu.dot_dimension_numbers<[1], [0], [0], [1], [0, 0, 1, 1], [], []>} : vector<8x128xf32>, vector<128x512xf32>, vector<8x512xf32> -> vector<8x512xf32>
    %107 = arith.addf %104, %106 : vector<8x512xf32>
    %108 = vector.extract_strided_slice %107 {offsets = [0, 0], sizes = [8, 384], strides = [1, 1]} : vector<8x512xf32> to vector<8x384xf32>
    %109 = arith.negf %108 : vector<8x384xf32>
    %110 = math.exp %109 : vector<8x384xf32>
    %cst_45 = arith.constant 1.000000e+00 : f32
    %111 = vector.broadcast %cst_45 : f32 to vector<8x384xf32>
    %112 = arith.addf %111, %110 : vector<8x384xf32>
    %113 = arith.divf %111, %112 : vector<8x384xf32>
    %114 = vector.extract_strided_slice %113 {offsets = [0, 0], sizes = [8, 128], strides = [1, 1]} : vector<8x384xf32> to vector<8x128xf32>
    %115 = vector.extract_strided_slice %113 {offsets = [0, 128], sizes = [8, 128], strides = [1, 1]} : vector<8x384xf32> to vector<8x128xf32>
    %116 = vector.extract_strided_slice %113 {offsets = [0, 256], sizes = [8, 128], strides = [1, 1]} : vector<8x384xf32> to vector<8x128xf32>
    %117 = vector.extract_strided_slice %107 {offsets = [0, 384], sizes = [8, 128], strides = [1, 1]} : vector<8x512xf32> to vector<8x128xf32>
    %118 = math.tanh %117 : vector<8x128xf32>
    %119 = arith.mulf %115, %80 : vector<8x128xf32>
    %120 = arith.mulf %114, %118 : vector<8x128xf32>
    %121 = arith.addf %119, %120 : vector<8x128xf32>
    %122 = math.tanh %121 : vector<8x128xf32>
    %123 = arith.mulf %116, %122 : vector<8x128xf32>
    %124 = tpu.concatenate %123, %103 in 1 : vector<8x128xf32>, vector<8x128xf32> -> vector<8x256xf32>
    %c0_46 = arith.constant 0 : index
    %c0_47 = arith.constant 0 : index
    %c0_48 = arith.constant 0 : index
    %125 = vector.load %arg10[%c0_46, %c0_47, %c0_48] : memref<1x256x512xf32, #tpu.memory_space<vmem>>, vector<1x256x512xf32>
    %126 = vector.shape_cast %125 : vector<1x256x512xf32> to vector<256x512xf32>
    %cst_49 = arith.constant dense<0.000000e+00> : vector<8x512xf32>
    %127 = tpu.matmul %124, %126, %cst_49 {dimension_numbers = #tpu.dot_dimension_numbers<[1], [0], [0], [1], [0, 0, 1, 1], [], []>} : vector<8x256xf32>, vector<256x512xf32>, vector<8x512xf32> -> vector<8x512xf32>
    %128 = arith.addf %127, %13 : vector<8x512xf32>
    %129 = vector.extract_strided_slice %128 {offsets = [0, 0], sizes = [8, 384], strides = [1, 1]} : vector<8x512xf32> to vector<8x384xf32>
    %130 = arith.negf %129 : vector<8x384xf32>
    %131 = math.exp %130 : vector<8x384xf32>
    %cst_50 = arith.constant 1.000000e+00 : f32
    %132 = vector.broadcast %cst_50 : f32 to vector<8x384xf32>
    %133 = arith.addf %132, %131 : vector<8x384xf32>
    %134 = arith.divf %132, %133 : vector<8x384xf32>
    %135 = vector.extract_strided_slice %134 {offsets = [0, 0], sizes = [8, 128], strides = [1, 1]} : vector<8x384xf32> to vector<8x128xf32>
    %136 = vector.extract_strided_slice %134 {offsets = [0, 128], sizes = [8, 128], strides = [1, 1]} : vector<8x384xf32> to vector<8x128xf32>
    %137 = vector.extract_strided_slice %134 {offsets = [0, 256], sizes = [8, 128], strides = [1, 1]} : vector<8x384xf32> to vector<8x128xf32>
    %138 = vector.extract_strided_slice %128 {offsets = [0, 384], sizes = [8, 128], strides = [1, 1]} : vector<8x512xf32> to vector<8x128xf32>
    %139 = math.tanh %138 : vector<8x128xf32>
    %140 = arith.mulf %136, %101 : vector<8x128xf32>
    %141 = arith.mulf %135, %139 : vector<8x128xf32>
    %142 = arith.addf %140, %141 : vector<8x128xf32>
    %143 = math.tanh %142 : vector<8x128xf32>
    %144 = arith.mulf %137, %143 : vector<8x128xf32>
    %c24 = arith.constant 24 : index
    %c0_51 = arith.constant 0 : index
    %145 = vector.load %arg9[%c24, %c0_51] : memref<64x512xf32, #tpu.memory_space<vmem>>, vector<8x512xf32>
    %c0_52 = arith.constant 0 : index
    %c0_53 = arith.constant 0 : index
    %146 = vector.load %arg2[%c0_52, %c0_53] : memref<128x512xf32, #tpu.memory_space<vmem>>, vector<128x512xf32>
    %cst_54 = arith.constant dense<0.000000e+00> : vector<8x512xf32>
    %147 = tpu.matmul %123, %146, %cst_54 {dimension_numbers = #tpu.dot_dimension_numbers<[1], [0], [0], [1], [0, 0, 1, 1], [], []>} : vector<8x128xf32>, vector<128x512xf32>, vector<8x512xf32> -> vector<8x512xf32>
    %148 = arith.addf %145, %147 : vector<8x512xf32>
    %149 = vector.extract_strided_slice %148 {offsets = [0, 0], sizes = [8, 384], strides = [1, 1]} : vector<8x512xf32> to vector<8x384xf32>
    %150 = arith.negf %149 : vector<8x384xf32>
    %151 = math.exp %150 : vector<8x384xf32>
    %cst_55 = arith.constant 1.000000e+00 : f32
    %152 = vector.broadcast %cst_55 : f32 to vector<8x384xf32>
    %153 = arith.addf %152, %151 : vector<8x384xf32>
    %154 = arith.divf %152, %153 : vector<8x384xf32>
    %155 = vector.extract_strided_slice %154 {offsets = [0, 0], sizes = [8, 128], strides = [1, 1]} : vector<8x384xf32> to vector<8x128xf32>
    %156 = vector.extract_strided_slice %154 {offsets = [0, 128], sizes = [8, 128], strides = [1, 1]} : vector<8x384xf32> to vector<8x128xf32>
    %157 = vector.extract_strided_slice %154 {offsets = [0, 256], sizes = [8, 128], strides = [1, 1]} : vector<8x384xf32> to vector<8x128xf32>
    %158 = vector.extract_strided_slice %148 {offsets = [0, 384], sizes = [8, 128], strides = [1, 1]} : vector<8x512xf32> to vector<8x128xf32>
    %159 = math.tanh %158 : vector<8x128xf32>
    %160 = arith.mulf %156, %121 : vector<8x128xf32>
    %161 = arith.mulf %155, %159 : vector<8x128xf32>
    %162 = arith.addf %160, %161 : vector<8x128xf32>
    %163 = math.tanh %162 : vector<8x128xf32>
    %164 = arith.mulf %157, %163 : vector<8x128xf32>
    %165 = tpu.concatenate %164, %144 in 1 : vector<8x128xf32>, vector<8x128xf32> -> vector<8x256xf32>
    %c0_56 = arith.constant 0 : index
    %c0_57 = arith.constant 0 : index
    %c0_58 = arith.constant 0 : index
    %166 = vector.load %arg10[%c0_56, %c0_57, %c0_58] : memref<1x256x512xf32, #tpu.memory_space<vmem>>, vector<1x256x512xf32>
    %167 = vector.shape_cast %166 : vector<1x256x512xf32> to vector<256x512xf32>
    %cst_59 = arith.constant dense<0.000000e+00> : vector<8x512xf32>
    %168 = tpu.matmul %165, %167, %cst_59 {dimension_numbers = #tpu.dot_dimension_numbers<[1], [0], [0], [1], [0, 0, 1, 1], [], []>} : vector<8x256xf32>, vector<256x512xf32>, vector<8x512xf32> -> vector<8x512xf32>
    %169 = arith.addf %168, %13 : vector<8x512xf32>
    %170 = vector.extract_strided_slice %169 {offsets = [0, 0], sizes = [8, 384], strides = [1, 1]} : vector<8x512xf32> to vector<8x384xf32>
    %171 = arith.negf %170 : vector<8x384xf32>
    %172 = math.exp %171 : vector<8x384xf32>
    %cst_60 = arith.constant 1.000000e+00 : f32
    %173 = vector.broadcast %cst_60 : f32 to vector<8x384xf32>
    %174 = arith.addf %173, %172 : vector<8x384xf32>
    %175 = arith.divf %173, %174 : vector<8x384xf32>
    %176 = vector.extract_strided_slice %175 {offsets = [0, 0], sizes = [8, 128], strides = [1, 1]} : vector<8x384xf32> to vector<8x128xf32>
    %177 = vector.extract_strided_slice %175 {offsets = [0, 128], sizes = [8, 128], strides = [1, 1]} : vector<8x384xf32> to vector<8x128xf32>
    %178 = vector.extract_strided_slice %175 {offsets = [0, 256], sizes = [8, 128], strides = [1, 1]} : vector<8x384xf32> to vector<8x128xf32>
    %179 = vector.extract_strided_slice %169 {offsets = [0, 384], sizes = [8, 128], strides = [1, 1]} : vector<8x512xf32> to vector<8x128xf32>
    %180 = math.tanh %179 : vector<8x128xf32>
    %181 = arith.mulf %177, %142 : vector<8x128xf32>
    %182 = arith.mulf %176, %180 : vector<8x128xf32>
    %183 = arith.addf %181, %182 : vector<8x128xf32>
    %184 = math.tanh %183 : vector<8x128xf32>
    %185 = arith.mulf %178, %184 : vector<8x128xf32>
    %c32 = arith.constant 32 : index
    %c0_61 = arith.constant 0 : index
    %186 = vector.load %arg9[%c32, %c0_61] : memref<64x512xf32, #tpu.memory_space<vmem>>, vector<8x512xf32>
    %c0_62 = arith.constant 0 : index
    %c0_63 = arith.constant 0 : index
    %187 = vector.load %arg2[%c0_62, %c0_63] : memref<128x512xf32, #tpu.memory_space<vmem>>, vector<128x512xf32>
    %cst_64 = arith.constant dense<0.000000e+00> : vector<8x512xf32>
    %188 = tpu.matmul %164, %187, %cst_64 {dimension_numbers = #tpu.dot_dimension_numbers<[1], [0], [0], [1], [0, 0, 1, 1], [], []>} : vector<8x128xf32>, vector<128x512xf32>, vector<8x512xf32> -> vector<8x512xf32>
    %189 = arith.addf %186, %188 : vector<8x512xf32>
    %190 = vector.extract_strided_slice %189 {offsets = [0, 0], sizes = [8, 384], strides = [1, 1]} : vector<8x512xf32> to vector<8x384xf32>
    %191 = arith.negf %190 : vector<8x384xf32>
    %192 = math.exp %191 : vector<8x384xf32>
    %cst_65 = arith.constant 1.000000e+00 : f32
    %193 = vector.broadcast %cst_65 : f32 to vector<8x384xf32>
    %194 = arith.addf %193, %192 : vector<8x384xf32>
    %195 = arith.divf %193, %194 : vector<8x384xf32>
    %196 = vector.extract_strided_slice %195 {offsets = [0, 0], sizes = [8, 128], strides = [1, 1]} : vector<8x384xf32> to vector<8x128xf32>
    %197 = vector.extract_strided_slice %195 {offsets = [0, 128], sizes = [8, 128], strides = [1, 1]} : vector<8x384xf32> to vector<8x128xf32>
    %198 = vector.extract_strided_slice %195 {offsets = [0, 256], sizes = [8, 128], strides = [1, 1]} : vector<8x384xf32> to vector<8x128xf32>
    %199 = vector.extract_strided_slice %189 {offsets = [0, 384], sizes = [8, 128], strides = [1, 1]} : vector<8x512xf32> to vector<8x128xf32>
    %200 = math.tanh %199 : vector<8x128xf32>
    %201 = arith.mulf %197, %162 : vector<8x128xf32>
    %202 = arith.mulf %196, %200 : vector<8x128xf32>
    %203 = arith.addf %201, %202 : vector<8x128xf32>
    %204 = math.tanh %203 : vector<8x128xf32>
    %205 = arith.mulf %198, %204 : vector<8x128xf32>
    %206 = tpu.concatenate %205, %185 in 1 : vector<8x128xf32>, vector<8x128xf32> -> vector<8x256xf32>
    %c0_66 = arith.constant 0 : index
    %c0_67 = arith.constant 0 : index
    %c0_68 = arith.constant 0 : index
    %207 = vector.load %arg10[%c0_66, %c0_67, %c0_68] : memref<1x256x512xf32, #tpu.memory_space<vmem>>, vector<1x256x512xf32>
    %208 = vector.shape_cast %207 : vector<1x256x512xf32> to vector<256x512xf32>
    %cst_69 = arith.constant dense<0.000000e+00> : vector<8x512xf32>
    %209 = tpu.matmul %206, %208, %cst_69 {dimension_numbers = #tpu.dot_dimension_numbers<[1], [0], [0], [1], [0, 0, 1, 1], [], []>} : vector<8x256xf32>, vector<256x512xf32>, vector<8x512xf32> -> vector<8x512xf32>
    %210 = arith.addf %209, %13 : vector<8x512xf32>
    %211 = vector.extract_strided_slice %210 {offsets = [0, 0], sizes = [8, 384], strides = [1, 1]} : vector<8x512xf32> to vector<8x384xf32>
    %212 = arith.negf %211 : vector<8x384xf32>
    %213 = math.exp %212 : vector<8x384xf32>
    %cst_70 = arith.constant 1.000000e+00 : f32
    %214 = vector.broadcast %cst_70 : f32 to vector<8x384xf32>
    %215 = arith.addf %214, %213 : vector<8x384xf32>
    %216 = arith.divf %214, %215 : vector<8x384xf32>
    %217 = vector.extract_strided_slice %216 {offsets = [0, 0], sizes = [8, 128], strides = [1, 1]} : vector<8x384xf32> to vector<8x128xf32>
    %218 = vector.extract_strided_slice %216 {offsets = [0, 128], sizes = [8, 128], strides = [1, 1]} : vector<8x384xf32> to vector<8x128xf32>
    %219 = vector.extract_strided_slice %216 {offsets = [0, 256], sizes = [8, 128], strides = [1, 1]} : vector<8x384xf32> to vector<8x128xf32>
    %220 = vector.extract_strided_slice %210 {offsets = [0, 384], sizes = [8, 128], strides = [1, 1]} : vector<8x512xf32> to vector<8x128xf32>
    %221 = math.tanh %220 : vector<8x128xf32>
    %222 = arith.mulf %218, %183 : vector<8x128xf32>
    %223 = arith.mulf %217, %221 : vector<8x128xf32>
    %224 = arith.addf %222, %223 : vector<8x128xf32>
    %225 = math.tanh %224 : vector<8x128xf32>
    %226 = arith.mulf %219, %225 : vector<8x128xf32>
    %c40 = arith.constant 40 : index
    %c0_71 = arith.constant 0 : index
    %227 = vector.load %arg9[%c40, %c0_71] : memref<64x512xf32, #tpu.memory_space<vmem>>, vector<8x512xf32>
    %c0_72 = arith.constant 0 : index
    %c0_73 = arith.constant 0 : index
    %228 = vector.load %arg2[%c0_72, %c0_73] : memref<128x512xf32, #tpu.memory_space<vmem>>, vector<128x512xf32>
    %cst_74 = arith.constant dense<0.000000e+00> : vector<8x512xf32>
    %229 = tpu.matmul %205, %228, %cst_74 {dimension_numbers = #tpu.dot_dimension_numbers<[1], [0], [0], [1], [0, 0, 1, 1], [], []>} : vector<8x128xf32>, vector<128x512xf32>, vector<8x512xf32> -> vector<8x512xf32>
    %230 = arith.addf %227, %229 : vector<8x512xf32>
    %231 = vector.extract_strided_slice %230 {offsets = [0, 0], sizes = [8, 384], strides = [1, 1]} : vector<8x512xf32> to vector<8x384xf32>
    %232 = arith.negf %231 : vector<8x384xf32>
    %233 = math.exp %232 : vector<8x384xf32>
    %cst_75 = arith.constant 1.000000e+00 : f32
    %234 = vector.broadcast %cst_75 : f32 to vector<8x384xf32>
    %235 = arith.addf %234, %233 : vector<8x384xf32>
    %236 = arith.divf %234, %235 : vector<8x384xf32>
    %237 = vector.extract_strided_slice %236 {offsets = [0, 0], sizes = [8, 128], strides = [1, 1]} : vector<8x384xf32> to vector<8x128xf32>
    %238 = vector.extract_strided_slice %236 {offsets = [0, 128], sizes = [8, 128], strides = [1, 1]} : vector<8x384xf32> to vector<8x128xf32>
    %239 = vector.extract_strided_slice %236 {offsets = [0, 256], sizes = [8, 128], strides = [1, 1]} : vector<8x384xf32> to vector<8x128xf32>
    %240 = vector.extract_strided_slice %230 {offsets = [0, 384], sizes = [8, 128], strides = [1, 1]} : vector<8x512xf32> to vector<8x128xf32>
    %241 = math.tanh %240 : vector<8x128xf32>
    %242 = arith.mulf %238, %203 : vector<8x128xf32>
    %243 = arith.mulf %237, %241 : vector<8x128xf32>
    %244 = arith.addf %242, %243 : vector<8x128xf32>
    %245 = math.tanh %244 : vector<8x128xf32>
    %246 = arith.mulf %239, %245 : vector<8x128xf32>
    %247 = tpu.concatenate %246, %226 in 1 : vector<8x128xf32>, vector<8x128xf32> -> vector<8x256xf32>
    %c0_76 = arith.constant 0 : index
    %c0_77 = arith.constant 0 : index
    %c0_78 = arith.constant 0 : index
    %248 = vector.load %arg10[%c0_76, %c0_77, %c0_78] : memref<1x256x512xf32, #tpu.memory_space<vmem>>, vector<1x256x512xf32>
    %249 = vector.shape_cast %248 : vector<1x256x512xf32> to vector<256x512xf32>
    %cst_79 = arith.constant dense<0.000000e+00> : vector<8x512xf32>
    %250 = tpu.matmul %247, %249, %cst_79 {dimension_numbers = #tpu.dot_dimension_numbers<[1], [0], [0], [1], [0, 0, 1, 1], [], []>} : vector<8x256xf32>, vector<256x512xf32>, vector<8x512xf32> -> vector<8x512xf32>
    %251 = arith.addf %250, %13 : vector<8x512xf32>
    %252 = vector.extract_strided_slice %251 {offsets = [0, 0], sizes = [8, 384], strides = [1, 1]} : vector<8x512xf32> to vector<8x384xf32>
    %253 = arith.negf %252 : vector<8x384xf32>
    %254 = math.exp %253 : vector<8x384xf32>
    %cst_80 = arith.constant 1.000000e+00 : f32
    %255 = vector.broadcast %cst_80 : f32 to vector<8x384xf32>
    %256 = arith.addf %255, %254 : vector<8x384xf32>
    %257 = arith.divf %255, %256 : vector<8x384xf32>
    %258 = vector.extract_strided_slice %257 {offsets = [0, 0], sizes = [8, 128], strides = [1, 1]} : vector<8x384xf32> to vector<8x128xf32>
    %259 = vector.extract_strided_slice %257 {offsets = [0, 128], sizes = [8, 128], strides = [1, 1]} : vector<8x384xf32> to vector<8x128xf32>
    %260 = vector.extract_strided_slice %257 {offsets = [0, 256], sizes = [8, 128], strides = [1, 1]} : vector<8x384xf32> to vector<8x128xf32>
    %261 = vector.extract_strided_slice %251 {offsets = [0, 384], sizes = [8, 128], strides = [1, 1]} : vector<8x512xf32> to vector<8x128xf32>
    %262 = math.tanh %261 : vector<8x128xf32>
    %263 = arith.mulf %259, %224 : vector<8x128xf32>
    %264 = arith.mulf %258, %262 : vector<8x128xf32>
    %265 = arith.addf %263, %264 : vector<8x128xf32>
    %266 = math.tanh %265 : vector<8x128xf32>
    %267 = arith.mulf %260, %266 : vector<8x128xf32>
    %c48 = arith.constant 48 : index
    %c0_81 = arith.constant 0 : index
    %268 = vector.load %arg9[%c48, %c0_81] : memref<64x512xf32, #tpu.memory_space<vmem>>, vector<8x512xf32>
    %c0_82 = arith.constant 0 : index
    %c0_83 = arith.constant 0 : index
    %269 = vector.load %arg2[%c0_82, %c0_83] : memref<128x512xf32, #tpu.memory_space<vmem>>, vector<128x512xf32>
    %cst_84 = arith.constant dense<0.000000e+00> : vector<8x512xf32>
    %270 = tpu.matmul %246, %269, %cst_84 {dimension_numbers = #tpu.dot_dimension_numbers<[1], [0], [0], [1], [0, 0, 1, 1], [], []>} : vector<8x128xf32>, vector<128x512xf32>, vector<8x512xf32> -> vector<8x512xf32>
    %271 = arith.addf %268, %270 : vector<8x512xf32>
    %272 = vector.extract_strided_slice %271 {offsets = [0, 0], sizes = [8, 384], strides = [1, 1]} : vector<8x512xf32> to vector<8x384xf32>
    %273 = arith.negf %272 : vector<8x384xf32>
    %274 = math.exp %273 : vector<8x384xf32>
    %cst_85 = arith.constant 1.000000e+00 : f32
    %275 = vector.broadcast %cst_85 : f32 to vector<8x384xf32>
    %276 = arith.addf %275, %274 : vector<8x384xf32>
    %277 = arith.divf %275, %276 : vector<8x384xf32>
    %278 = vector.extract_strided_slice %277 {offsets = [0, 0], sizes = [8, 128], strides = [1, 1]} : vector<8x384xf32> to vector<8x128xf32>
    %279 = vector.extract_strided_slice %277 {offsets = [0, 128], sizes = [8, 128], strides = [1, 1]} : vector<8x384xf32> to vector<8x128xf32>
    %280 = vector.extract_strided_slice %277 {offsets = [0, 256], sizes = [8, 128], strides = [1, 1]} : vector<8x384xf32> to vector<8x128xf32>
    %281 = vector.extract_strided_slice %271 {offsets = [0, 384], sizes = [8, 128], strides = [1, 1]} : vector<8x512xf32> to vector<8x128xf32>
    %282 = math.tanh %281 : vector<8x128xf32>
    %283 = arith.mulf %279, %244 : vector<8x128xf32>
    %284 = arith.mulf %278, %282 : vector<8x128xf32>
    %285 = arith.addf %283, %284 : vector<8x128xf32>
    %286 = math.tanh %285 : vector<8x128xf32>
    %287 = arith.mulf %280, %286 : vector<8x128xf32>
    %288 = tpu.concatenate %287, %267 in 1 : vector<8x128xf32>, vector<8x128xf32> -> vector<8x256xf32>
    %c0_86 = arith.constant 0 : index
    %c0_87 = arith.constant 0 : index
    %c0_88 = arith.constant 0 : index
    %289 = vector.load %arg10[%c0_86, %c0_87, %c0_88] : memref<1x256x512xf32, #tpu.memory_space<vmem>>, vector<1x256x512xf32>
    %290 = vector.shape_cast %289 : vector<1x256x512xf32> to vector<256x512xf32>
    %cst_89 = arith.constant dense<0.000000e+00> : vector<8x512xf32>
    %291 = tpu.matmul %288, %290, %cst_89 {dimension_numbers = #tpu.dot_dimension_numbers<[1], [0], [0], [1], [0, 0, 1, 1], [], []>} : vector<8x256xf32>, vector<256x512xf32>, vector<8x512xf32> -> vector<8x512xf32>
    %292 = arith.addf %291, %13 : vector<8x512xf32>
    %293 = vector.extract_strided_slice %292 {offsets = [0, 0], sizes = [8, 384], strides = [1, 1]} : vector<8x512xf32> to vector<8x384xf32>
    %294 = arith.negf %293 : vector<8x384xf32>
    %295 = math.exp %294 : vector<8x384xf32>
    %cst_90 = arith.constant 1.000000e+00 : f32
    %296 = vector.broadcast %cst_90 : f32 to vector<8x384xf32>
    %297 = arith.addf %296, %295 : vector<8x384xf32>
    %298 = arith.divf %296, %297 : vector<8x384xf32>
    %299 = vector.extract_strided_slice %298 {offsets = [0, 0], sizes = [8, 128], strides = [1, 1]} : vector<8x384xf32> to vector<8x128xf32>
    %300 = vector.extract_strided_slice %298 {offsets = [0, 128], sizes = [8, 128], strides = [1, 1]} : vector<8x384xf32> to vector<8x128xf32>
    %301 = vector.extract_strided_slice %298 {offsets = [0, 256], sizes = [8, 128], strides = [1, 1]} : vector<8x384xf32> to vector<8x128xf32>
    %302 = vector.extract_strided_slice %292 {offsets = [0, 384], sizes = [8, 128], strides = [1, 1]} : vector<8x512xf32> to vector<8x128xf32>
    %303 = math.tanh %302 : vector<8x128xf32>
    %304 = arith.mulf %300, %265 : vector<8x128xf32>
    %305 = arith.mulf %299, %303 : vector<8x128xf32>
    %306 = arith.addf %304, %305 : vector<8x128xf32>
    %307 = math.tanh %306 : vector<8x128xf32>
    %308 = arith.mulf %301, %307 : vector<8x128xf32>
    %c56 = arith.constant 56 : index
    %c0_91 = arith.constant 0 : index
    %309 = vector.load %arg9[%c56, %c0_91] : memref<64x512xf32, #tpu.memory_space<vmem>>, vector<8x512xf32>
    %c0_92 = arith.constant 0 : index
    %c0_93 = arith.constant 0 : index
    %310 = vector.load %arg2[%c0_92, %c0_93] : memref<128x512xf32, #tpu.memory_space<vmem>>, vector<128x512xf32>
    %cst_94 = arith.constant dense<0.000000e+00> : vector<8x512xf32>
    %311 = tpu.matmul %287, %310, %cst_94 {dimension_numbers = #tpu.dot_dimension_numbers<[1], [0], [0], [1], [0, 0, 1, 1], [], []>} : vector<8x128xf32>, vector<128x512xf32>, vector<8x512xf32> -> vector<8x512xf32>
    %312 = arith.addf %309, %311 : vector<8x512xf32>
    %313 = vector.extract_strided_slice %312 {offsets = [0, 0], sizes = [8, 384], strides = [1, 1]} : vector<8x512xf32> to vector<8x384xf32>
    %314 = arith.negf %313 : vector<8x384xf32>
    %315 = math.exp %314 : vector<8x384xf32>
    %cst_95 = arith.constant 1.000000e+00 : f32
    %316 = vector.broadcast %cst_95 : f32 to vector<8x384xf32>
    %317 = arith.addf %316, %315 : vector<8x384xf32>
    %318 = arith.divf %316, %317 : vector<8x384xf32>
    %319 = vector.extract_strided_slice %318 {offsets = [0, 0], sizes = [8, 128], strides = [1, 1]} : vector<8x384xf32> to vector<8x128xf32>
    %320 = vector.extract_strided_slice %318 {offsets = [0, 128], sizes = [8, 128], strides = [1, 1]} : vector<8x384xf32> to vector<8x128xf32>
    %321 = vector.extract_strided_slice %318 {offsets = [0, 256], sizes = [8, 128], strides = [1, 1]} : vector<8x384xf32> to vector<8x128xf32>
    %322 = vector.extract_strided_slice %312 {offsets = [0, 384], sizes = [8, 128], strides = [1, 1]} : vector<8x512xf32> to vector<8x128xf32>
    %323 = math.tanh %322 : vector<8x128xf32>
    %324 = arith.mulf %320, %285 : vector<8x128xf32>
    %325 = arith.mulf %319, %323 : vector<8x128xf32>
    %326 = arith.addf %324, %325 : vector<8x128xf32>
    %327 = math.tanh %326 : vector<8x128xf32>
    %328 = arith.mulf %321, %327 : vector<8x128xf32>
    %329 = tpu.concatenate %328, %308 in 1 : vector<8x128xf32>, vector<8x128xf32> -> vector<8x256xf32>
    %c0_96 = arith.constant 0 : index
    %c0_97 = arith.constant 0 : index
    %c0_98 = arith.constant 0 : index
    %330 = vector.load %arg10[%c0_96, %c0_97, %c0_98] : memref<1x256x512xf32, #tpu.memory_space<vmem>>, vector<1x256x512xf32>
    %331 = vector.shape_cast %330 : vector<1x256x512xf32> to vector<256x512xf32>
    %cst_99 = arith.constant dense<0.000000e+00> : vector<8x512xf32>
    %332 = tpu.matmul %329, %331, %cst_99 {dimension_numbers = #tpu.dot_dimension_numbers<[1], [0], [0], [1], [0, 0, 1, 1], [], []>} : vector<8x256xf32>, vector<256x512xf32>, vector<8x512xf32> -> vector<8x512xf32>
    %333 = arith.addf %332, %13 : vector<8x512xf32>
    %334 = vector.extract_strided_slice %333 {offsets = [0, 0], sizes = [8, 384], strides = [1, 1]} : vector<8x512xf32> to vector<8x384xf32>
    %335 = arith.negf %334 : vector<8x384xf32>
    %336 = math.exp %335 : vector<8x384xf32>
    %cst_100 = arith.constant 1.000000e+00 : f32
    %337 = vector.broadcast %cst_100 : f32 to vector<8x384xf32>
    %338 = arith.addf %337, %336 : vector<8x384xf32>
    %339 = arith.divf %337, %338 : vector<8x384xf32>
    %340 = vector.extract_strided_slice %339 {offsets = [0, 0], sizes = [8, 128], strides = [1, 1]} : vector<8x384xf32> to vector<8x128xf32>
    %341 = vector.extract_strided_slice %339 {offsets = [0, 128], sizes = [8, 128], strides = [1, 1]} : vector<8x384xf32> to vector<8x128xf32>
    %342 = vector.extract_strided_slice %339 {offsets = [0, 256], sizes = [8, 128], strides = [1, 1]} : vector<8x384xf32> to vector<8x128xf32>
    %343 = vector.extract_strided_slice %333 {offsets = [0, 384], sizes = [8, 128], strides = [1, 1]} : vector<8x512xf32> to vector<8x128xf32>
    %344 = math.tanh %343 : vector<8x128xf32>
    %345 = arith.mulf %341, %306 : vector<8x128xf32>
    %346 = arith.mulf %340, %344 : vector<8x128xf32>
    %347 = arith.addf %345, %346 : vector<8x128xf32>
    %348 = math.tanh %347 : vector<8x128xf32>
    %349 = arith.mulf %342, %348 : vector<8x128xf32>
    %350 = tpu.concatenate %62, %103, %144, %185, %226, %267, %308, %349 in 0 : vector<8x128xf32>, vector<8x128xf32>, vector<8x128xf32>, vector<8x128xf32>, vector<8x128xf32>, vector<8x128xf32>, vector<8x128xf32>, vector<8x128xf32> -> vector<64x128xf32>
    %c0_101 = arith.constant 0 : index
    %c0_102 = arith.constant 0 : index
    %351 = vector.load %arg6[%c0_101, %c0_102] : memref<64x128xf32, #tpu.memory_space<vmem>>, vector<64x128xf32>
    tpu.vector_store %arg6[%c0_101, %c0_102], %350 {strides = array<i32>} : memref<64x128xf32, #tpu.memory_space<vmem>>, vector<64x128xf32>,
    %c0_103 = arith.constant 0 : index
    %c0_104 = arith.constant 0 : index
    %c0_105 = arith.constant 0 : index
    %352 = vector.load %arg7[%c0_103, %c0_104, %c0_105] : memref<2x8x128xf32, #tpu.memory_space<vmem>>, vector<1x8x128xf32>
    %353 = vector.shape_cast %352 : vector<1x8x128xf32> to vector<8x128xf32>
    %354 = vector.shape_cast %328 : vector<8x128xf32> to vector<1x8x128xf32>
    tpu.vector_store %arg7[%c0_103, %c0_104, %c0_105], %354 {strides = array<i32>} : memref<2x8x128xf32, #tpu.memory_space<vmem>>, vector<1x8x128xf32>,
    %c0_106 = arith.constant 0 : index
    %c0_107 = arith.constant 0 : index
    %c0_108 = arith.constant 0 : index
    %355 = vector.load %arg8[%c0_106, %c0_107, %c0_108] : memref<2x8x128xf32, #tpu.memory_space<vmem>>, vector<1x8x128xf32>
    %356 = vector.shape_cast %355 : vector<1x8x128xf32> to vector<8x128xf32>
    %357 = vector.shape_cast %326 : vector<8x128xf32> to vector<1x8x128xf32>
    tpu.vector_store %arg8[%c0_106, %c0_107, %c0_108], %357 {strides = array<i32>} : memref<2x8x128xf32, #tpu.memory_space<vmem>>, vector<1x8x128xf32>,
    %c1 = arith.constant 1 : index
    %c0_109 = arith.constant 0 : index
    %c0_110 = arith.constant 0 : index
    %358 = vector.load %arg7[%c1, %c0_109, %c0_110] : memref<2x8x128xf32, #tpu.memory_space<vmem>>, vector<1x8x128xf32>
    %359 = vector.shape_cast %358 : vector<1x8x128xf32> to vector<8x128xf32>
    %360 = vector.shape_cast %349 : vector<8x128xf32> to vector<1x8x128xf32>
    tpu.vector_store %arg7[%c1, %c0_109, %c0_110], %360 {strides = array<i32>} : memref<2x8x128xf32, #tpu.memory_space<vmem>>, vector<1x8x128xf32>,
    %c1_111 = arith.constant 1 : index
    %c0_112 = arith.constant 0 : index
    %c0_113 = arith.constant 0 : index
    %361 = vector.load %arg8[%c1_111, %c0_112, %c0_113] : memref<2x8x128xf32, #tpu.memory_space<vmem>>, vector<1x8x128xf32>
    %362 = vector.shape_cast %361 : vector<1x8x128xf32> to vector<8x128xf32>
    %363 = vector.shape_cast %347 : vector<8x128xf32> to vector<1x8x128xf32>
    tpu.vector_store %arg8[%c1_111, %c0_112, %c0_113], %363 {strides = array<i32>} : memref<2x8x128xf32, #tpu.memory_space<vmem>>, vector<1x8x128xf32>,
    return
  }
}

</mosaic_0001>

<bundles_post_ra>
// kernel: lstm_encoder.1
= control target key start
LH: loop header
LB: loop body
LE: loop exit
PB: predicated region body
PF: predicated region fallthrough
CT: control target
= control target key end

     0   :  { %s8074_s0 = inlined_call_operand.vmem [shape: f32[64,23], index: 0, kind: input, shape index: {}]   ;;  %s8075_s1 = inlined_call_operand.vmem [shape: f32[23,512], index: 1, kind: input, shape index: {}]   ;;  %s8076_s2 = inlined_call_operand.vmem [shape: f32[128,512], index: 2, kind: input, shape index: {}]   ;;  %s8077_s3 = inlined_call_operand.vmem [shape: f32[1,512], index: 3, kind: input, shape index: {}]   ;;  %s8078_s4 = inlined_call_operand.vmem [shape: f32[1,512], index: 4, kind: input, shape index: {}]   ;;  %s8079_s5 = inlined_call_operand.vmem [shape: f32[256,512], index: 5, kind: input, shape index: {}]   ;;  %s8080_s6 = inlined_call_operand.vmem [shape: f32[64,128], index: 6, kind: output, shape index: {0}]   ;;  %s8081_s7 = inlined_call_operand.vmem [shape: f32[2,8,128], index: 7, kind: output, shape index: {1}]   ;;  %s8082_s8 = inlined_call_operand.vmem [shape: f32[2,8,128], index: 8, kind: output, shape index: {2}]  }
   0x1   :  { %v5687_v0 = vld [vmem:[%s8079_s5] sm:$0xff]  ;;  %v5692_v1 = vld [vmem:[%s8079_s5 + $0x8] sm:$0xff]  ;;  %v5697_v2 = vld [vmem:[%s8079_s5 + $0x10] sm:$0xff] }
   0x2   :  { %v5702_v3 = vld [vmem:[%s8079_s5 + $0x18] sm:$0xff]  ;;  %v5707_v4 = vld [vmem:[%s8079_s5 + $0x20] sm:$0xff]  ;;  %v5712_v5 = vld [vmem:[%s8079_s5 + $0x28] sm:$0xff] }
   0x3   :  { %v5717_v6 = vld [vmem:[%s8079_s5 + $0x30] sm:$0xff]  ;;  %v5722_v7 = vld [vmem:[%s8079_s5 + $0x38] sm:$0xff]  ;;  %v5727_v8 = vld [vmem:[%s8079_s5 + $0x40] sm:$0xff] }
   0x4   :  { %v5732_v9 = vld [vmem:[%s8079_s5 + $0x48] sm:$0xff]  ;;  %v5737_v10 = vld [vmem:[%s8079_s5 + $0x50] sm:$0xff]  ;;  %v5742_v11 = vld [vmem:[%s8079_s5 + $0x58] sm:$0xff] }
   0x5   :  { %v5747_v12 = vld [vmem:[%s8079_s5 + $0x60] sm:$0xff]  ;;  %v5752_v13 = vld [vmem:[%s8079_s5 + $0x68] sm:$0xff]  ;;  %v5757_v14 = vld [vmem:[%s8079_s5 + $0x70] sm:$0xff] }
   0x6   :  { %v5762_v15 = vld [vmem:[%s8079_s5 + $0x78] sm:$0xff]  ;;  %v5767_v16 = vld [vmem:[%s8079_s5 + $0x80] sm:$0xff]  ;;  %v5772_v17 = vld [vmem:[%s8079_s5 + $0x88] sm:$0xff] }
   0x7   :  { %v5777_v18 = vld [vmem:[%s8079_s5 + $0x90] sm:$0xff]  ;;  %v5782_v19 = vld [vmem:[%s8079_s5 + $0x98] sm:$0xff]  ;;  %v5787_v20 = vld [vmem:[%s8079_s5 + $0xa0] sm:$0xff] }
   0x8   :  { %v5792_v21 = vld [vmem:[%s8079_s5 + $0xa8] sm:$0xff]  ;;  %v5797_v22 = vld [vmem:[%s8079_s5 + $0xb0] sm:$0xff]  ;;  %v5802_v23 = vld [vmem:[%s8079_s5 + $0xb8] sm:$0xff] }
   0x9   :  { %v5807_v24 = vld [vmem:[%s8079_s5 + $0xc0] sm:$0xff]  ;;  %v5812_v25 = vld [vmem:[%s8079_s5 + $0xc8] sm:$0xff]  ;;  %v5817_v26 = vld [vmem:[%s8079_s5 + $0xd0] sm:$0xff] }
   0xa   :  { %v5822_v27 = vld [vmem:[%s8079_s5 + $0xd8] sm:$0xff]  ;;  %v5827_v28 = vld [vmem:[%s8079_s5 + $0xe0] sm:$0xff]  ;;  %v5832_v29 = vld [vmem:[%s8079_s5 + $0xe8] sm:$0xff] }
   0xb   :  { %v5837_v30 = vld [vmem:[%s8079_s5 + $0xf0] sm:$0xff]  ;;  %v5842_v31 = vld [vmem:[%s8079_s5 + $0xf8] sm:$0xff]  ;;  %v5847_v32 = vld [vmem:[%s8079_s5 + $0x100] sm:$0xff] }
   0xc   :  { %v5852_v33 = vld [vmem:[%s8079_s5 + $0x108] sm:$0xff]  ;;  %v5857_v34 = vld [vmem:[%s8079_s5 + $0x110] sm:$0xff]  ;;  %v5862_v35 = vld [vmem:[%s8079_s5 + $0x118] sm:$0xff] }
   0xd   :  { %v5867_v36 = vld [vmem:[%s8079_s5 + $0x120] sm:$0xff]  ;;  %v5872_v37 = vld [vmem:[%s8079_s5 + $0x128] sm:$0xff]  ;;  %v5877_v38 = vld [vmem:[%s8079_s5 + $0x130] sm:$0xff] }
   0xe   :  { %v5882_v39 = vld [vmem:[%s8079_s5 + $0x138] sm:$0xff]  ;;  %v5887_v40 = vld [vmem:[%s8079_s5 + $0x140] sm:$0xff]  ;;  %v5892_v41 = vld [vmem:[%s8079_s5 + $0x148] sm:$0xff] }
   0xf   :  { %8257 = vst [vmem:[#allocation7_spill] sm:$0xff] %v5887_v40  ;;  %v5897_v42 = vld [vmem:[%s8079_s5 + $0x150] sm:$0xff]  ;;  %v5902_v43 = vld [vmem:[%s8079_s5 + $0x158] sm:$0xff]  ;;  %v5907_v44 = vld [vmem:[%s8079_s5 + $0x160] sm:$0xff] }
  0x10   :  { %8258 = vst [vmem:[#allocation8_spill] sm:$0xff] %v5897_v42  ;;  %8259 = vst [vmem:[#allocation9_spill] sm:$0xff] %v5902_v43  ;;  %v5912_v45 = vld [vmem:[%s8079_s5 + $0x168] sm:$0xff]  ;;  %v5917_v46 = vld [vmem:[%s8079_s5 + $0x170] sm:$0xff] }
  0x11   :  { %8260 = vst [vmem:[#allocation10_spill] sm:$0xff] %v5907_v44  ;;  %8261 = vst [vmem:[#allocation11_spill] sm:$0xff] %v5917_v46  ;;  %v5922_v47 = vld [vmem:[%s8079_s5 + $0x178] sm:$0xff]  ;;  %v5927_v48 = vld [vmem:[%s8079_s5 + $0x180] sm:$0xff] }
  0x12   :  { %8262 = vst [vmem:[#allocation12_spill] sm:$0xff] %v5922_v47  ;;  %8263 = vst [vmem:[#allocation13_spill] sm:$0xff] %v5927_v48  ;;  %v5932_v49 = vld [vmem:[%s8079_s5 + $0x188] sm:$0xff]  ;;  %v5937_v50 = vld [vmem:[%s8079_s5 + $0x190] sm:$0xff] }
  0x13   :  { %8264 = vst [vmem:[#allocation14_spill] sm:$0xff] %v5932_v49  ;;  %8265 = vst [vmem:[#allocation15_spill] sm:$0xff] %v5937_v50  ;;  %v5942_v51 = vld [vmem:[%s8079_s5 + $0x198] sm:$0xff]  ;;  %v5947_v52 = vld [vmem:[%s8079_s5 + $0x1a0] sm:$0xff] }
  0x14   :  { %8266 = vst [vmem:[#allocation16_spill] sm:$0xff] %v5942_v51  ;;  %8267 = vst [vmem:[#allocation17_spill] sm:$0xff] %v5947_v52  ;;  %v5952_v53 = vld [vmem:[%s8079_s5 + $0x1a8] sm:$0xff]  ;;  %v5957_v54 = vld [vmem:[%s8079_s5 + $0x1b0] sm:$0xff] }
  0x15   :  { %8268 = vst [vmem:[#allocation18_spill] sm:$0xff] %v5952_v53  ;;  %8269 = vst [vmem:[#allocation19_spill] sm:$0xff] %v5957_v54  ;;  %v5962_v55 = vld [vmem:[%s8079_s5 + $0x1b8] sm:$0xff]  ;;  %v5967_v56 = vld [vmem:[%s8079_s5 + $0x1c0] sm:$0xff] }
  0x16   :  { %8270 = vst [vmem:[#allocation20_spill] sm:$0xff] %v5962_v55  ;;  %8271 = vst [vmem:[#allocation21_spill] sm:$0xff] %v5967_v56  ;;  %v5972_v57 = vld [vmem:[%s8079_s5 + $0x1c8] sm:$0xff]  ;;  %v5977_v58 = vld [vmem:[%s8079_s5 + $0x1d0] sm:$0xff] }
  0x17   :  { %8272 = vst [vmem:[#allocation22_spill] sm:$0xff] %v5972_v57  ;;  %8273 = vst [vmem:[#allocation23_spill] sm:$0xff] %v5977_v58  ;;  %v5982_v59 = vld [vmem:[%s8079_s5 + $0x1d8] sm:$0xff]  ;;  %v5987_v60 = vld [vmem:[%s8079_s5 + $0x1e0] sm:$0xff] }
  0x18   :  { %8274 = vst [vmem:[#allocation24_spill] sm:$0xff] %v5982_v59  ;;  %8275 = vst [vmem:[#allocation25_spill] sm:$0xff] %v5987_v60  ;;  %v5992_v61 = vld [vmem:[%s8079_s5 + $0x1e8] sm:$0xff]  ;;  %v5997_v62 = vld [vmem:[%s8079_s5 + $0x1f0] sm:$0xff] }
  0x19   :  { %8276 = vst [vmem:[#allocation26_spill] sm:$0xff] %v5992_v61  ;;  %8277 = vst [vmem:[#allocation27_spill] sm:$0xff] %v5997_v62  ;;  %v6002_v63 = vld [vmem:[%s8079_s5 + $0x1f8] sm:$0xff]  ;;  %v6007_v58 = vld [vmem:[%s8079_s5 + $0x200] sm:$0xff] }
  0x1a   :  { %8278 = vst [vmem:[#allocation28_spill] sm:$0xff] %v6002_v63  ;;  %8279 = vst [vmem:[#allocation29_spill] sm:$0xff] %v6007_v58  ;;  %v6012_v60 = vld [vmem:[%s8079_s5 + $0x208] sm:$0xff]  ;;  %v6017_v56 = vld [vmem:[%s8079_s5 + $0x210] sm:$0xff] }
  0x1b   :  { %8280 = vst [vmem:[#allocation30_spill] sm:$0xff] %v6012_v60  ;;  %8281 = vst [vmem:[#allocation31_spill] sm:$0xff] %v6017_v56  ;;  %v6022_v62 = vld [vmem:[%s8079_s5 + $0x218] sm:$0xff]  ;;  %v6027_v63 = vld [vmem:[%s8079_s5 + $0x220] sm:$0xff] }
  0x1c   :  { %8282 = vst [vmem:[#allocation32_spill] sm:$0xff] %v6022_v62  ;;  %8283 = vst [vmem:[#allocation33_spill] sm:$0xff] %v6027_v63  ;;  %v6032_v58 = vld [vmem:[%s8079_s5 + $0x228] sm:$0xff]  ;;  %v6037_v60 = vld [vmem:[%s8079_s5 + $0x230] sm:$0xff] }
  0x1d   :  { %8284 = vst [vmem:[#allocation34_spill] sm:$0xff] %v6032_v58  ;;  %8285 = vst [vmem:[#allocation35_spill] sm:$0xff] %v6037_v60  ;;  %v6042_v56 = vld [vmem:[%s8079_s5 + $0x238] sm:$0xff]  ;;  %v6047_v62 = vld [vmem:[%s8079_s5 + $0x240] sm:$0xff] }
  0x1e   :  { %8286 = vst [vmem:[#allocation36_spill] sm:$0xff] %v6042_v56  ;;  %8287 = vst [vmem:[#allocation37_spill] sm:$0xff] %v6047_v62  ;;  %v6052_v63 = vld [vmem:[%s8079_s5 + $0x248] sm:$0xff]  ;;  %v6057_v58 = vld [vmem:[%s8079_s5 + $0x250] sm:$0xff] }
  0x1f   :  { %8288 = vst [vmem:[#allocation38_spill] sm:$0xff] %v6052_v63  ;;  %8289 = vst [vmem:[#allocation39_spill] sm:$0xff] %v6057_v58  ;;  %v6062_v60 = vld [vmem:[%s8079_s5 + $0x258] sm:$0xff]  ;;  %v6067_v56 = vld [vmem:[%s8079_s5 + $0x260] sm:$0xff] }
  0x20   :  { %8290 = vst [vmem:[#allocation40_spill] sm:$0xff] %v6062_v60  ;;  %8291 = vst [vmem:[#allocation41_spill] sm:$0xff] %v6067_v56  ;;  %v6072_v62 = vld [vmem:[%s8079_s5 + $0x268] sm:$0xff]  ;;  %v6077_v63 = vld [vmem:[%s8079_s5 + $0x270] sm:$0xff] }
  0x21   :  { %8292 = vst [vmem:[#allocation42_spill] sm:$0xff] %v6072_v62  ;;  %8293 = vst [vmem:[#allocation43_spill] sm:$0xff] %v6077_v63  ;;  %v6082_v58 = vld [vmem:[%s8079_s5 + $0x278] sm:$0xff]  ;;  %v6087_v60 = vld [vmem:[%s8079_s5 + $0x280] sm:$0xff] }
  0x22   :  { %8294 = vst [vmem:[#allocation44_spill] sm:$0xff] %v6082_v58  ;;  %8295 = vst [vmem:[#allocation45_spill] sm:$0xff] %v6087_v60  ;;  %v6092_v56 = vld [vmem:[%s8079_s5 + $0x288] sm:$0xff]  ;;  %v6097_v62 = vld [vmem:[%s8079_s5 + $0x290] sm:$0xff] }
  0x23   :  { %8296 = vst [vmem:[#allocation46_spill] sm:$0xff] %v6092_v56  ;;  %8297 = vst [vmem:[#allocation47_spill] sm:$0xff] %v6097_v62  ;;  %v6102_v63 = vld [vmem:[%s8079_s5 + $0x298] sm:$0xff]  ;;  %v6107_v58 = vld [vmem:[%s8079_s5 + $0x2a0] sm:$0xff] }
  0x24   :  { %8298 = vst [vmem:[#allocation48_spill] sm:$0xff] %v6102_v63  ;;  %8299 = vst [vmem:[#allocation49_spill] sm:$0xff] %v6107_v58  ;;  %v6112_v60 = vld [vmem:[%s8079_s5 + $0x2a8] sm:$0xff]  ;;  %v6117_v56 = vld [vmem:[%s8079_s5 + $0x2b0] sm:$0xff] }
  0x25   :  { %8300 = vst [vmem:[#allocation50_spill] sm:$0xff] %v6112_v60  ;;  %8301 = vst [vmem:[#allocation51_spill] sm:$0xff] %v6117_v56  ;;  %v6122_v62 = vld [vmem:[%s8079_s5 + $0x2b8] sm:$0xff]  ;;  %v6127_v63 = vld [vmem:[%s8079_s5 + $0x2c0] sm:$0xff] }
  0x26   :  { %8302 = vst [vmem:[#allocation52_spill] sm:$0xff] %v6122_v62  ;;  %8303 = vst [vmem:[#allocation53_spill] sm:$0xff] %v6127_v63  ;;  %v6132_v58 = vld [vmem:[%s8079_s5 + $0x2c8] sm:$0xff]  ;;  %v6137_v60 = vld [vmem:[%s8079_s5 + $0x2d0] sm:$0xff] }
  0x27   :  { %8304 = vst [vmem:[#allocation54_spill] sm:$0xff] %v6132_v58  ;;  %8305 = vst [vmem:[#allocation55_spill] sm:$0xff] %v6137_v60  ;;  %v6142_v56 = vld [vmem:[%s8079_s5 + $0x2d8] sm:$0xff]  ;;  %v6147_v62 = vld [vmem:[%s8079_s5 + $0x2e0] sm:$0xff] }
  0x28   :  { %8306 = vst [vmem:[#allocation56_spill] sm:$0xff] %v6142_v56  ;;  %8307 = vst [vmem:[#allocation57_spill] sm:$0xff] %v6147_v62  ;;  %v6152_v63 = vld [vmem:[%s8079_s5 + $0x2e8] sm:$0xff]  ;;  %v6157_v58 = vld [vmem:[%s8079_s5 + $0x2f0] sm:$0xff] }
  0x29   :  { %8308 = vst [vmem:[#allocation58_spill] sm:$0xff] %v6152_v63  ;;  %8309 = vst [vmem:[#allocation59_spill] sm:$0xff] %v6157_v58  ;;  %v6162_v60 = vld [vmem:[%s8079_s5 + $0x2f8] sm:$0xff]  ;;  %v6167_v56 = vld [vmem:[%s8079_s5 + $0x300] sm:$0xff] }
  0x2a   :  { %8310 = vst [vmem:[#allocation60_spill] sm:$0xff] %v6162_v60  ;;  %8311 = vst [vmem:[#allocation61_spill] sm:$0xff] %v6167_v56  ;;  %v6172_v62 = vld [vmem:[%s8079_s5 + $0x308] sm:$0xff]  ;;  %v6177_v63 = vld [vmem:[%s8079_s5 + $0x310] sm:$0xff] }
  0x2b   :  { %8312 = vst [vmem:[#allocation62_spill] sm:$0xff] %v6172_v62  ;;  %8313 = vst [vmem:[#allocation63_spill] sm:$0xff] %v6177_v63  ;;  %v6182_v58 = vld [vmem:[%s8079_s5 + $0x318] sm:$0xff]  ;;  %v6187_v60 = vld [vmem:[%s8079_s5 + $0x320] sm:$0xff] }
  0x2c   :  { %8314 = vst [vmem:[#allocation64_spill] sm:$0xff] %v6182_v58  ;;  %8315 = vst [vmem:[#allocation65_spill] sm:$0xff] %v6187_v60  ;;  %v6192_v56 = vld [vmem:[%s8079_s5 + $0x328] sm:$0xff]  ;;  %v6197_v62 = vld [vmem:[%s8079_s5 + $0x330] sm:$0xff] }
  0x2d   :  { %8316 = vst [vmem:[#allocation66_spill] sm:$0xff] %v6192_v56  ;;  %8317 = vst [vmem:[#allocation67_spill] sm:$0xff] %v6197_v62  ;;  %v6202_v63 = vld [vmem:[%s8079_s5 + $0x338] sm:$0xff]  ;;  %v6207_v58 = vld [vmem:[%s8079_s5 + $0x340] sm:$0xff] }
  0x2e   :  { %8318 = vst [vmem:[#allocation68_spill] sm:$0xff] %v6202_v63  ;;  %8319 = vst [vmem:[#allocation69_spill] sm:$0xff] %v6207_v58  ;;  %v6212_v60 = vld [vmem:[%s8079_s5 + $0x348] sm:$0xff]  ;;  %v6217_v56 = vld [vmem:[%s8079_s5 + $0x350] sm:$0xff] }
  0x2f   :  { %8320 = vst [vmem:[#allocation70_spill] sm:$0xff] %v6212_v60  ;;  %8321 = vst [vmem:[#allocation71_spill] sm:$0xff] %v6217_v56  ;;  %v6222_v62 = vld [vmem:[%s8079_s5 + $0x358] sm:$0xff]  ;;  %v6227_v63 = vld [vmem:[%s8079_s5 + $0x360] sm:$0xff] }
  0x30   :  { %8322 = vst [vmem:[#allocation72_spill] sm:$0xff] %v6222_v62  ;;  %8323 = vst [vmem:[#allocation73_spill] sm:$0xff] %v6227_v63  ;;  %v6232_v58 = vld [vmem:[%s8079_s5 + $0x368] sm:$0xff]  ;;  %v6237_v60 = vld [vmem:[%s8079_s5 + $0x370] sm:$0xff] }
  0x31   :  { %8324 = vst [vmem:[#allocation74_spill] sm:$0xff] %v6232_v58  ;;  %8325 = vst [vmem:[#allocation75_spill] sm:$0xff] %v6237_v60  ;;  %v6242_v56 = vld [vmem:[%s8079_s5 + $0x378] sm:$0xff]  ;;  %v6247_v62 = vld [vmem:[%s8079_s5 + $0x380] sm:$0xff] }
  0x32   :  { %8326 = vst [vmem:[#allocation76_spill] sm:$0xff] %v6242_v56  ;;  %8327 = vst [vmem:[#allocation77_spill] sm:$0xff] %v6247_v62  ;;  %v6252_v63 = vld [vmem:[%s8079_s5 + $0x388] sm:$0xff]  ;;  %v6257_v58 = vld [vmem:[%s8079_s5 + $0x390] sm:$0xff] }
  0x33   :  { %8328 = vst [vmem:[#allocation78_spill] sm:$0xff] %v6252_v63  ;;  %8329 = vst [vmem:[#allocation79_spill] sm:$0xff] %v6257_v58  ;;  %v6262_v60 = vld [vmem:[%s8079_s5 + $0x398] sm:$0xff]  ;;  %v6267_v56 = vld [vmem:[%s8079_s5 + $0x3a0] sm:$0xff] }
  0x34   :  { %8330 = vst [vmem:[#allocation80_spill] sm:$0xff] %v6262_v60  ;;  %8331 = vst [vmem:[#allocation81_spill] sm:$0xff] %v6267_v56  ;;  %v6272_v62 = vld [vmem:[%s8079_s5 + $0x3a8] sm:$0xff]  ;;  %v6277_v63 = vld [vmem:[%s8079_s5 + $0x3b0] sm:$0xff] }
  0x35   :  { %8332 = vst [vmem:[#allocation82_spill] sm:$0xff] %v6272_v62  ;;  %8333 = vst [vmem:[#allocation83_spill] sm:$0xff] %v6277_v63  ;;  %v6282_v58 = vld [vmem:[%s8079_s5 + $0x3b8] sm:$0xff]  ;;  %v6287_v60 = vld [vmem:[%s8079_s5 + $0x3c0] sm:$0xff] }
  0x36   :  { %8334 = vst [vmem:[#allocation84_spill] sm:$0xff] %v6282_v58  ;;  %8335 = vst [vmem:[#allocation85_spill] sm:$0xff] %v6287_v60  ;;  %v6292_v56 = vld [vmem:[%s8079_s5 + $0x3c8] sm:$0xff]  ;;  %v6297_v62 = vld [vmem:[%s8079_s5 + $0x3d0] sm:$0xff] }
  0x37   :  { %8336 = vst [vmem:[#allocation86_spill] sm:$0xff] %v6292_v56  ;;  %8337 = vst [vmem:[#allocation87_spill] sm:$0xff] %v6297_v62  ;;  %v6302_v63 = vld [vmem:[%s8079_s5 + $0x3d8] sm:$0xff]  ;;  %v6307_v58 = vld [vmem:[%s8079_s5 + $0x3e0] sm:$0xff] }
  0x38   :  { %8338 = vst [vmem:[#allocation88_spill] sm:$0xff] %v6302_v63  ;;  %8339 = vst [vmem:[#allocation89_spill] sm:$0xff] %v6307_v58  ;;  %v6312_v60 = vld [vmem:[%s8079_s5 + $0x3e8] sm:$0xff]  ;;  %v6317_v56 = vld [vmem:[%s8079_s5 + $0x3f0] sm:$0xff] }
  0x39   :  { %8340 = vst [vmem:[#allocation90_spill] sm:$0xff] %v6312_v60  ;;  %8341 = vst [vmem:[#allocation91_spill] sm:$0xff] %v6317_v56  ;;  %v6322_v62 = vld [vmem:[%s8079_s5 + $0x3f8] sm:$0xff] }
  0x3a   :  { %8342 = vst [vmem:[#allocation92_spill] sm:$0xff] %v6322_v62 }
  0x3b   :  { %319 = vsyncadd [#allocation4], 16384  ;;  %v329_v58 = vld [vmem:[%s8075_s1 + $0x8] sm:$0xff]  ;;  %v331_v59 = vld [vmem:[%s8075_s1 + $0x18] sm:$0xff]  ;;  %v8083_v54 = vmov 0.0   ;;  %vm387_vm0 = vcmask 1046528  }
  0x3c   :  { %v333_v63 = vld [vmem:[%s8075_s1 + $0x28] sm:$0xff]  ;;  %v335_v56 = vld [vmem:[%s8075_s1 + $0x38] sm:$0xff]  ;;  %v328_v62 = vld [vmem:[%s8075_s1] sm:$0xff]  ;;  %464 = vmatprep.mubr.f32.mxu0 %v8083_v54  ;;  %577 = vmatprep.mubr.f32.mxu1 %v8083_v54  ;;  %vm362_vm1 = vcmask 187392  }
  0x3d   :  { %v3771_v60 = vpack.c.bf16 %v333_v63, %v329_v58  ;;  %v3775_v50 = vpack.c.bf16 %v335_v56, %v331_v59  ;;  %v332_v58 = vld [vmem:[%s8075_s1 + $0x20] sm:$0xff]  ;;  %v330_v63 = vld [vmem:[%s8075_s1 + $0x10] sm:$0xff]  ;;  %v337_v54 = vld [vmem:[%s8075_s1 + $0x48] sm:$0x7f] }
  0x3e   :  { %v334_v61 = vld [vmem:[%s8075_s1 + $0x30] sm:$0xff]  ;;  %v3773_v57 = vpack.c.bf16 %v332_v58, %v328_v62  ;;  %v339_v56 = vld [vmem:[%s8075_s1 + $0x58] sm:$0x7f]  ;;  %v336_v59 = vld [vmem:[%s8075_s1 + $0x40] sm:$0x7f] }
  0x3f   :  { %3772 = vmatprep.subr.bf16.mxu0 %v3771_v60  ;;  %v3777_v52 = vpack.c.bf16 %v334_v61, %v330_v63  ;;  %3776 = vmatprep.subr.bf16.mxu1 %v3775_v50  ;;  %v338_v60 = vld [vmem:[%s8075_s1 + $0x50] sm:$0x7f]  ;;  %v685_v61 = vld [vmem:[%s8076_s2 + $0x8] sm:$0xff]  ;;  %v687_v50 = vld [vmem:[%s8076_s2 + $0x18] sm:$0xff] }
  0x40   :  { %3774 = vmatpush1.bf16.msra.mxu0 %v3773_v57  ;;  %v689_v62 = vld [vmem:[%s8076_s2 + $0x28] sm:$0xff]  ;;  %v691_v58 = vld [vmem:[%s8076_s2 + $0x38] sm:$0xff]  ;;  %v688_v57 = vld [vmem:[%s8076_s2 + $0x20] sm:$0xff] }
  0x41   :  { %3778 = vmatpush1.bf16.msra.mxu1 %v3777_v52  ;;  %3700 = vmatprep.subr.msk.mxu0 %vm387_vm0, %v337_v54  ;;  %v684_v52 = vld [vmem:[%s8076_s2] sm:$0xff]  ;;  %v686_v63 = vld [vmem:[%s8076_s2 + $0x10] sm:$0xff]  ;;  %v3779_v54 = vpack.c.bf16 %v689_v62, %v685_v61  ;;  %v3811_v55 = vpack.c.bf16 %v691_v58, %v687_v50  ;;  %v693_v51 = vld [vmem:[%s8076_s2 + $0x48] sm:$0xff] }
  0x42   :  { %3710 = vmatprep.subr.msk.mxu1 %vm387_vm0, %v339_v56  ;;  %v320_v48 = vld [vmem:[%s8074_s0] sm:$0xff]  ;;  %v690_v56 = vld [vmem:[%s8076_s2 + $0x30] sm:$0xff]  ;;  %v3781_v46 = vpack.c.bf16 %v688_v57, %v684_v52  ;;  %v697_v53 = vld [vmem:[%s8076_s2 + $0x68] sm:$0xff] }
  0x43   :  { %v3813_v42 = vpack.c.bf16 %v690_v56, %v686_v63  ;;  %v695_v49 = vld [vmem:[%s8076_s2 + $0x58] sm:$0xff]  ;;  %v692_v62 = vld [vmem:[%s8076_s2 + $0x40] sm:$0xff]  ;;  %v694_v58 = vld [vmem:[%s8076_s2 + $0x50] sm:$0xff]  ;;  %v3783_v52 = vpack.c.bf16 %v697_v53, %v693_v51  ;;  %v8343_v53 = vmov 0.0  }
  0x44   :  { %v699_v61 = vld [vmem:[%s8076_s2 + $0x78] sm:$0xff]  ;;  %3701 = vmatpush1.msk.msra.mxu0 %vm387_vm0, %v336_v59  ;;  %v696_v50 = vld [vmem:[%s8076_s2 + $0x60] sm:$0xff]  ;;  %v698_v59 = vld [vmem:[%s8076_s2 + $0x70] sm:$0xff] }
  0x45   :  { %3711 = vmatpush1.msk.msra.mxu1 %vm387_vm0, %v338_v60  ;;  %3702 = vmatmul.mubr.msk.f32.vlgmr.msra.gmra.mrb[0].mxu0 %vm362_vm1, %v320_v48  ;;  %v321_v60 = vld [vmem:[%s8074_s0 + $0x8] sm:$0xff]  ;;  %v3815_v57 = vpack.c.bf16 %v699_v61, %v695_v49  ;;  %v3785_v56 = vpack.c.bf16 %v696_v50, %v692_v62  ;;  %v3817_v44 = vpack.c.bf16 %v698_v59, %v694_v58  ;;  %v707_v49 = vld [vmem:[%s8076_s2 + $0xb8] sm:$0xff]  ;;  %v700_v51 = vld [vmem:[%s8076_s2 + $0x80] sm:$0xff] }
  0x46   :  { %3712 = vmatmul.mubr.msk.f32.vlgmr.msra.gmra.mrb[0].mxu1 %vm362_vm1, %v320_v48  ;;  %3780 = vmatprep.subr.bf16.mxu0 %v3779_v54  ;;  %v701_v63 = vld [vmem:[%s8076_s2 + $0x88] sm:$0xff]  ;;  %v706_v54 = vld [vmem:[%s8076_s2 + $0xb0] sm:$0xff] }
  0x47   :  { %3812 = vmatprep.subr.bf16.mxu1 %v3811_v55  ;;  %v705_v48 = vld [vmem:[%s8076_s2 + $0xa8] sm:$0xff]  ;;  %3782 = vmatpush1.bf16.msra.mxu0 %v3781_v46  ;;  %v703_v55 = vld [vmem:[%s8076_s2 + $0x98] sm:$0xff]  ;;  %v702_v46 = vld [vmem:[%s8076_s2 + $0x90] sm:$0xff] }
  0x48   :  { %3814 = vmatpush1.bf16.msra.mxu1 %v3813_v42  ;;  %470 = vmatprep.mubr.f32.mxu0 %v8343_v53  ;;  %v704_v42 = vld [vmem:[%s8076_s2 + $0xa0] sm:$0xff]  ;;  %v322_v61 = vld [vmem:[%s8074_s0 + $0x10] sm:$0xff]  ;;  %v3787_v62 = vpack.c.bf16 %v705_v48, %v701_v63  ;;  %v3819_v50 = vpack.c.bf16 %v707_v49, %v703_v55  ;;  %v709_v58 = vld [vmem:[%s8076_s2 + $0xc8] sm:$0xff] }
  0x49   :  { %583 = vmatprep.mubr.f32.mxu1 %v8343_v53  ;;  %3703 = vmatmul.mubr.msk.f32.gmra.mrb[2].mxu0 %vm362_vm1, %v321_v60  ;;  %v713_v59 = vld [vmem:[%s8076_s2 + $0xe8] sm:$0xff]  ;;  %v3789_v40 = vpack.c.bf16 %v704_v42, %v700_v51  ;;  %v708_v63 = vld [vmem:[%s8076_s2 + $0xc0] sm:$0xff]  ;;  %v710_v48 = vld [vmem:[%s8076_s2 + $0xd0] sm:$0xff] }
  0x4a   :  { %3713 = vmatmul.mubr.msk.f32.gmra.mrb[2].mxu1 %vm362_vm1, %v321_v60  ;;  %3784 = vmatprep.subr.bf16.mxu0 %v3783_v52  ;;  %v3821_v60 = vpack.c.bf16 %v706_v54, %v702_v46  ;;  %v711_v52 = vld [vmem:[%s8076_s2 + $0xd8] sm:$0xff]  ;;  %v3791_v49 = vpack.c.bf16 %v713_v59, %v709_v58  ;;  %v717_v42 = vld [vmem:[%s8076_s2 + $0x108] sm:$0xff]  ;;  %v342_v54 = vlaneseq  ;;  %v716_v59 = vld [vmem:[%s8076_s2 + $0x100] sm:$0xff] }
  0x4b   :  { %3816 = vmatprep.subr.bf16.mxu1 %v3815_v57  ;;  %3786 = vmatpush1.bf16.msra.mxu0 %v3785_v56  ;;  %v715_v57 = vld [vmem:[%s8076_s2 + $0xf8] sm:$0xff]  ;;  %v714_v56 = vld [vmem:[%s8076_s2 + $0xf0] sm:$0xff]  ;;  %v721_v46 = vld [vmem:[%s8076_s2 + $0x128] sm:$0xff] }
  0x4c   :  { %3818 = vmatpush1.bf16.msra.mxu1 %v3817_v44  ;;  %476 = vmatprep.mubr.f32.mxu0 %v8343_v53  ;;  %v712_v44 = vld [vmem:[%s8076_s2 + $0xe0] sm:$0xff]  ;;  %v323_v55 = vld [vmem:[%s8074_s0 + $0x18] sm:$0xff]  ;;  %v3823_v51 = vpack.c.bf16 %v715_v57, %v711_v52  ;;  %v722_v52 = vld [vmem:[%s8076_s2 + $0x130] sm:$0xff]  ;;  %v6521_v47 = vshrl.u32 %v342_v54, 7 }
  0x4d   :  { %589 = vmatprep.mubr.f32.mxu1 %v8343_v53  ;;  %3704 = vmatmul.mubr.msk.f32.gmra.mrb[4].mxu0 %vm362_vm1, %v322_v61  ;;  %v723_v58 = vld [vmem:[%s8076_s2 + $0x138] sm:$0xff]  ;;  %v324_v57 = vld [vmem:[%s8074_s0 + $0x20] sm:$0xff]  ;;  %v741_v43 = vld [vmem:[%s8076_s2 + $0x1c8] sm:$0xff] }
  0x4e   :  { %3714 = vmatmul.mubr.msk.f32.gmra.mrb[4].mxu1 %vm362_vm1, %v322_v61  ;;  %3788 = vmatprep.subr.bf16.mxu0 %v3787_v62  ;;  %v3793_v61 = vpack.c.bf16 %v712_v44, %v708_v63  ;;  %v3825_v62 = vpack.c.bf16 %v714_v56, %v710_v48  ;;  %v3795_v63 = vpack.c.bf16 %v721_v46, %v717_v42  ;;  %v725_v48 = vld [vmem:[%s8076_s2 + $0x148] sm:$0xff]  ;;  %v731_v42 = vld [vmem:[%s8076_s2 + $0x178] sm:$0xff]  ;;  %v724_v46 = vld [vmem:[%s8076_s2 + $0x140] sm:$0xff] }
  0x4f   :  { %3820 = vmatprep.subr.bf16.mxu1 %v3819_v50  ;;  %3790 = vmatpush1.bf16.msra.mxu0 %v3789_v40  ;;  %v719_v50 = vld [vmem:[%s8076_s2 + $0x118] sm:$0xff]  ;;  %v720_v40 = vld [vmem:[%s8076_s2 + $0x120] sm:$0xff]  ;;  %v729_v56 = vld [vmem:[%s8076_s2 + $0x168] sm:$0xff] }
  0x50   :  { %3822 = vmatpush1.bf16.msra.mxu1 %v3821_v60  ;;  %482 = vmatprep.mubr.f32.mxu0 %v8343_v53  ;;  %v718_v60 = vld [vmem:[%s8076_s2 + $0x110] sm:$0xff]  ;;  %v3827_v44 = vpack.c.bf16 %v723_v58, %v719_v50  ;;  %v728_v54 = vld [vmem:[%s8076_s2 + $0x160] sm:$0xff]  ;;  %v325_v50 = vld [vmem:[%s8074_s0 + $0x28] sm:$0xff]  ;;  %v3799_v58 = vpack.c.bf16 %v729_v56, %v725_v48 }
  0x51   :  { %595 = vmatprep.mubr.f32.mxu1 %v8343_v53  ;;  %3705 = vmatmul.mubr.msk.f32.gmra.mrb[6].mxu0 %vm362_vm1, %v323_v55  ;;  %v739_v48 = vld [vmem:[%s8076_s2 + $0x1b8] sm:$0xff]  ;;  %v732_v56 = vld [vmem:[%s8076_s2 + $0x180] sm:$0xff] }
  0x52   :  { %3715 = vmatmul.mubr.msk.f32.gmra.mrb[6].mxu1 %vm362_vm1, %v323_v55  ;;  %3792 = vmatprep.subr.bf16.mxu0 %v3791_v49  ;;  %v3797_v55 = vpack.c.bf16 %v720_v40, %v716_v59  ;;  %v3829_v49 = vpack.c.bf16 %v722_v52, %v718_v60  ;;  %v733_v40 = vld [vmem:[%s8076_s2 + $0x188] sm:$0xff]  ;;  %v735_v52 = vld [vmem:[%s8076_s2 + $0x198] sm:$0xff] }
  0x53   :  { %3824 = vmatprep.subr.bf16.mxu1 %v3823_v51  ;;  %3794 = vmatpush1.bf16.msra.mxu0 %v3793_v61  ;;  %v727_v51 = vld [vmem:[%s8076_s2 + $0x158] sm:$0xff]  ;;  %v726_v61 = vld [vmem:[%s8076_s2 + $0x150] sm:$0xff]  ;;  %v737_v60 = vld [vmem:[%s8076_s2 + $0x1a8] sm:$0xff] }
  0x54   :  { %3826 = vmatpush1.bf16.msra.mxu1 %v3825_v62  ;;  %488 = vmatprep.mubr.f32.mxu0 %v8343_v53  ;;  %v730_v62 = vld [vmem:[%s8076_s2 + $0x170] sm:$0xff]  ;;  %v3831_v59 = vpack.c.bf16 %v731_v42, %v727_v51  ;;  %v658_v51 = vld [vmem:[%s8078_s4] sm:$0xf] }
  0x55   :  { %601 = vmatprep.mubr.f32.mxu1 %v8343_v53  ;;  %3706 = vmatmul.mubr.msk.f32.gmra.mrb[8].mxu0 %vm362_vm1, %v324_v57  ;;  %v738_v42 = vld [vmem:[%s8076_s2 + $0x1b0] sm:$0xff] }
  0x56   :  { %3716 = vmatmul.mubr.msk.f32.gmra.mrb[8].mxu1 %vm362_vm1, %v324_v57  ;;  %3796 = vmatprep.subr.bf16.mxu0 %v3795_v63  ;;  %v8085_v57 = vsub.s32 0, %v6521_v47  ;;  %v3801_v63 = vpack.c.bf16 %v728_v54, %v724_v46  ;;  %v326_v54 = vld [vmem:[%s8074_s0 + $0x30] sm:$0xff] }
  0x57   :  { %3828 = vmatprep.subr.bf16.mxu1 %v3827_v44  ;;  %3798 = vmatpush1.bf16.msra.mxu0 %v3797_v55  ;;  %v3833_v44 = vpack.c.bf16 %v730_v62, %v726_v61  ;;  %v736_v55 = vld [vmem:[%s8076_s2 + $0x1a0] sm:$0xff]  ;;  %v3803_v61 = vpack.c.bf16 %v737_v60, %v733_v40  ;;  %v3835_v62 = vpack.c.bf16 %v739_v48, %v735_v52  ;;  %v742_v52 = vld [vmem:[%s8076_s2 + $0x1d0] sm:$0xff] }
  0x58   :  { %3830 = vmatpush1.bf16.msra.mxu1 %v3829_v49  ;;  %494 = vmatprep.mubr.f32.mxu0 %v8343_v53  ;;  %v734_v49 = vld [vmem:[%s8076_s2 + $0x190] sm:$0xff]  ;;  %v6580_v46 = vrot.slane %v658_v51, %v8085_v57  ;;  %v745_v57 = vld [vmem:[%s8076_s2 + $0x1e8] sm:$0xff]  ;;  %v740_v40 = vld [vmem:[%s8076_s2 + $0x1c0] sm:$0xff] }
  0x59   :  { %607 = vmatprep.mubr.f32.mxu1 %v8343_v53  ;;  %3707 = vmatmul.mubr.msk.f32.gmra.mrb[10].mxu0 %vm362_vm1, %v325_v50  ;;  %v744_v60 = vld [vmem:[%s8076_s2 + $0x1e0] sm:$0xff]  ;;  %v3807_v48 = vpack.c.bf16 %v745_v57, %v741_v43  ;;  %v352_v43 = vsub.s32 2, %v6521_v47  ;;  %v348_v57 = vsub.s32 1, %v6521_v47 }
  0x5a   :  { %8344 = vst [vmem:[#allocation93_spill] sm:$0xff] %v6580_v46  ;;  %3717 = vmatmul.mubr.msk.f32.gmra.mrb[10].mxu1 %vm362_vm1, %v325_v50  ;;  %3800 = vmatprep.subr.bf16.mxu0 %v3799_v58  ;;  %v3805_v46 = vpack.c.bf16 %v736_v55, %v732_v56  ;;  %v3837_v50 = vpack.c.bf16 %v738_v42, %v734_v49  ;;  %v743_v58 = vld [vmem:[%s8076_s2 + $0x1d8] sm:$0xff] }
  0x5b   :  { %3832 = vmatprep.subr.bf16.mxu1 %v3831_v59  ;;  %3802 = vmatpush1.bf16.msra.mxu0 %v3801_v63  ;;  %v747_v59 = vld [vmem:[%s8076_s2 + $0x1f8] sm:$0xff]  ;;  %v746_v63 = vld [vmem:[%s8076_s2 + $0x1f0] sm:$0xff]  ;;  %v3809_v55 = vpack.c.bf16 %v744_v60, %v740_v40  ;;  %v6628_v42 = vrot.slane %v658_v51, %v352_v43 }
  0x5c   :  { %3834 = vmatpush1.bf16.msra.mxu1 %v3833_v44  ;;  %500 = vmatprep.mubr.f32.mxu0 %v8343_v53  ;;  %v327_v44 = vld [vmem:[%s8074_s0 + $0x38] sm:$0xff]  ;;  %v3839_v56 = vpack.c.bf16 %v747_v59, %v743_v58  ;;  %v3841_v49 = vpack.c.bf16 %v746_v63, %v742_v52 }
  0x5d   :  { %613 = vmatprep.mubr.f32.mxu1 %v8343_v53  ;;  %3708 = vmatmul.mubr.msk.f32.gmra.mrb[12].mxu0 %vm362_vm1, %v326_v54  ;;  %8345 = vst [vmem:[#allocation94_spill] sm:$0xff] %v6628_v42 }
  0x5e   :  { %3718 = vmatmul.mubr.msk.f32.gmra.mrb[12].mxu1 %vm362_vm1, %v326_v54  ;;  %3804 = vmatprep.subr.bf16.mxu0 %v3803_v61  ;;  %v356_v54 = vsub.s32 3, %v6521_v47 }
  0x5f   :  { %3836 = vmatprep.subr.bf16.mxu1 %v3835_v62  ;;  %3806 = vmatpush1.bf16.msra.mxu0 %v3805_v46  ;;  %v6630_v46 = vrot.slane %v658_v51, %v348_v57  ;;  %v340_v62 = vld [vmem:[%s8077_s3] sm:$0xf] }
  0x60   :  { %3838 = vmatpush1.bf16.msra.mxu1 %v3837_v50  ;;  %506 = vmatprep.mubr.f32.mxu0 %v8343_v53  ;;  %v6633_v61 = vrot.slane %v658_v51, %v356_v54  ;;  %v8348_v50 = vsub.s32 0, %v6521_v47  ;;  %v6642_v59 = vrot.slane %v340_v62, %v348_v57 }
  0x61   :  { %619 = vmatprep.mubr.f32.mxu1 %v8343_v53  ;;  %3709 = vmatmul.mubr.msk.f32.gmra.mrb[14].mxu0 %vm362_vm1, %v327_v44  ;;  %8346 = vst [vmem:[#allocation95_spill] sm:$0xff] %v6630_v46 }
  0x62   :  { %3719 = vmatmul.mubr.msk.f32.gmra.mrb[14].mxu1 %vm362_vm1, %v327_v44  ;;  %3808 = vmatprep.subr.bf16.mxu0 %v3807_v48  ;;  %8347 = vst [vmem:[#allocation96_spill] sm:$0xff] %v6633_v61  ;;  %v6640_v58 = vrot.slane %v340_v62, %v8348_v50  ;;  %8350 = vst [vmem:[#allocation98_spill] sm:$0xff] %v6642_v59 }
  0x63   :  { %3840 = vmatprep.subr.bf16.mxu1 %v3839_v56  ;;  %3810 = vmatpush1.bf16.msra.mxu0 %v3809_v55  ;;  %v6646_v55 = vrot.slane %v340_v62, %v352_v43 }
  0x64   :  { %3842 = vmatpush1.bf16.msra.mxu1 %v3841_v49  ;;  %812 = vmatprep.mubr.f32.mxu0 %v8343_v53  ;;  %8349 = vst [vmem:[#allocation97_spill] sm:$0xff] %v6640_v58  ;;  %v6648_v49 = vrot.slane %v340_v62, %v356_v54 }
  0x65   :  { %883 = vmatprep.mubr.f32.mxu1 %v8343_v53  ;;  %8351 = vst [vmem:[#allocation99_spill] sm:$0xff] %v6646_v55 }
  0x66   :  { %813 = vmatmul.mubr.f32.vlgmr.msra.gmra.mrb[0].mxu0 %v8343_v53  ;;  %8352 = vst [vmem:[#allocation100_spill] sm:$0xff] %v6648_v49 }
  0x67   :  { %884 = vmatmul.mubr.f32.vlgmr.msra.gmra.mrb[0].mxu1 %v8343_v53 }
 0x139   :  { %v814_v40 = vpop.f32.mrb[0].mxu0 }
 0x13a   :  { %v885_v60 = vpop.f32.mrb[0].mxu1  ;;  %v5315_v52 = vadd.f32 %v814_v40, %v6640_v58  ;;  %v816_v63 = vpop.f32.mrb[1].mxu0 }
 0x13b   :  { %v887_v44 = vpop.f32.mrb[1].mxu1  ;;  %v5316_v48 = vadd.f32 %v816_v63, %v6642_v59  ;;  %v5331_v47 = vadd.f32 %v885_v60, %v6646_v55 }
 0x13c   :  { %v3720_v51 = vmul.f32 -1.442695, %v5315_v52  ;;  %v5332_v57 = vadd.f32 %v887_v44, %v6648_v49 }
 0x13d   :  { %v3721_v56 = vmul.f32 -1.442695, %v5316_v48  ;;  %v3722_v50 = vmul.f32 -1.442695, %v5331_v47  ;;  %v6663_v47 = vpack.c.bf16 %v5707_v4, %v5687_v0 }
 0x13e   :  { %5380 = vpow2.f32 %v3720_v51 }
 0x13f   :  { %5382 = vpow2.f32 %v3721_v56 }
 0x140   :  { %5384 = vtanh.f32 %v5332_v57  ;;  %v6667_v57 = vpack.c.bf16 %v5752_v13, %v5732_v9 }
 0x141   :  { %5386 = vpow2.f32 %v3722_v50 }
 0x148   :  { %v5381_v61 = vpop.eup %5380 }
 0x149   :  { %v903_v42 = vadd.f32 1.0, %v5381_v61  ;;  %v5383_v40 = vpop.eup %5382 }
 0x14a   :  { %v904_v63 = vadd.f32 1.0, %v5383_v40  ;;  %v5385_v52 = vpop.eup %5384 }
 0x14b   :  { %5388 = vrcp.f32 %v903_v42  ;;  %v5387_v48 = vpop.eup %5386  ;;  %v6659_v42 = vpack.c.bf16 %v5712_v5, %v5692_v1 }
 0x14c   :  { %5390 = vrcp.f32 %v904_v63  ;;  %v905_v54 = vadd.f32 1.0, %v5387_v48 }
 0x14e   :  { %5392 = vrcp.f32 %v905_v54 }
 0x155   :  { %v5389_v43 = vpop.eup %5388 }
 0x156   :  { %v914_v51 = vmul.f32 %v5389_v43, %v5385_v52  ;;  %v5391_v56 = vpop.eup %5390 }
 0x157   :  { %v913_v62 = vmul.f32 0.0, %v5391_v56 }
 0x158   :  { %v5393_v60 = vpop.eup %5392 }
 0x159   :  { %v6652_v59 = vadd.f32 %v914_v51, %v913_v62 }
 0x15b   :  { %8353 = vst [vmem:[#allocation101_spill] sm:$0xff] %v6652_v59  ;;  %5394 = vtanh.f32 %v6652_v59 }
 0x165   :  { %v5395_v61 = vpop.eup %5394 }
 0x166   :  { %v6655_v44 = vmul.f32 %v5395_v61, %v5393_v60 }
 0x167   :  { %5636 = dma.done.wait [#allocation4], 16384 }
 0x168   :  { %5637 = vsyncadd [#allocation4], 4294950912  ;;  %1114 = vmatprep.mubr.f32.mxu0 %v8343_v53  ;;  %1185 = vmatprep.mubr.f32.mxu1 %v8343_v53  ;;  %v6674_v1 = vpack.c.bf16 %v5722_v7, %v5702_v3  ;;  %v6678_v0 = vpack.c.bf16 %v5717_v6, %v5697_v2  ;;  %v6683_v4 = vpack.c.bf16 %v5747_v12, %v5727_v8  ;;  %v8391_v50 = vld [vmem:[#allocation24_spill] sm:$0xff]  ;;  %v8394_v52 = vld [vmem:[#allocation21_spill] sm:$0xff] }
 0x169   :  { %3844 = vmatprep.subr.bf16.mxu0 %v6659_v42  ;;  %v6687_v5 = vpack.c.bf16 %v5762_v15, %v5742_v11  ;;  %v6692_v3 = vpack.c.bf16 %v5792_v21, %v5772_v17  ;;  %v6698_v2 = vpack.c.bf16 %v5757_v14, %v5737_v10  ;;  %v6703_v6 = vpack.c.bf16 %v5802_v23, %v5782_v19  ;;  %v8368_v19 = vld [vmem:[#allocation12_spill] sm:$0xff]  ;;  %v8370_v21 = vld [vmem:[#allocation7_spill] sm:$0xff]  ;;  %v8395_v48 = vld [vmem:[#allocation25_spill] sm:$0xff] }
 0x16a   :  { %3846 = vmatpush1.bf16.msra.mxu0 %v6663_v47  ;;  %3908 = vmatprep.subr.bf16.mxu1 %v6674_v1  ;;  %v6708_v7 = vpack.c.bf16 %v5787_v20, %v5767_v16  ;;  %v6713_v8 = vpack.c.bf16 %v5832_v29, %v5812_v25  ;;  %v6718_v9 = vpack.c.bf16 %v5797_v22, %v5777_v18  ;;  %v8367_v18 = vld [vmem:[#allocation9_spill] sm:$0xff]  ;;  %v8371_v22 = vld [vmem:[#allocation10_spill] sm:$0xff]  ;;  %v8392_v40 = vld [vmem:[#allocation28_spill] sm:$0xff] }
 0x16b   :  { %3848 = vmatprep.subr.bf16.mxu0 %v6667_v57  ;;  %8354 = vst [vmem:[#allocation102_spill] sm:$0xff] %v6692_v3  ;;  %3910 = vmatpush1.bf16.msra.mxu1 %v6678_v0  ;;  %8355 = vst [vmem:[#allocation103_spill] sm:$0xff] %v6703_v6  ;;  %v6723_v10 = vpack.c.bf16 %v5842_v31, %v5822_v27  ;;  %v6728_v11 = vpack.c.bf16 %v5827_v28, %v5807_v24  ;;  %v8373_v24 = vld [vmem:[#allocation14_spill] sm:$0xff]  ;;  %v8376_v27 = vld [vmem:[#allocation8_spill] sm:$0xff] }
 0x16c   :  { %3912 = vmatprep.subr.bf16.mxu1 %v6687_v5  ;;  %8356 = vst [vmem:[#allocation104_spill] sm:$0xff] %v6708_v7  ;;  %8357 = vst [vmem:[#allocation105_spill] sm:$0xff] %v6713_v8  ;;  %v6733_v12 = vpack.c.bf16 %v5872_v37, %v5852_v33  ;;  %v6738_v13 = vpack.c.bf16 %v5837_v30, %v5817_v26  ;;  %v6743_v14 = vpack.c.bf16 %v5882_v39, %v5862_v35  ;;  %v8374_v25 = vld [vmem:[#allocation18_spill] sm:$0xff]  ;;  %v8377_v28 = vld [vmem:[#allocation11_spill] sm:$0xff] }
 0x16d   :  { %8358 = vst [vmem:[#allocation106_spill] sm:$0xff] %v6718_v9  ;;  %8359 = vst [vmem:[#allocation107_spill] sm:$0xff] %v6723_v10  ;;  %v6748_v15 = vpack.c.bf16 %v5867_v36, %v5847_v32  ;;  %v6753_v16 = vpack.c.bf16 %v5912_v45, %v5892_v41  ;;  %v6758_v17 = vpack.c.bf16 %v5877_v38, %v5857_v34  ;;  %v8379_v30 = vld [vmem:[#allocation16_spill] sm:$0xff]  ;;  %v8382_v33 = vld [vmem:[#allocation13_spill] sm:$0xff] }
 0x16e   :  { %3850 = vmatpush1.bf16.msra.mxu0 %v6683_v4  ;;  %8360 = vst [vmem:[#allocation108_spill] sm:$0xff] %v6728_v11  ;;  %8361 = vst [vmem:[#allocation109_spill] sm:$0xff] %v6733_v12  ;;  %v6763_v20 = vpack.c.bf16 %v8368_v19, %v8367_v18  ;;  %v6768_v23 = vpack.c.bf16 %v8371_v22, %v8370_v21  ;;  %v6773_v26 = vpack.c.bf16 %v8374_v25, %v8373_v24  ;;  %v8380_v31 = vld [vmem:[#allocation20_spill] sm:$0xff]  ;;  %v8383_v34 = vld [vmem:[#allocation17_spill] sm:$0xff] }
 0x16f   :  { %3852 = vmatprep.subr.bf16.mxu0 %v6692_v3  ;;  %3914 = vmatpush1.bf16.msra.mxu1 %v6698_v2  ;;  %8362 = vst [vmem:[#allocation110_spill] sm:$0xff] %v6738_v13  ;;  %8363 = vst [vmem:[#allocation111_spill] sm:$0xff] %v6743_v14  ;;  %v6778_v29 = vpack.c.bf16 %v8377_v28, %v8376_v27  ;;  %v6783_v32 = vpack.c.bf16 %v8380_v31, %v8379_v30  ;;  %v8385_v36 = vld [vmem:[#allocation22_spill] sm:$0xff]  ;;  %v8388_v39 = vld [vmem:[#allocation15_spill] sm:$0xff] }
 0x170   :  { %3916 = vmatprep.subr.bf16.mxu1 %v6703_v6  ;;  %8364 = vst [vmem:[#allocation112_spill] sm:$0xff] %v6748_v15  ;;  %8365 = vst [vmem:[#allocation113_spill] sm:$0xff] %v6753_v16  ;;  %v6788_v35 = vpack.c.bf16 %v8383_v34, %v8382_v33  ;;  %v8386_v37 = vld [vmem:[#allocation26_spill] sm:$0xff]  ;;  %v8389_v41 = vld [vmem:[#allocation19_spill] sm:$0xff]  ;;  %v6803_v63 = vpack.c.bf16 %v8392_v40, %v8391_v50  ;;  %v6808_v43 = vpack.c.bf16 %v8395_v48, %v8394_v52 }
 0x171   :  { %8366 = vst [vmem:[#allocation114_spill] sm:$0xff] %v6758_v17  ;;  %8369 = vst [vmem:[#allocation9_spill] sm:$0xff] %v6763_v20  ;;  %v6793_v38 = vpack.c.bf16 %v8386_v37, %v8385_v36  ;;  %v6798_v45 = vpack.c.bf16 %v8389_v41, %v8388_v39  ;;  %v8397_v51 = vld [vmem:[#allocation30_spill] sm:$0xff]  ;;  %v8400_v62 = vld [vmem:[#allocation23_spill] sm:$0xff] }
 0x172   :  { %3854 = vmatpush1.bf16.msra.mxu0 %v6708_v7  ;;  %8372 = vst [vmem:[#allocation12_spill] sm:$0xff] %v6768_v23  ;;  %8375 = vst [vmem:[#allocation7_spill] sm:$0xff] %v6773_v26  ;;  %v8398_v56 = vld [vmem:[#allocation34_spill] sm:$0xff]  ;;  %v8401_v60 = vld [vmem:[#allocation27_spill] sm:$0xff] }
 0x173   :  { %3856 = vmatprep.subr.bf16.mxu0 %v6713_v8  ;;  %3918 = vmatpush1.bf16.msra.mxu1 %v6718_v9  ;;  %8378 = vst [vmem:[#allocation10_spill] sm:$0xff] %v6778_v29  ;;  %8381 = vst [vmem:[#allocation14_spill] sm:$0xff] %v6783_v32  ;;  %v6813_v54 = vpack.c.bf16 %v8398_v56, %v8397_v51  ;;  %v6818_v61 = vpack.c.bf16 %v8401_v60, %v8400_v62  ;;  %v8403_v18 = vld [vmem:[#allocation32_spill] sm:$0xff]  ;;  %v8406_v22 = vld [vmem:[#allocation29_spill] sm:$0xff] }
 0x174   :  { %3920 = vmatprep.subr.bf16.mxu1 %v6723_v10  ;;  %8384 = vst [vmem:[#allocation18_spill] sm:$0xff] %v6788_v35  ;;  %8387 = vst [vmem:[#allocation8_spill] sm:$0xff] %v6793_v38  ;;  %v8404_v19 = vld [vmem:[#allocation36_spill] sm:$0xff]  ;;  %v8407_v24 = vld [vmem:[#allocation33_spill] sm:$0xff] }
 0x175   :  { %8390 = vst [vmem:[#allocation11_spill] sm:$0xff] %v6798_v45  ;;  %8393 = vst [vmem:[#allocation16_spill] sm:$0xff] %v6803_v63  ;;  %v6823_v21 = vpack.c.bf16 %v8404_v19, %v8403_v18  ;;  %v6828_v25 = vpack.c.bf16 %v8407_v24, %v8406_v22  ;;  %v8409_v27 = vld [vmem:[#allocation38_spill] sm:$0xff]  ;;  %v8412_v31 = vld [vmem:[#allocation31_spill] sm:$0xff] }
 0x176   :  { %3858 = vmatpush1.bf16.msra.mxu0 %v6728_v11  ;;  %8396 = vst [vmem:[#allocation20_spill] sm:$0xff] %v6808_v43  ;;  %8399 = vst [vmem:[#allocation13_spill] sm:$0xff] %v6813_v54  ;;  %v8410_v28 = vld [vmem:[#allocation42_spill] sm:$0xff]  ;;  %v8413_v33 = vld [vmem:[#allocation35_spill] sm:$0xff] }
 0x177   :  { %3860 = vmatprep.subr.bf16.mxu0 %v6733_v12  ;;  %3922 = vmatpush1.bf16.msra.mxu1 %v6738_v13  ;;  %8402 = vst [vmem:[#allocation17_spill] sm:$0xff] %v6818_v61  ;;  %8405 = vst [vmem:[#allocation22_spill] sm:$0xff] %v6823_v21  ;;  %v6833_v30 = vpack.c.bf16 %v8410_v28, %v8409_v27  ;;  %v6838_v34 = vpack.c.bf16 %v8413_v33, %v8412_v31  ;;  %v8415_v36 = vld [vmem:[#allocation40_spill] sm:$0xff]  ;;  %v8418_v41 = vld [vmem:[#allocation37_spill] sm:$0xff] }
 0x178   :  { %3924 = vmatprep.subr.bf16.mxu1 %v6743_v14  ;;  %8408 = vst [vmem:[#allocation26_spill] sm:$0xff] %v6828_v25  ;;  %v8416_v37 = vld [vmem:[#allocation44_spill] sm:$0xff]  ;;  %v8419_v50 = vld [vmem:[#allocation41_spill] sm:$0xff]  ;;  %v8421_v52 = vld [vmem:[#allocation46_spill] sm:$0xff] }
 0x179   :  { %8411 = vst [vmem:[#allocation15_spill] sm:$0xff] %v6833_v30  ;;  %8414 = vst [vmem:[#allocation19_spill] sm:$0xff] %v6838_v34  ;;  %v6843_v39 = vpack.c.bf16 %v8416_v37, %v8415_v36  ;;  %v6848_v40 = vpack.c.bf16 %v8419_v50, %v8418_v41  ;;  %v8422_v48 = vld [vmem:[#allocation50_spill] sm:$0xff]  ;;  %v8424_v56 = vld [vmem:[#allocation39_spill] sm:$0xff] }
 0x17a   :  { %3862 = vmatpush1.bf16.msra.mxu0 %v6748_v15  ;;  %v6853_v51 = vpack.c.bf16 %v8422_v48, %v8421_v52  ;;  %v8425_v62 = vld [vmem:[#allocation43_spill] sm:$0xff]  ;;  %v8427_v18 = vld [vmem:[#allocation48_spill] sm:$0xff]  ;;  %v8430_v24 = vld [vmem:[#allocation45_spill] sm:$0xff] }
 0x17b   :  { %3864 = vmatprep.subr.bf16.mxu0 %v6753_v16  ;;  %3926 = vmatpush1.bf16.msra.mxu1 %v6758_v17  ;;  %8417 = vst [vmem:[#allocation24_spill] sm:$0xff] %v6843_v39  ;;  %8420 = vst [vmem:[#allocation28_spill] sm:$0xff] %v6848_v40  ;;  %v6858_v60 = vpack.c.bf16 %v8425_v62, %v8424_v56  ;;  %v8428_v19 = vld [vmem:[#allocation52_spill] sm:$0xff]  ;;  %v8431_v27 = vld [vmem:[#allocation49_spill] sm:$0xff] }
 0x17c   :  { %3928 = vmatprep.subr.bf16.mxu1 %v6763_v20  ;;  %8423 = vst [vmem:[#allocation21_spill] sm:$0xff] %v6853_v51  ;;  %v6863_v22 = vpack.c.bf16 %v8428_v19, %v8427_v18  ;;  %v6868_v28 = vpack.c.bf16 %v8431_v27, %v8430_v24  ;;  %v8433_v31 = vld [vmem:[#allocation54_spill] sm:$0xff]  ;;  %v8436_v37 = vld [vmem:[#allocation47_spill] sm:$0xff]  ;;  %v8439_v52 = vld [vmem:[#allocation56_spill] sm:$0xff] }
 0x17d   :  { %8426 = vst [vmem:[#allocation25_spill] sm:$0xff] %v6858_v60  ;;  %v8434_v33 = vld [vmem:[#allocation58_spill] sm:$0xff]  ;;  %v8437_v41 = vld [vmem:[#allocation51_spill] sm:$0xff]  ;;  %v8440_v48 = vld [vmem:[#allocation60_spill] sm:$0xff] }
 0x17e   :  { %3866 = vmatpush1.bf16.msra.mxu0 %v6768_v23  ;;  %8429 = vst [vmem:[#allocation30_spill] sm:$0xff] %v6863_v22  ;;  %8432 = vst [vmem:[#allocation34_spill] sm:$0xff] %v6868_v28  ;;  %v6873_v36 = vpack.c.bf16 %v8434_v33, %v8433_v31  ;;  %v6878_v50 = vpack.c.bf16 %v8437_v41, %v8436_v37  ;;  %v6883_v56 = vpack.c.bf16 %v8440_v48, %v8439_v52  ;;  %v8442_v62 = vld [vmem:[#allocation53_spill] sm:$0xff]  ;;  %v8445_v24 = vld [vmem:[#allocation62_spill] sm:$0xff] }
 0x17f   :  { %3868 = vmatprep.subr.bf16.mxu0 %v6773_v26  ;;  %3930 = vmatpush1.bf16.msra.mxu1 %v6778_v29  ;;  %v8443_v18 = vld [vmem:[#allocation57_spill] sm:$0xff]  ;;  %v8446_v27 = vld [vmem:[#allocation66_spill] sm:$0xff]  ;;  %v8448_v33 = vld [vmem:[#allocation55_spill] sm:$0xff] }
 0x180   :  { %3932 = vmatprep.subr.bf16.mxu1 %v6783_v32  ;;  %8435 = vst [vmem:[#allocation23_spill] sm:$0xff] %v6873_v36  ;;  %8438 = vst [vmem:[#allocation27_spill] sm:$0xff] %v6878_v50  ;;  %v6888_v19 = vpack.c.bf16 %v8443_v18, %v8442_v62  ;;  %v6893_v31 = vpack.c.bf16 %v8446_v27, %v8445_v24  ;;  %v8449_v37 = vld [vmem:[#allocation59_spill] sm:$0xff]  ;;  %v8451_v52 = vld [vmem:[#allocation64_spill] sm:$0xff] }
 0x181   :  { %8441 = vst [vmem:[#allocation32_spill] sm:$0xff] %v6883_v56  ;;  %v6898_v41 = vpack.c.bf16 %v8449_v37, %v8448_v33  ;;  %v8452_v48 = vld [vmem:[#allocation68_spill] sm:$0xff]  ;;  %v8454_v62 = vld [vmem:[#allocation61_spill] sm:$0xff]  ;;  %v8457_v24 = vld [vmem:[#allocation70_spill] sm:$0xff] }
 0x182   :  { %3870 = vmatpush1.bf16.msra.mxu0 %v6788_v35  ;;  %8444 = vst [vmem:[#allocation36_spill] sm:$0xff] %v6888_v19  ;;  %8447 = vst [vmem:[#allocation29_spill] sm:$0xff] %v6893_v31  ;;  %v6903_v59 = vpack.c.bf16 %v8452_v48, %v8451_v52  ;;  %v8455_v18 = vld [vmem:[#allocation65_spill] sm:$0xff]  ;;  %v8458_v27 = vld [vmem:[#allocation74_spill] sm:$0xff] }
 0x183   :  { %3872 = vmatprep.subr.bf16.mxu0 %v6793_v38  ;;  %3934 = vmatpush1.bf16.msra.mxu1 %v6798_v45  ;;  %8450 = vst [vmem:[#allocation33_spill] sm:$0xff] %v6898_v41  ;;  %v6908_v49 = vpack.c.bf16 %v8455_v18, %v8454_v62  ;;  %v6913_v55 = vpack.c.bf16 %v8458_v27, %v8457_v24  ;;  %v8460_v33 = vld [vmem:[#allocation63_spill] sm:$0xff]  ;;  %v8463_v52 = vld [vmem:[#allocation72_spill] sm:$0xff]  ;;  %v8466_v62 = vld [vmem:[#allocation69_spill] sm:$0xff] }
 0x184   :  { %3936 = vmatprep.subr.bf16.mxu1 %v6803_v63  ;;  %8453 = vst [vmem:[#allocation38_spill] sm:$0xff] %v6903_v59  ;;  %v8461_v37 = vld [vmem:[#allocation67_spill] sm:$0xff]  ;;  %v8464_v48 = vld [vmem:[#allocation76_spill] sm:$0xff]  ;;  %v8467_v18 = vld [vmem:[#allocation73_spill] sm:$0xff] }
 0x185   :  { %8456 = vst [vmem:[#allocation42_spill] sm:$0xff] %v6908_v49  ;;  %8459 = vst [vmem:[#allocation31_spill] sm:$0xff] %v6913_v55  ;;  %v6918_v58 = vpack.c.bf16 %v8461_v37, %v8460_v33  ;;  %v6923_v46 = vpack.c.bf16 %v8464_v48, %v8463_v52  ;;  %v8469_v24 = vld [vmem:[#allocation78_spill] sm:$0xff]  ;;  %v8472_v33 = vld [vmem:[#allocation71_spill] sm:$0xff] }
 0x186   :  { %3874 = vmatpush1.bf16.msra.mxu0 %v6808_v43  ;;  %v8470_v27 = vld [vmem:[#allocation82_spill] sm:$0xff]  ;;  %v8473_v37 = vld [vmem:[#allocation75_spill] sm:$0xff]  ;;  %v8475_v52 = vld [vmem:[#allocation80_spill] sm:$0xff] }
 0x187   :  { %3876 = vmatprep.subr.bf16.mxu0 %v6813_v54  ;;  %3938 = vmatpush1.bf16.msra.mxu1 %v6818_v61  ;;  %8462 = vst [vmem:[#allocation35_spill] sm:$0xff] %v6918_v58  ;;  %8465 = vst [vmem:[#allocation40_spill] sm:$0xff] %v6923_v46  ;;  %v8476_v48 = vld [vmem:[#allocation84_spill] sm:$0xff] }
 0x188   :  { %3940 = vmatprep.subr.bf16.mxu1 %v6823_v21 }
 0x18a   :  { %3878 = vmatpush1.bf16.msra.mxu0 %v6828_v25 }
 0x18b   :  { %3880 = vmatprep.subr.bf16.mxu0 %v6833_v30  ;;  %3942 = vmatpush1.bf16.msra.mxu1 %v6838_v34 }
 0x18c   :  { %3944 = vmatprep.subr.bf16.mxu1 %v6843_v39 }
 0x18e   :  { %3882 = vmatpush1.bf16.msra.mxu0 %v6848_v40 }
 0x18f   :  { %3884 = vmatprep.subr.bf16.mxu0 %v6853_v51  ;;  %3946 = vmatpush1.bf16.msra.mxu1 %v6858_v60 }
 0x190   :  { %3948 = vmatprep.subr.bf16.mxu1 %v6863_v22 }
 0x192   :  { %3886 = vmatpush1.bf16.msra.mxu0 %v6868_v28 }
 0x193   :  { %3888 = vmatprep.subr.bf16.mxu0 %v6873_v36  ;;  %3950 = vmatpush1.bf16.msra.mxu1 %v6878_v50 }
 0x194   :  { %3952 = vmatprep.subr.bf16.mxu1 %v6883_v56 }
 0x196   :  { %3890 = vmatpush1.bf16.msra.mxu0 %v6888_v19  ;;  %v1226_v19 = vld [vmem:[%s8076_s2 + $0x30] sm:$0xff] }
 0x197   :  { %3892 = vmatprep.subr.bf16.mxu0 %v6893_v31  ;;  %3954 = vmatpush1.bf16.msra.mxu1 %v6898_v41  ;;  %v6928_v31 = vpack.c.bf16 %v8467_v18, %v8466_v62  ;;  %v6933_v41 = vpack.c.bf16 %v8470_v27, %v8469_v24  ;;  %v8478_v62 = vld [vmem:[#allocation77_spill] sm:$0xff]  ;;  %v8481_v24 = vld [vmem:[#allocation86_spill] sm:$0xff] }
 0x198   :  { %3956 = vmatprep.subr.bf16.mxu1 %v6903_v59  ;;  %v6938_v59 = vpack.c.bf16 %v8473_v37, %v8472_v33  ;;  %v8479_v18 = vld [vmem:[#allocation81_spill] sm:$0xff]  ;;  %v8482_v27 = vld [vmem:[#allocation90_spill] sm:$0xff]  ;;  %v1221_v33 = vld [vmem:[%s8076_s2 + $0x8] sm:$0xff] }
 0x199   :  { %8468 = vst [vmem:[#allocation44_spill] sm:$0xff] %v6928_v31  ;;  %8471 = vst [vmem:[#allocation37_spill] sm:$0xff] %v6933_v41  ;;  %v1225_v37 = vld [vmem:[%s8076_s2 + $0x28] sm:$0xff] }
 0x19a   :  { %3894 = vmatpush1.bf16.msra.mxu0 %v6908_v49  ;;  %8474 = vst [vmem:[#allocation41_spill] sm:$0xff] %v6938_v59  ;;  %v6943_v49 = vpack.c.bf16 %v8476_v48, %v8475_v52  ;;  %v8484_v52 = vld [vmem:[#allocation79_spill] sm:$0xff] }
 0x19b   :  { %3896 = vmatprep.subr.bf16.mxu0 %v6913_v55  ;;  %3958 = vmatpush1.bf16.msra.mxu1 %v6918_v58  ;;  %v6948_v55 = vpack.c.bf16 %v8479_v18, %v8478_v62  ;;  %v6953_v58 = vpack.c.bf16 %v8482_v27, %v8481_v24  ;;  %v8485_v48 = vld [vmem:[#allocation83_spill] sm:$0xff]  ;;  %v8487_v18 = vld [vmem:[#allocation88_spill] sm:$0xff]  ;;  %v8490_v27 = vld [vmem:[#allocation85_spill] sm:$0xff] }
 0x19c   :  { %3960 = vmatprep.subr.bf16.mxu1 %v6923_v46  ;;  %8477 = vst [vmem:[#allocation46_spill] sm:$0xff] %v6943_v49  ;;  %v6964_v62 = vpack.c.bf16 %v8485_v48, %v8484_v52  ;;  %v1227_v52 = vld [vmem:[%s8076_s2 + $0x38] sm:$0xff]  ;;  %v6983_v48 = vpack.c.bf16 %v1225_v37, %v1221_v33  ;;  %v8494_v33 = vld [vmem:[#allocation87_spill] sm:$0xff] }
 0x19d   :  { %8480 = vst [vmem:[#allocation50_spill] sm:$0xff] %v6948_v55  ;;  %8483 = vst [vmem:[#allocation39_spill] sm:$0xff] %v6953_v58  ;;  %v8495_v37 = vld [vmem:[#allocation91_spill] sm:$0xff] }
 0x19e   :  { %3898 = vmatpush1.bf16.msra.mxu0 %v6928_v31  ;;  %8486 = vst [vmem:[#allocation43_spill] sm:$0xff] %v6964_v62  ;;  %v8491_v31 = vld [vmem:[#allocation89_spill] sm:$0xff]  ;;  %8493 = vst [vmem:[#allocation45_spill] sm:$0xff] %v6983_v48 }
 0x19f   :  { %3900 = vmatprep.subr.bf16.mxu0 %v6933_v41  ;;  %3962 = vmatpush1.bf16.msra.mxu1 %v6938_v59  ;;  %v8488_v41 = vld [vmem:[#allocation92_spill] sm:$0xff]  ;;  %v6974_v46 = vpack.c.bf16 %v8491_v31, %v8490_v27  ;;  %v1223_v59 = vld [vmem:[%s8076_s2 + $0x18] sm:$0xff]  ;;  %v1224_v31 = vld [vmem:[%s8076_s2 + $0x20] sm:$0xff] }
 0x1a0   :  { %3964 = vmatprep.subr.bf16.mxu1 %v6943_v49  ;;  %v6969_v24 = vpack.c.bf16 %v8488_v41, %v8487_v18  ;;  %v1220_v41 = vld [vmem:[%s8076_s2] sm:$0xff]  ;;  %v1229_v18 = vld [vmem:[%s8076_s2 + $0x48] sm:$0xff]  ;;  %v1222_v49 = vld [vmem:[%s8076_s2 + $0x10] sm:$0xff] }
 0x1a1   :  { %8492 = vst [vmem:[#allocation52_spill] sm:$0xff] %v6974_v46  ;;  %v1233_v27 = vld [vmem:[%s8076_s2 + $0x68] sm:$0xff]  ;;  %v7012_v56 = vpack.c.bf16 %v1224_v31, %v1220_v41  ;;  %v1232_v41 = vld [vmem:[%s8076_s2 + $0x60] sm:$0xff] }
 0x1a2   :  { %8489 = vst [vmem:[#allocation48_spill] sm:$0xff] %v6969_v24  ;;  %3902 = vmatpush1.bf16.msra.mxu0 %v6948_v55  ;;  %v7003_v55 = vpack.c.bf16 %v1227_v52, %v1223_v59  ;;  %v1235_v59 = vld [vmem:[%s8076_s2 + $0x78] sm:$0xff]  ;;  %v7021_v52 = vpack.c.bf16 %v1233_v27, %v1229_v18  ;;  %v1237_v31 = vld [vmem:[%s8076_s2 + $0x88] sm:$0xff]  ;;  %v7036_v18 = vpack.c.bf16 %v1226_v19, %v1222_v49 }
 0x1a3   :  { %3904 = vmatprep.subr.bf16.mxu0 %v6953_v58  ;;  %3966 = vmatpush1.bf16.msra.mxu1 %v6964_v62  ;;  %v7000_v58 = vpack.c.bf16 %v8495_v37, %v8494_v33  ;;  %8498 = vst [vmem:[#allocation58_spill] sm:$0xff] %v7012_v56  ;;  %v1231_v33 = vld [vmem:[%s8076_s2 + $0x58] sm:$0xff]  ;;  %v1228_v37 = vld [vmem:[%s8076_s2 + $0x40] sm:$0xff] }
 0x1a4   :  { %3968 = vmatprep.subr.bf16.mxu1 %v6969_v24  ;;  %8497 = vst [vmem:[#allocation54_spill] sm:$0xff] %v7003_v55  ;;  %8499 = vst [vmem:[#allocation47_spill] sm:$0xff] %v7021_v52  ;;  %v7040_v27 = vpack.c.bf16 %v1235_v59, %v1231_v33  ;;  %v1234_v24 = vld [vmem:[%s8076_s2 + $0x70] sm:$0xff]  ;;  %v7049_v62 = vpack.c.bf16 %v1232_v41, %v1228_v37  ;;  %v1239_v49 = vld [vmem:[%s8076_s2 + $0x98] sm:$0xff] }
 0x1a5   :  { %8496 = vst [vmem:[#allocation49_spill] sm:$0xff] %v7000_v58  ;;  %v1243_v19 = vld [vmem:[%s8076_s2 + $0xb8] sm:$0xff]  ;;  %v1236_v59 = vld [vmem:[%s8076_s2 + $0x80] sm:$0xff]  ;;  %v1245_v41 = vld [vmem:[%s8076_s2 + $0xc8] sm:$0xff] }
 0x1a6   :  { %3906 = vmatpush1.bf16.msra.mxu0 %v6974_v46  ;;  %v1241_v46 = vld [vmem:[%s8076_s2 + $0xa8] sm:$0xff]  ;;  %8500 = vst [vmem:[#allocation51_spill] sm:$0xff] %v7040_v27  ;;  %8501 = vst [vmem:[#allocation56_spill] sm:$0xff] %v7049_v62  ;;  %v1240_v37 = vld [vmem:[%s8076_s2 + $0xa0] sm:$0xff] }
 0x1a7   :  { %3972 = vmatprep.subr.bf16.mxu0 %v6983_v48  ;;  %3970 = vmatpush1.bf16.msra.mxu1 %v7000_v58  ;;  %v1230_v48 = vld [vmem:[%s8076_s2 + $0x50] sm:$0xff]  ;;  %v7059_v33 = vpack.c.bf16 %v1241_v46, %v1237_v31  ;;  %v7079_v31 = vpack.c.bf16 %v1243_v19, %v1239_v49  ;;  %v7088_v58 = vpack.c.bf16 %v1240_v37, %v1236_v59  ;;  %v1244_v19 = vld [vmem:[%s8076_s2 + $0xc0] sm:$0xff]  ;;  %v1253_v37 = vld [vmem:[%s8076_s2 + $0x108] sm:$0xff] }
 0x1a8   :  { %4004 = vmatprep.subr.bf16.mxu1 %v7003_v55  ;;  %v7075_v46 = vpack.c.bf16 %v1234_v24, %v1230_v48  ;;  %v1242_v55 = vld [vmem:[%s8076_s2 + $0xb0] sm:$0xff]  ;;  %v1247_v24 = vld [vmem:[%s8076_s2 + $0xd8] sm:$0xff]  ;;  %v1248_v59 = vld [vmem:[%s8076_s2 + $0xe0] sm:$0xff] }
 0x1a9   :  { %1115 = vmatmul.mubr.f32.vlgmr.msra.gmra.mrb[16].mxu0 %v6655_v44  ;;  %8502 = vst [vmem:[#allocation60_spill] sm:$0xff] %v7059_v33  ;;  %8504 = vst [vmem:[#allocation57_spill] sm:$0xff] %v7079_v31  ;;  %v1251_v48 = vld [vmem:[%s8076_s2 + $0xf8] sm:$0xff] }
 0x1aa   :  { %3974 = vmatpush1.bf16.msra.mxu0 %v7012_v56  ;;  %1348 = vmatprep.mubr.f32.mxu0 %v8343_v53  ;;  %8503 = vst [vmem:[#allocation53_spill] sm:$0xff] %v7075_v46  ;;  %v1238_v56 = vld [vmem:[%s8076_s2 + $0x90] sm:$0xff]  ;;  %8505 = vst [vmem:[#allocation62_spill] sm:$0xff] %v7088_v58 }
 0x1ab   :  { %3976 = vmatprep.subr.bf16.mxu0 %v7021_v52  ;;  %1186 = vmatmul.mubr.f32.vlgmr.msra.gmra.mrb[16].mxu1 %v6655_v44  ;;  %v1249_v52 = vld [vmem:[%s8076_s2 + $0xe8] sm:$0xff] }
 0x1ac   :  { %4006 = vmatpush1.bf16.msra.mxu1 %v7036_v18  ;;  %1419 = vmatprep.mubr.f32.mxu1 %v8343_v53  ;;  %v7097_v49 = vpack.c.bf16 %v1249_v52, %v1245_v41  ;;  %v7112_v52 = vpack.c.bf16 %v1242_v55, %v1238_v56  ;;  %v7115_v41 = vpack.c.bf16 %v1251_v48, %v1247_v24  ;;  %v1250_v53 = vld [vmem:[%s8076_s2 + $0xf0] sm:$0xff]  ;;  %v1255_v55 = vld [vmem:[%s8076_s2 + $0x118] sm:$0xff]  ;;  %v1252_v48 = vld [vmem:[%s8076_s2 + $0x100] sm:$0xff] }
 0x1ad   :  { %4008 = vmatprep.subr.bf16.mxu1 %v7040_v27  ;;  %v7124_v27 = vpack.c.bf16 %v1248_v59, %v1244_v19  ;;  %v1259_v56 = vld [vmem:[%s8076_s2 + $0x138] sm:$0xff]  ;;  %v1256_v19 = vld [vmem:[%s8076_s2 + $0x120] sm:$0xff]  ;;  %v1261_v59 = vld [vmem:[%s8076_s2 + $0x148] sm:$0xff] }
 0x1ae   :  { %3978 = vmatpush1.bf16.msra.mxu0 %v7049_v62  ;;  %8506 = vst [vmem:[#allocation66_spill] sm:$0xff] %v7097_v49  ;;  %v1257_v62 = vld [vmem:[%s8076_s2 + $0x128] sm:$0xff]  ;;  %8507 = vst [vmem:[#allocation55_spill] sm:$0xff] %v7112_v52 }
 0x1af   :  { %3980 = vmatprep.subr.bf16.mxu0 %v7059_v33  ;;  %8508 = vst [vmem:[#allocation59_spill] sm:$0xff] %v7115_v41  ;;  %v1246_v33 = vld [vmem:[%s8076_s2 + $0xd0] sm:$0xff]  ;;  %8509 = vst [vmem:[#allocation64_spill] sm:$0xff] %v7124_v27  ;;  %v7133_v24 = vpack.c.bf16 %v1257_v62, %v1253_v37  ;;  %v7151_v37 = vpack.c.bf16 %v1259_v56, %v1255_v55  ;;  %v1260_v56 = vld [vmem:[%s8076_s2 + $0x140] sm:$0xff] }
 0x1b0   :  { %4010 = vmatpush1.bf16.msra.mxu1 %v7075_v46  ;;  %v7148_v62 = vpack.c.bf16 %v1250_v53, %v1246_v33  ;;  %v7160_v46 = vpack.c.bf16 %v1256_v19, %v1252_v48  ;;  %v1263_v53 = vld [vmem:[%s8076_s2 + $0x158] sm:$0xff]  ;;  %v1264_v48 = vld [vmem:[%s8076_s2 + $0x160] sm:$0xff]  ;;  %v1269_v19 = vld [vmem:[%s8076_s2 + $0x188] sm:$0xff] }
 0x1b1   :  { %4012 = vmatprep.subr.bf16.mxu1 %v7079_v31  ;;  %8510 = vst [vmem:[#allocation68_spill] sm:$0xff] %v7133_v24  ;;  %8512 = vst [vmem:[#allocation65_spill] sm:$0xff] %v7151_v37  ;;  %v1258_v31 = vld [vmem:[%s8076_s2 + $0x130] sm:$0xff]  ;;  %v1267_v33 = vld [vmem:[%s8076_s2 + $0x178] sm:$0xff] }
 0x1b2   :  { %3982 = vmatpush1.bf16.msra.mxu0 %v7088_v58  ;;  %v1265_v58 = vld [vmem:[%s8076_s2 + $0x168] sm:$0xff]  ;;  %8511 = vst [vmem:[#allocation61_spill] sm:$0xff] %v7148_v62  ;;  %8513 = vst [vmem:[#allocation70_spill] sm:$0xff] %v7160_v46 }
 0x1b3   :  { %3984 = vmatprep.subr.bf16.mxu0 %v7097_v49  ;;  %v1254_v49 = vld [vmem:[%s8076_s2 + $0x110] sm:$0xff]  ;;  %v7169_v55 = vpack.c.bf16 %v1265_v58, %v1261_v59  ;;  %v7187_v59 = vpack.c.bf16 %v1267_v33, %v1263_v53  ;;  %v1268_v33 = vld [vmem:[%s8076_s2 + $0x180] sm:$0xff] }
 0x1b4   :  { %4014 = vmatpush1.bf16.msra.mxu1 %v7112_v52  ;;  %v7184_v58 = vpack.c.bf16 %v1258_v31, %v1254_v49  ;;  %v7196_v52 = vpack.c.bf16 %v1264_v48, %v1260_v56  ;;  %v1271_v31 = vld [vmem:[%s8076_s2 + $0x198] sm:$0xff]  ;;  %v1272_v56 = vld [vmem:[%s8076_s2 + $0x1a0] sm:$0xff]  ;;  %v1277_v48 = vld [vmem:[%s8076_s2 + $0x1c8] sm:$0xff] }
 0x1b5   :  { %4016 = vmatprep.subr.bf16.mxu1 %v7115_v41  ;;  %8514 = vst [vmem:[#allocation74_spill] sm:$0xff] %v7169_v55  ;;  %v1266_v41 = vld [vmem:[%s8076_s2 + $0x170] sm:$0xff]  ;;  %v1275_v49 = vld [vmem:[%s8076_s2 + $0x1b8] sm:$0xff] }
 0x1b6   :  { %3986 = vmatpush1.bf16.msra.mxu0 %v7124_v27  ;;  %v1273_v27 = vld [vmem:[%s8076_s2 + $0x1a8] sm:$0xff]  ;;  %8515 = vst [vmem:[#allocation63_spill] sm:$0xff] %v7196_v52 }
 0x1b7   :  { %3988 = vmatprep.subr.bf16.mxu0 %v7133_v24  ;;  %v1262_v24 = vld [vmem:[%s8076_s2 + $0x150] sm:$0xff]  ;;  %v7205_v53 = vpack.c.bf16 %v1273_v27, %v1269_v19  ;;  %v7223_v19 = vpack.c.bf16 %v1275_v49, %v1271_v31  ;;  %v1276_v49 = vld [vmem:[%s8076_s2 + $0x1c0] sm:$0xff] }
 0x1b8   :  { %4018 = vmatpush1.bf16.msra.mxu1 %v7148_v62  ;;  %v7220_v27 = vpack.c.bf16 %v1266_v41, %v1262_v24  ;;  %v7232_v62 = vpack.c.bf16 %v1272_v56, %v1268_v33  ;;  %v1279_v41 = vld [vmem:[%s8076_s2 + $0x1d8] sm:$0xff]  ;;  %v1280_v33 = vld [vmem:[%s8076_s2 + $0x1e0] sm:$0xff] }
 0x1b9   :  { %4020 = vmatprep.subr.bf16.mxu1 %v7151_v37  ;;  %8516 = vst [vmem:[#allocation67_spill] sm:$0xff] %v7205_v53  ;;  %v1274_v37 = vld [vmem:[%s8076_s2 + $0x1b0] sm:$0xff]  ;;  %v1283_v24 = vld [vmem:[%s8076_s2 + $0x1f8] sm:$0xff] }
 0x1ba   :  { %3990 = vmatpush1.bf16.msra.mxu0 %v7160_v46  ;;  %v1281_v46 = vld [vmem:[%s8076_s2 + $0x1e8] sm:$0xff] }
 0x1bb   :  { %3992 = vmatprep.subr.bf16.mxu0 %v7169_v55  ;;  %v1270_v55 = vld [vmem:[%s8076_s2 + $0x190] sm:$0xff]  ;;  %v7241_v31 = vpack.c.bf16 %v1281_v46, %v1277_v48 }
 0x1bc   :  { %4022 = vmatpush1.bf16.msra.mxu1 %v7184_v58  ;;  %v7250_v56 = vpack.c.bf16 %v1274_v37, %v1270_v55  ;;  %v1278_v46 = vld [vmem:[%s8076_s2 + $0x1d0] sm:$0xff]  ;;  %v8518_v55 = vld [vmem:[#allocation36_spill] sm:$0xff] }
 0x1bd   :  { %4024 = vmatprep.subr.bf16.mxu1 %v7187_v59  ;;  %v1282_v48 = vld [vmem:[%s8076_s2 + $0x1f0] sm:$0xff] }
 0x1be   :  { %3994 = vmatpush1.bf16.msra.mxu0 %v7196_v52  ;;  %v7253_v52 = vpack.c.bf16 %v1283_v24, %v1279_v41  ;;  %v7266_v37 = vpack.c.bf16 %v1282_v48, %v1278_v46  ;;  %v8519_v41 = vld [vmem:[#allocation29_spill] sm:$0xff]  ;;  %v8523_v46 = vld [vmem:[#allocation31_spill] sm:$0xff] }
 0x1bf   :  { %3996 = vmatprep.subr.bf16.mxu0 %v7205_v53  ;;  %v7262_v53 = vpack.c.bf16 %v1280_v33, %v1276_v49  ;;  %v8520_v24 = vld [vmem:[#allocation33_spill] sm:$0xff]  ;;  %v8521_v49 = vld [vmem:[#allocation38_spill] sm:$0xff]  ;;  %v8524_v48 = vld [vmem:[#allocation35_spill] sm:$0xff] }
 0x1c0   :  { %4026 = vmatpush1.bf16.msra.mxu1 %v7220_v27  ;;  %v8522_v33 = vld [vmem:[#allocation42_spill] sm:$0xff] }
 0x1c1   :  { %4028 = vmatprep.subr.bf16.mxu1 %v7223_v19 }
 0x1c2   :  { %3998 = vmatpush1.bf16.msra.mxu0 %v7232_v62 }
 0x1c3   :  { %4000 = vmatprep.subr.bf16.mxu0 %v7241_v31 }
 0x1c4   :  { %4030 = vmatpush1.bf16.msra.mxu1 %v7250_v56 }
 0x1c5   :  { %4032 = vmatprep.subr.bf16.mxu1 %v7253_v52 }
 0x1c6   :  { %4002 = vmatpush1.bf16.msra.mxu0 %v7262_v53 }
 0x1c7   :  { %4036 = vmatprep.subr.bf16.mxu0 %v6659_v42 }
 0x1c8   :  { %4034 = vmatpush1.bf16.msra.mxu1 %v7266_v37 }
 0x1c9   :  { %1349 = vmatmul.mubr.f32.vlgmr.msra.gmra.mrb[2].mxu0 %v6655_v44  ;;  %4100 = vmatprep.subr.bf16.mxu1 %v6674_v1 }
 0x1ca   :  { %4038 = vmatpush1.bf16.msra.mxu0 %v6663_v47 }
 0x1cb   :  { %1420 = vmatmul.mubr.f32.vlgmr.msra.gmra.mrb[2].mxu1 %v6655_v44  ;;  %4040 = vmatprep.subr.bf16.mxu0 %v6667_v57  ;;  %v8517_v44 = vld [vmem:[#allocation32_spill] sm:$0xff] }
 0x1cc   :  { %4102 = vmatpush1.bf16.msra.mxu1 %v6678_v0 }
 0x1cd   :  { %4104 = vmatprep.subr.bf16.mxu1 %v6687_v5 }
 0x1ce   :  { %4042 = vmatpush1.bf16.msra.mxu0 %v6683_v4 }
 0x1cf   :  { %4044 = vmatprep.subr.bf16.mxu0 %v6692_v3 }
 0x1d0   :  { %4106 = vmatpush1.bf16.msra.mxu1 %v6698_v2 }
 0x1d1   :  { %4108 = vmatprep.subr.bf16.mxu1 %v6703_v6 }
 0x1d2   :  { %4046 = vmatpush1.bf16.msra.mxu0 %v6708_v7 }
 0x1d3   :  { %4048 = vmatprep.subr.bf16.mxu0 %v6713_v8 }
 0x1d4   :  { %4110 = vmatpush1.bf16.msra.mxu1 %v6718_v9 }
 0x1d5   :  { %4112 = vmatprep.subr.bf16.mxu1 %v6723_v10 }
 0x1d6   :  { %4050 = vmatpush1.bf16.msra.mxu0 %v6728_v11 }
 0x1d7   :  { %4052 = vmatprep.subr.bf16.mxu0 %v6733_v12 }
 0x1d8   :  { %4114 = vmatpush1.bf16.msra.mxu1 %v6738_v13 }
 0x1d9   :  { %4116 = vmatprep.subr.bf16.mxu1 %v6743_v14 }
 0x1da   :  { %4054 = vmatpush1.bf16.msra.mxu0 %v6748_v15 }
 0x1db   :  { %4056 = vmatprep.subr.bf16.mxu0 %v6753_v16 }
 0x1dc   :  { %4118 = vmatpush1.bf16.msra.mxu1 %v6758_v17 }
 0x1dd   :  { %4120 = vmatprep.subr.bf16.mxu1 %v6763_v20 }
 0x1de   :  { %4058 = vmatpush1.bf16.msra.mxu0 %v6768_v23 }
 0x1df   :  { %4060 = vmatprep.subr.bf16.mxu0 %v6773_v26 }
 0x1e0   :  { %4122 = vmatpush1.bf16.msra.mxu1 %v6778_v29 }
 0x1e1   :  { %4124 = vmatprep.subr.bf16.mxu1 %v6783_v32 }
 0x1e2   :  { %4062 = vmatpush1.bf16.msra.mxu0 %v6788_v35 }
 0x1e3   :  { %4064 = vmatprep.subr.bf16.mxu0 %v6793_v38 }
 0x1e4   :  { %4126 = vmatpush1.bf16.msra.mxu1 %v6798_v45 }
 0x1e5   :  { %4128 = vmatprep.subr.bf16.mxu1 %v6803_v63 }
 0x1e6   :  { %4066 = vmatpush1.bf16.msra.mxu0 %v6808_v43 }
 0x1e7   :  { %4068 = vmatprep.subr.bf16.mxu0 %v6813_v54 }
 0x1e8   :  { %4130 = vmatpush1.bf16.msra.mxu1 %v6818_v61 }
 0x1e9   :  { %4132 = vmatprep.subr.bf16.mxu1 %v6823_v21 }
 0x1ea   :  { %4070 = vmatpush1.bf16.msra.mxu0 %v6828_v25 }
 0x1eb   :  { %4072 = vmatprep.subr.bf16.mxu0 %v6833_v30 }
 0x1ec   :  { %4134 = vmatpush1.bf16.msra.mxu1 %v6838_v34 }
 0x1ed   :  { %4136 = vmatprep.subr.bf16.mxu1 %v6843_v39 }
 0x1ee   :  { %4074 = vmatpush1.bf16.msra.mxu0 %v6848_v40 }
 0x1ef   :  { %4076 = vmatprep.subr.bf16.mxu0 %v6853_v51  ;;  %v8539_v51 = vld [vmem:[#allocation95_spill] sm:$0xff] }
 0x1f0   :  { %4138 = vmatpush1.bf16.msra.mxu1 %v6858_v60 }
 0x1f1   :  { %4140 = vmatprep.subr.bf16.mxu1 %v6863_v22 }
 0x1f2   :  { %4078 = vmatpush1.bf16.msra.mxu0 %v6868_v28  ;;  %v8525_v28 = vld [vmem:[#allocation40_spill] sm:$0xff] }
 0x1f3   :  { %4080 = vmatprep.subr.bf16.mxu0 %v6873_v36  ;;  %v8526_v36 = vld [vmem:[#allocation44_spill] sm:$0xff] }
 0x1f4   :  { %4142 = vmatpush1.bf16.msra.mxu1 %v6878_v50  ;;  %v8527_v50 = vld [vmem:[#allocation37_spill] sm:$0xff] }
 0x1f5   :  { %4144 = vmatprep.subr.bf16.mxu1 %v8517_v44  ;;  %v8528_v44 = vld [vmem:[#allocation41_spill] sm:$0xff] }
 0x1f6   :  { %4082 = vmatpush1.bf16.msra.mxu0 %v8518_v55  ;;  %v8529_v55 = vld [vmem:[#allocation46_spill] sm:$0xff] }
 0x1f7   :  { %4084 = vmatprep.subr.bf16.mxu0 %v8519_v41  ;;  %v8530_v41 = vld [vmem:[#allocation50_spill] sm:$0xff] }
 0x1f8   :  { %4146 = vmatpush1.bf16.msra.mxu1 %v8520_v24  ;;  %v8531_v24 = vld [vmem:[#allocation39_spill] sm:$0xff] }
 0x1f9   :  { %4148 = vmatprep.subr.bf16.mxu1 %v8521_v49  ;;  %v8532_v49 = vld [vmem:[#allocation43_spill] sm:$0xff] }
 0x1fa   :  { %4086 = vmatpush1.bf16.msra.mxu0 %v8522_v33  ;;  %v8533_v33 = vld [vmem:[#allocation48_spill] sm:$0xff] }
 0x1fb   :  { %4088 = vmatprep.subr.bf16.mxu0 %v8523_v46  ;;  %v8534_v46 = vld [vmem:[#allocation52_spill] sm:$0xff] }
 0x1fc   :  { %4150 = vmatpush1.bf16.msra.mxu1 %v8524_v48  ;;  %v8535_v48 = vld [vmem:[#allocation45_spill] sm:$0xff] }
 0x1fd   :  { %4152 = vmatprep.subr.bf16.mxu1 %v8525_v28  ;;  %v8536_v28 = vld [vmem:[#allocation49_spill] sm:$0xff] }
 0x1fe   :  { %4090 = vmatpush1.bf16.msra.mxu0 %v8526_v36  ;;  %v8537_v36 = vld [vmem:[#allocation54_spill] sm:$0xff] }
 0x1ff   :  { %4092 = vmatprep.subr.bf16.mxu0 %v8527_v50 }
 0x200   :  { %4154 = vmatpush1.bf16.msra.mxu1 %v8528_v44  ;;  %v8538_v44 = vld [vmem:[#allocation93_spill] sm:$0xff] }
 0x201   :  { %4156 = vmatprep.subr.bf16.mxu1 %v8529_v55 }
 0x202   :  { %4094 = vmatpush1.bf16.msra.mxu0 %v8530_v41 }
 0x203   :  { %4096 = vmatprep.subr.bf16.mxu0 %v8531_v24 }
 0x204   :  { %4158 = vmatpush1.bf16.msra.mxu1 %v8532_v49 }
 0x205   :  { %4160 = vmatprep.subr.bf16.mxu1 %v8533_v33  ;;  %v8540_v33 = vld [vmem:[#allocation94_spill] sm:$0xff] }
 0x206   :  { %4098 = vmatpush1.bf16.msra.mxu0 %v8534_v46 }
 0x207   :  { %4164 = vmatprep.subr.bf16.mxu0 %v8535_v48  ;;  %v8541_v48 = vld [vmem:[#allocation96_spill] sm:$0xff] }
 0x208   :  { %4162 = vmatpush1.bf16.msra.mxu1 %v8536_v28 }
 0x209   :  { %4196 = vmatprep.subr.bf16.mxu1 %v8537_v36 }
 0x27c   :  { %v1116_v50 = vpop.f32.mrb[16].mxu0 }
 0x27d   :  { %v1117_v22 = vadd.f32 %v1116_v50, %v8538_v44  ;;  %v1118_v55 = vpop.f32.mrb[17].mxu0 }
 0x27e   :  { %v1119_v41 = vadd.f32 %v1118_v55, %v8539_v51  ;;  %v1187_v60 = vpop.f32.mrb[16].mxu1 }
 0x27f   :  { %v3723_v24 = vmul.f32 -1.442695, %v1117_v22  ;;  %v1189_v40 = vpop.f32.mrb[17].mxu1  ;;  %v1188_v46 = vadd.f32 %v1187_v60, %v8540_v33  ;;  %v8543_v33 = vld [vmem:[#allocation98_spill] sm:$0xff] }
 0x280   :  { %v3724_v49 = vmul.f32 -1.442695, %v1119_v41  ;;  %v1190_v30 = vadd.f32 %v1189_v40, %v8541_v48  ;;  %v8542_v40 = vld [vmem:[#allocation97_spill] sm:$0xff] }
 0x281   :  { %5396 = vpow2.f32 %v3723_v24  ;;  %v3725_v39 = vmul.f32 -1.442695, %v1188_v46 }
 0x282   :  { %5398 = vpow2.f32 %v3724_v49 }
 0x283   :  { %5400 = vpow2.f32 %v3725_v39 }
 0x284   :  { %5402 = vtanh.f32 %v1190_v30 }
 0x28b   :  { %v5397_v28 = vpop.eup %5396 }
 0x28c   :  { %v5399_v36 = vpop.eup %5398  ;;  %v1201_v34 = vadd.f32 1.0, %v5397_v28 }
 0x28d   :  { %v1202_v50 = vadd.f32 1.0, %v5399_v36  ;;  %v5401_v55 = vpop.eup %5400 }
 0x28e   :  { %5404 = vrcp.f32 %v1201_v34  ;;  %v5403_v51 = vpop.eup %5402  ;;  %v1203_v44 = vadd.f32 1.0, %v5401_v55  ;;  %v8544_v55 = vld [vmem:[#allocation99_spill] sm:$0xff] }
 0x28f   :  { %5406 = vrcp.f32 %v1202_v50 }
 0x290   :  { %5408 = vrcp.f32 %v1203_v44 }
 0x298   :  { %v5405_v22 = vpop.eup %5404 }
 0x299   :  { %v5407_v41 = vpop.eup %5406  ;;  %v1212_v24 = vmul.f32 %v5405_v22, %v5403_v51 }
 0x29a   :  { %v1211_v49 = vmul.f32 0.0, %v5407_v41  ;;  %v5409_v22 = vpop.eup %5408 }
 0x29c   :  { %v7343_v60 = vadd.f32 %v1212_v24, %v1211_v49  ;;  %v1350_v46 = vpop.f32.mrb[2].mxu0  ;;  %v8545_v24 = vld [vmem:[#allocation100_spill] sm:$0xff] }
 0x29d   :  { %v5317_v48 = vadd.f32 %v1350_v46, %v8542_v40  ;;  %v1352_v39 = vpop.f32.mrb[3].mxu0 }
 0x29e   :  { %v5318_v28 = vadd.f32 %v1352_v39, %v8543_v33  ;;  %v1421_v30 = vpop.f32.mrb[2].mxu1  ;;  %5410 = vtanh.f32 %v7343_v60 }
 0x29f   :  { %v3726_v34 = vmul.f32 -1.442695, %v5317_v48  ;;  %v1423_v36 = vpop.f32.mrb[3].mxu1  ;;  %v5333_v51 = vadd.f32 %v1421_v30, %v8544_v55 }
 0x2a0   :  { %v3727_v50 = vmul.f32 -1.442695, %v5318_v28  ;;  %v5334_v49 = vadd.f32 %v1423_v36, %v8545_v24 }
 0x2a1   :  { %5412 = vpow2.f32 %v3726_v34  ;;  %v3728_v44 = vmul.f32 -1.442695, %v5333_v51 }
 0x2a2   :  { %5414 = vpow2.f32 %v3727_v50 }
 0x2a3   :  { %5416 = vpow2.f32 %v3728_v44 }
 0x2a4   :  { %5418 = vtanh.f32 %v5334_v49  ;;  %v8547_v49 = vld [vmem:[#allocation58_spill] sm:$0xff] }
 0x2a8   :  { %v5411_v41 = vpop.eup %5410 }
 0x2a9   :  { %v1215_v25 = vmul.f32 %v5411_v41, %v5409_v22  ;;  %v8546_v41 = vld [vmem:[#allocation101_spill] sm:$0xff] }
 0x2ab   :  { %v5413_v46 = vpop.eup %5412  ;;  %1518 = vmatprep.mubr.f32.mxu0 %v1215_v25  ;;  %3660 = vst [vmem:[%s8080_s6] sm:$0xff] %v1215_v25  ;;  %1589 = vmatprep.mubr.f32.mxu1 %v1215_v25 }
 0x2ac   :  { %v5415_v48 = vpop.eup %5414  ;;  %v1439_v39 = vadd.f32 1.0, %v5413_v46 }
 0x2ad   :  { %v1440_v28 = vadd.f32 1.0, %v5415_v48  ;;  %v5417_v30 = vpop.eup %5416  ;;  %v8548_v48 = vld [vmem:[#allocation47_spill] sm:$0xff] }
 0x2ae   :  { %5420 = vrcp.f32 %v1439_v39  ;;  %v5419_v34 = vpop.eup %5418  ;;  %v1441_v51 = vadd.f32 1.0, %v5417_v30  ;;  %v8549_v39 = vld [vmem:[#allocation51_spill] sm:$0xff]  ;;  %v8551_v30 = vld [vmem:[#allocation56_spill] sm:$0xff] }
 0x2af   :  { %5422 = vrcp.f32 %v1440_v28  ;;  %v8550_v28 = vmov 0.0  }
 0x2b0   :  { %5424 = vrcp.f32 %v1441_v51  ;;  %v8555_v51 = vld [vmem:[#allocation62_spill] sm:$0xff] }
 0x2b8   :  { %v5421_v50 = vpop.eup %5420 }
 0x2b9   :  { %v5423_v36 = vpop.eup %5422  ;;  %v1450_v22 = vmul.f32 %v5421_v50, %v5419_v34  ;;  %v8552_v34 = vld [vmem:[#allocation53_spill] sm:$0xff]  ;;  %v8553_v50 = vld [vmem:[#allocation60_spill] sm:$0xff] }
 0x2ba   :  { %v1449_v44 = vmul.f32 %v5423_v36, %v8546_v41  ;;  %v5425_v25 = vpop.eup %5424  ;;  %v8556_v36 = vld [vmem:[#allocation55_spill] sm:$0xff] }
 0x2bb   :  { %v8558_v41 = vld [vmem:[#allocation59_spill] sm:$0xff] }
 0x2bc   :  { %v7354_v24 = vadd.f32 %v1450_v22, %v1449_v44  ;;  %v8557_v22 = vld [vmem:[#allocation66_spill] sm:$0xff]  ;;  %v8559_v44 = vld [vmem:[#allocation64_spill] sm:$0xff] }
 0x2be   :  { %5426 = vtanh.f32 %v7354_v24 }
 0x2c8   :  { %v5427_v55 = vpop.eup %5426 }
 0x2c9   :  { %v1453_v46 = vmul.f32 %v5427_v55, %v5425_v25  ;;  %v8554_v55 = vld [vmem:[#allocation57_spill] sm:$0xff] }
 0x2ca   :  { %v8560_v25 = vld [vmem:[#allocation61_spill] sm:$0xff] }
 0x2cb   :  { %1519 = vmatmul.mubr.f32.vlgmr.msra.gmra.mrb[18].mxu0 %v1453_v46  ;;  %1590 = vmatmul.mubr.f32.vlgmr.msra.gmra.mrb[18].mxu1 %v1453_v46 }
 0x2cc   :  { %4166 = vmatpush1.bf16.msra.mxu0 %v8547_v49  ;;  %4198 = vmatpush1.bf16.msra.mxu1 %v7036_v18 }
 0x2cd   :  { %4168 = vmatprep.subr.bf16.mxu0 %v8548_v48  ;;  %4200 = vmatprep.subr.bf16.mxu1 %v8549_v39 }
 0x2ce   :  { %1688 = vmatprep.mubr.f32.mxu0 %v8550_v28  ;;  %1759 = vmatprep.mubr.f32.mxu1 %v8550_v28  ;;  %v8561_v28 = vld [vmem:[#allocation68_spill] sm:$0xff] }
 0x2d0   :  { %4170 = vmatpush1.bf16.msra.mxu0 %v8551_v30  ;;  %4202 = vmatpush1.bf16.msra.mxu1 %v8552_v34  ;;  %v8562_v30 = vld [vmem:[#allocation65_spill] sm:$0xff]  ;;  %v8563_v34 = vld [vmem:[#allocation70_spill] sm:$0xff] }
 0x2d1   :  { %4172 = vmatprep.subr.bf16.mxu0 %v8553_v50  ;;  %4204 = vmatprep.subr.bf16.mxu1 %v8554_v55  ;;  %v8564_v55 = vld [vmem:[#allocation74_spill] sm:$0xff] }
 0x2d4   :  { %4174 = vmatpush1.bf16.msra.mxu0 %v8555_v51  ;;  %4206 = vmatpush1.bf16.msra.mxu1 %v8556_v36  ;;  %v8565_v36 = vld [vmem:[#allocation63_spill] sm:$0xff] }
 0x2d5   :  { %4176 = vmatprep.subr.bf16.mxu0 %v8557_v22  ;;  %4208 = vmatprep.subr.bf16.mxu1 %v8558_v41  ;;  %v8566_v41 = vld [vmem:[#allocation67_spill] sm:$0xff] }
 0x2d8   :  { %4178 = vmatpush1.bf16.msra.mxu0 %v8559_v44  ;;  %4210 = vmatpush1.bf16.msra.mxu1 %v8560_v25 }
 0x2d9   :  { %4180 = vmatprep.subr.bf16.mxu0 %v8561_v28  ;;  %4212 = vmatprep.subr.bf16.mxu1 %v8562_v30 }
 0x2dc   :  { %4182 = vmatpush1.bf16.msra.mxu0 %v8563_v34  ;;  %4214 = vmatpush1.bf16.msra.mxu1 %v7184_v58 }
 0x2dd   :  { %4184 = vmatprep.subr.bf16.mxu0 %v8564_v55  ;;  %4216 = vmatprep.subr.bf16.mxu1 %v7187_v59 }
 0x2e0   :  { %4186 = vmatpush1.bf16.msra.mxu0 %v8565_v36  ;;  %4218 = vmatpush1.bf16.msra.mxu1 %v7220_v27 }
 0x2e1   :  { %4188 = vmatprep.subr.bf16.mxu0 %v8566_v41  ;;  %4220 = vmatprep.subr.bf16.mxu1 %v7223_v19 }
 0x2e4   :  { %4190 = vmatpush1.bf16.msra.mxu0 %v7232_v62  ;;  %4222 = vmatpush1.bf16.msra.mxu1 %v7250_v56 }
 0x2e5   :  { %4192 = vmatprep.subr.bf16.mxu0 %v7241_v31  ;;  %4224 = vmatprep.subr.bf16.mxu1 %v7253_v52 }
 0x2e8   :  { %4194 = vmatpush1.bf16.msra.mxu0 %v7262_v53  ;;  %4226 = vmatpush1.bf16.msra.mxu1 %v7266_v37 }
 0x2e9   :  { %4228 = vmatprep.subr.bf16.mxu0 %v6659_v42  ;;  %4292 = vmatprep.subr.bf16.mxu1 %v6674_v1 }
 0x2eb   :  { %1689 = vmatmul.mubr.f32.vlgmr.msra.gmra.mrb[4].mxu0 %v1453_v46  ;;  %1760 = vmatmul.mubr.f32.vlgmr.msra.gmra.mrb[4].mxu1 %v1453_v46  ;;  %v8567_v46 = vld [vmem:[#allocation26_spill] sm:$0xff] }
 0x2ec   :  { %4230 = vmatpush1.bf16.msra.mxu0 %v6663_v47  ;;  %4294 = vmatpush1.bf16.msra.mxu1 %v6678_v0 }
 0x2ed   :  { %4232 = vmatprep.subr.bf16.mxu0 %v6667_v57  ;;  %4296 = vmatprep.subr.bf16.mxu1 %v6687_v5 }
 0x2f0   :  { %4234 = vmatpush1.bf16.msra.mxu0 %v6683_v4  ;;  %4298 = vmatpush1.bf16.msra.mxu1 %v6698_v2 }
 0x2f1   :  { %4236 = vmatprep.subr.bf16.mxu0 %v6692_v3  ;;  %4300 = vmatprep.subr.bf16.mxu1 %v6703_v6 }
 0x2f4   :  { %4238 = vmatpush1.bf16.msra.mxu0 %v6708_v7  ;;  %4302 = vmatpush1.bf16.msra.mxu1 %v6718_v9 }
 0x2f5   :  { %4240 = vmatprep.subr.bf16.mxu0 %v6713_v8  ;;  %4304 = vmatprep.subr.bf16.mxu1 %v6723_v10 }
 0x2f8   :  { %4242 = vmatpush1.bf16.msra.mxu0 %v6728_v11  ;;  %4306 = vmatpush1.bf16.msra.mxu1 %v6738_v13 }
 0x2f9   :  { %4244 = vmatprep.subr.bf16.mxu0 %v6733_v12  ;;  %4308 = vmatprep.subr.bf16.mxu1 %v6743_v14 }
 0x2fc   :  { %4246 = vmatpush1.bf16.msra.mxu0 %v6748_v15  ;;  %4310 = vmatpush1.bf16.msra.mxu1 %v6758_v17  ;;  %v8602_v17 = vld [vmem:[#allocation96_spill] sm:$0xff] }
 0x2fd   :  { %4248 = vmatprep.subr.bf16.mxu0 %v6753_v16  ;;  %4312 = vmatprep.subr.bf16.mxu1 %v6763_v20  ;;  %v8600_v20 = vld [vmem:[#allocation95_spill] sm:$0xff] }
 0x300   :  { %4250 = vmatpush1.bf16.msra.mxu0 %v6768_v23  ;;  %4314 = vmatpush1.bf16.msra.mxu1 %v6778_v29  ;;  %v8599_v29 = vld [vmem:[#allocation93_spill] sm:$0xff] }
 0x301   :  { %4252 = vmatprep.subr.bf16.mxu0 %v6773_v26  ;;  %4316 = vmatprep.subr.bf16.mxu1 %v6783_v32  ;;  %v8568_v26 = vld [vmem:[#allocation19_spill] sm:$0xff] }
 0x302   :  { %v8569_v32 = vld [vmem:[#allocation15_spill] sm:$0xff] }
 0x304   :  { %4254 = vmatpush1.bf16.msra.mxu0 %v6788_v35  ;;  %4318 = vmatpush1.bf16.msra.mxu1 %v6798_v45  ;;  %v8570_v35 = vld [vmem:[#allocation24_spill] sm:$0xff] }
 0x305   :  { %4256 = vmatprep.subr.bf16.mxu0 %v6793_v38  ;;  %4320 = vmatprep.subr.bf16.mxu1 %v6803_v63  ;;  %v8571_v45 = vld [vmem:[#allocation28_spill] sm:$0xff]  ;;  %v8572_v38 = vld [vmem:[#allocation25_spill] sm:$0xff] }
 0x306   :  { %v8573_v63 = vld [vmem:[#allocation21_spill] sm:$0xff] }
 0x308   :  { %4258 = vmatpush1.bf16.msra.mxu0 %v6808_v43  ;;  %4322 = vmatpush1.bf16.msra.mxu1 %v6818_v61  ;;  %v8574_v43 = vld [vmem:[#allocation30_spill] sm:$0xff] }
 0x309   :  { %4260 = vmatprep.subr.bf16.mxu0 %v6813_v54  ;;  %4324 = vmatprep.subr.bf16.mxu1 %v6823_v21  ;;  %v8575_v61 = vld [vmem:[#allocation34_spill] sm:$0xff]  ;;  %v8576_v54 = vld [vmem:[#allocation27_spill] sm:$0xff] }
 0x30a   :  { %v8577_v21 = vld [vmem:[#allocation23_spill] sm:$0xff] }
 0x30c   :  { %4262 = vmatpush1.bf16.msra.mxu0 %v8567_v46  ;;  %4326 = vmatpush1.bf16.msra.mxu1 %v8568_v26  ;;  %v8578_v46 = vld [vmem:[#allocation32_spill] sm:$0xff] }
 0x30d   :  { %4264 = vmatprep.subr.bf16.mxu0 %v8569_v32  ;;  %4328 = vmatprep.subr.bf16.mxu1 %v8570_v35  ;;  %v8579_v26 = vld [vmem:[#allocation36_spill] sm:$0xff]  ;;  %v8580_v32 = vld [vmem:[#allocation33_spill] sm:$0xff] }
 0x30e   :  { %v8581_v35 = vld [vmem:[#allocation29_spill] sm:$0xff] }
 0x310   :  { %4266 = vmatpush1.bf16.msra.mxu0 %v8571_v45  ;;  %4330 = vmatpush1.bf16.msra.mxu1 %v8572_v38  ;;  %v8582_v45 = vld [vmem:[#allocation38_spill] sm:$0xff] }
 0x311   :  { %4268 = vmatprep.subr.bf16.mxu0 %v8573_v63  ;;  %4332 = vmatprep.subr.bf16.mxu1 %v8574_v43  ;;  %v8583_v38 = vld [vmem:[#allocation42_spill] sm:$0xff]  ;;  %v8584_v63 = vld [vmem:[#allocation35_spill] sm:$0xff] }
 0x312   :  { %v8585_v43 = vld [vmem:[#allocation31_spill] sm:$0xff] }
 0x314   :  { %4270 = vmatpush1.bf16.msra.mxu0 %v8575_v61  ;;  %4334 = vmatpush1.bf16.msra.mxu1 %v8576_v54  ;;  %v8586_v61 = vld [vmem:[#allocation40_spill] sm:$0xff] }
 0x315   :  { %4272 = vmatprep.subr.bf16.mxu0 %v8577_v21  ;;  %4336 = vmatprep.subr.bf16.mxu1 %v8578_v46  ;;  %v8587_v54 = vld [vmem:[#allocation44_spill] sm:$0xff]  ;;  %v8588_v21 = vld [vmem:[#allocation41_spill] sm:$0xff] }
 0x316   :  { %v8589_v46 = vld [vmem:[#allocation37_spill] sm:$0xff] }
 0x318   :  { %4274 = vmatpush1.bf16.msra.mxu0 %v8579_v26  ;;  %4338 = vmatpush1.bf16.msra.mxu1 %v8580_v32  ;;  %v8590_v26 = vld [vmem:[#allocation46_spill] sm:$0xff] }
 0x319   :  { %4276 = vmatprep.subr.bf16.mxu0 %v8581_v35  ;;  %4340 = vmatprep.subr.bf16.mxu1 %v8582_v45  ;;  %v8591_v32 = vld [vmem:[#allocation50_spill] sm:$0xff]  ;;  %v8592_v35 = vld [vmem:[#allocation43_spill] sm:$0xff] }
 0x31a   :  { %v8593_v45 = vld [vmem:[#allocation39_spill] sm:$0xff] }
 0x31c   :  { %4278 = vmatpush1.bf16.msra.mxu0 %v8583_v38  ;;  %4342 = vmatpush1.bf16.msra.mxu1 %v8584_v63  ;;  %v8594_v38 = vld [vmem:[#allocation48_spill] sm:$0xff] }
 0x31d   :  { %4280 = vmatprep.subr.bf16.mxu0 %v8585_v43  ;;  %4344 = vmatprep.subr.bf16.mxu1 %v8586_v61  ;;  %v8595_v63 = vld [vmem:[#allocation52_spill] sm:$0xff]  ;;  %v8596_v43 = vld [vmem:[#allocation49_spill] sm:$0xff] }
 0x31e   :  { %v8597_v61 = vld [vmem:[#allocation45_spill] sm:$0xff] }
 0x320   :  { %4282 = vmatpush1.bf16.msra.mxu0 %v8587_v54  ;;  %4346 = vmatpush1.bf16.msra.mxu1 %v8588_v21  ;;  %v8598_v54 = vld [vmem:[#allocation54_spill] sm:$0xff] }
 0x321   :  { %4284 = vmatprep.subr.bf16.mxu0 %v8589_v46  ;;  %4348 = vmatprep.subr.bf16.mxu1 %v8590_v26 }
 0x324   :  { %4286 = vmatpush1.bf16.msra.mxu0 %v8591_v32  ;;  %4350 = vmatpush1.bf16.msra.mxu1 %v8592_v35 }
 0x325   :  { %4288 = vmatprep.subr.bf16.mxu0 %v8593_v45  ;;  %4352 = vmatprep.subr.bf16.mxu1 %v8594_v38  ;;  %v8601_v38 = vld [vmem:[#allocation94_spill] sm:$0xff] }
 0x328   :  { %4290 = vmatpush1.bf16.msra.mxu0 %v8595_v63  ;;  %4354 = vmatpush1.bf16.msra.mxu1 %v8596_v43 }
 0x329   :  { %4356 = vmatprep.subr.bf16.mxu0 %v8597_v61  ;;  %4388 = vmatprep.subr.bf16.mxu1 %v8598_v54 }
 0x39e   :  { %v1520_v21 = vpop.f32.mrb[18].mxu0  ;;  %v1591_v46 = vpop.f32.mrb[18].mxu1 }
 0x39f   :  { %v1521_v26 = vadd.f32 %v1520_v21, %v8599_v29  ;;  %v1522_v23 = vpop.f32.mrb[19].mxu0  ;;  %v1593_v32 = vpop.f32.mrb[19].mxu1  ;;  %v1592_v63 = vadd.f32 %v1591_v46, %v8601_v38 }
 0x3a0   :  { %v1523_v35 = vadd.f32 %v1522_v23, %v8600_v20  ;;  %v1594_v43 = vadd.f32 %v1593_v32, %v8602_v17 }
 0x3a1   :  { %v3729_v16 = vmul.f32 -1.442695, %v1521_v26  ;;  %v3731_v15 = vmul.f32 -1.442695, %v1592_v63 }
 0x3a2   :  { %v3730_v45 = vmul.f32 -1.442695, %v1523_v35 }
 0x3a3   :  { %5428 = vpow2.f32 %v3729_v16 }
 0x3a4   :  { %5430 = vpow2.f32 %v3730_v45 }
 0x3a5   :  { %5432 = vtanh.f32 %v1594_v43 }
 0x3a6   :  { %5434 = vpow2.f32 %v3731_v15 }
 0x3ad   :  { %v5429_v61 = vpop.eup %5428 }
 0x3ae   :  { %v1605_v14 = vadd.f32 1.0, %v5429_v61  ;;  %v5431_v54 = vpop.eup %5430 }
 0x3af   :  { %v1606_v21 = vadd.f32 1.0, %v5431_v54  ;;  %v5433_v29 = vpop.eup %5432 }
 0x3b0   :  { %5436 = vrcp.f32 %v1605_v14  ;;  %v5435_v12 = vpop.eup %5434 }
 0x3b1   :  { %5438 = vrcp.f32 %v1606_v21  ;;  %v1607_v16 = vadd.f32 1.0, %v5435_v12  ;;  %v8603_v12 = vld [vmem:[#allocation99_spill] sm:$0xff]  ;;  %v8604_v21 = vld [vmem:[#allocation100_spill] sm:$0xff] }
 0x3b3   :  { %5440 = vrcp.f32 %v1607_v16 }
 0x3ba   :  { %v5437_v23 = vpop.eup %5436 }
 0x3bb   :  { %v1616_v26 = vmul.f32 %v5437_v23, %v5433_v29  ;;  %v5439_v35 = vpop.eup %5438 }
 0x3bc   :  { %v1615_v45 = vmul.f32 %v5439_v35, %v7343_v60 }
 0x3bd   :  { %v5441_v60 = vpop.eup %5440 }
 0x3be   :  { %v1690_v46 = vpop.f32.mrb[4].mxu0  ;;  %v1761_v38 = vpop.f32.mrb[4].mxu1  ;;  %v7460_v32 = vadd.f32 %v1616_v26, %v1615_v45 }
 0x3bf   :  { %v5319_v63 = vadd.f32 %v1690_v46, %v8542_v40  ;;  %v1692_v43 = vpop.f32.mrb[5].mxu0  ;;  %v1763_v61 = vpop.f32.mrb[5].mxu1  ;;  %v5335_v29 = vadd.f32 %v1761_v38, %v8603_v12 }
 0x3c0   :  { %v5320_v14 = vadd.f32 %v1692_v43, %v8543_v33  ;;  %5442 = vtanh.f32 %v7460_v32  ;;  %v5336_v23 = vadd.f32 %v1763_v61, %v8604_v21 }
 0x3c1   :  { %v3732_v15 = vmul.f32 -1.442695, %v5319_v63  ;;  %v3734_v35 = vmul.f32 -1.442695, %v5335_v29 }
 0x3c2   :  { %v3733_v54 = vmul.f32 -1.442695, %v5320_v14 }
 0x3c3   :  { %5444 = vpow2.f32 %v3732_v15 }
 0x3c4   :  { %5446 = vpow2.f32 %v3733_v54 }
 0x3c5   :  { %5448 = vtanh.f32 %v5336_v23 }
 0x3c6   :  { %5450 = vpow2.f32 %v3734_v35  ;;  %v8607_v35 = vld [vmem:[#allocation53_spill] sm:$0xff] }
 0x3ca   :  { %v5443_v26 = vpop.eup %5442 }
 0x3cb   :  { %v1619_v45 = vmul.f32 %v5443_v26, %v5441_v60 }
 0x3cd   :  { %v5445_v46 = vpop.eup %5444  ;;  %1858 = vmatprep.mubr.f32.mxu0 %v1619_v45  ;;  %3661 = vst [vmem:[%s8080_s6 + $0x8] sm:$0xff] %v1619_v45  ;;  %1929 = vmatprep.mubr.f32.mxu1 %v1619_v45 }
 0x3ce   :  { %v1779_v40 = vadd.f32 1.0, %v5445_v46  ;;  %v5447_v16 = vpop.eup %5446  ;;  %v8608_v46 = vld [vmem:[#allocation57_spill] sm:$0xff] }
 0x3cf   :  { %v1780_v63 = vadd.f32 1.0, %v5447_v16  ;;  %v5449_v38 = vpop.eup %5448  ;;  %v8609_v16 = vld [vmem:[#allocation55_spill] sm:$0xff] }
 0x3d0   :  { %5452 = vrcp.f32 %v1779_v40  ;;  %v5451_v43 = vpop.eup %5450  ;;  %v8605_v40 = vmov 0.0  }
 0x3d1   :  { %5454 = vrcp.f32 %v1780_v63  ;;  %v1781_v54 = vadd.f32 1.0, %v5451_v43  ;;  %v8610_v63 = vld [vmem:[#allocation59_spill] sm:$0xff] }
 0x3d2   :  { %v8612_v43 = vld [vmem:[#allocation111_spill] sm:$0xff] }
 0x3d3   :  { %5456 = vrcp.f32 %v1781_v54  ;;  %v8616_v54 = vld [vmem:[#allocation9_spill] sm:$0xff] }
 0x3da   :  { %v5453_v61 = vpop.eup %5452 }
 0x3db   :  { %v1790_v14 = vmul.f32 %v5453_v61, %v5449_v38  ;;  %v5455_v15 = vpop.eup %5454  ;;  %v8611_v38 = vld [vmem:[#allocation109_spill] sm:$0xff]  ;;  %v8613_v61 = vld [vmem:[#allocation112_spill] sm:$0xff] }
 0x3dc   :  { %v1789_v29 = vmul.f32 %v5455_v15, %v7354_v24  ;;  %v8606_v24 = vld [vmem:[#allocation56_spill] sm:$0xff]  ;;  %v8615_v15 = vld [vmem:[#allocation113_spill] sm:$0xff] }
 0x3dd   :  { %v5457_v23 = vpop.eup %5456 }
 0x3de   :  { %v7471_v60 = vadd.f32 %v1790_v14, %v1789_v29  ;;  %v8614_v14 = vld [vmem:[#allocation114_spill] sm:$0xff]  ;;  %v8617_v29 = vld [vmem:[#allocation12_spill] sm:$0xff] }
 0x3e0   :  { %5458 = vtanh.f32 %v7471_v60 }
 0x3ea   :  { %v5459_v26 = vpop.eup %5458 }
 0x3eb   :  { %v1793_v45 = vmul.f32 %v5459_v26, %v5457_v23  ;;  %v8618_v23 = vld [vmem:[#allocation10_spill] sm:$0xff]  ;;  %v8619_v26 = vld [vmem:[#allocation7_spill] sm:$0xff] }
 0x3ed   :  { %1859 = vmatmul.mubr.f32.vlgmr.msra.gmra.mrb[20].mxu0 %v1793_v45  ;;  %1930 = vmatmul.mubr.f32.vlgmr.msra.gmra.mrb[20].mxu1 %v1793_v45 }
 0x3ee   :  { %4358 = vmatpush1.bf16.msra.mxu0 %v8547_v49  ;;  %4390 = vmatpush1.bf16.msra.mxu1 %v7036_v18 }
 0x3ef   :  { %4360 = vmatprep.subr.bf16.mxu0 %v8548_v48  ;;  %4392 = vmatprep.subr.bf16.mxu1 %v8549_v39 }
 0x3f0   :  { %2028 = vmatprep.mubr.f32.mxu0 %v8605_v40  ;;  %2099 = vmatprep.mubr.f32.mxu1 %v8605_v40 }
 0x3f2   :  { %4362 = vmatpush1.bf16.msra.mxu0 %v8606_v24  ;;  %4394 = vmatpush1.bf16.msra.mxu1 %v8607_v35 }
 0x3f3   :  { %4364 = vmatprep.subr.bf16.mxu0 %v8553_v50  ;;  %4396 = vmatprep.subr.bf16.mxu1 %v8608_v46 }
 0x3f6   :  { %4366 = vmatpush1.bf16.msra.mxu0 %v8555_v51  ;;  %4398 = vmatpush1.bf16.msra.mxu1 %v8609_v16 }
 0x3f7   :  { %4368 = vmatprep.subr.bf16.mxu0 %v8557_v22  ;;  %4400 = vmatprep.subr.bf16.mxu1 %v8610_v63 }
 0x3fa   :  { %4370 = vmatpush1.bf16.msra.mxu0 %v8559_v44  ;;  %4402 = vmatpush1.bf16.msra.mxu1 %v8560_v25 }
 0x3fb   :  { %4372 = vmatprep.subr.bf16.mxu0 %v8561_v28  ;;  %4404 = vmatprep.subr.bf16.mxu1 %v8562_v30 }
 0x3fe   :  { %4374 = vmatpush1.bf16.msra.mxu0 %v8563_v34  ;;  %4406 = vmatpush1.bf16.msra.mxu1 %v7184_v58 }
 0x3ff   :  { %4376 = vmatprep.subr.bf16.mxu0 %v8564_v55  ;;  %4408 = vmatprep.subr.bf16.mxu1 %v7187_v59 }
 0x402   :  { %4378 = vmatpush1.bf16.msra.mxu0 %v8565_v36  ;;  %4410 = vmatpush1.bf16.msra.mxu1 %v7220_v27 }
 0x403   :  { %4380 = vmatprep.subr.bf16.mxu0 %v8566_v41  ;;  %4412 = vmatprep.subr.bf16.mxu1 %v7223_v19 }
 0x406   :  { %4382 = vmatpush1.bf16.msra.mxu0 %v7232_v62  ;;  %4414 = vmatpush1.bf16.msra.mxu1 %v7250_v56 }
 0x407   :  { %4384 = vmatprep.subr.bf16.mxu0 %v7241_v31  ;;  %4416 = vmatprep.subr.bf16.mxu1 %v7253_v52 }
 0x40a   :  { %4386 = vmatpush1.bf16.msra.mxu0 %v7262_v53  ;;  %4418 = vmatpush1.bf16.msra.mxu1 %v7266_v37 }
 0x40b   :  { %4420 = vmatprep.subr.bf16.mxu0 %v6659_v42  ;;  %4484 = vmatprep.subr.bf16.mxu1 %v6674_v1 }
 0x40d   :  { %2029 = vmatmul.mubr.f32.vlgmr.msra.gmra.mrb[6].mxu0 %v1793_v45  ;;  %2100 = vmatmul.mubr.f32.vlgmr.msra.gmra.mrb[6].mxu1 %v1793_v45  ;;  %v8620_v45 = vld [vmem:[#allocation14_spill] sm:$0xff] }
 0x40e   :  { %4422 = vmatpush1.bf16.msra.mxu0 %v6663_v47  ;;  %4486 = vmatpush1.bf16.msra.mxu1 %v6678_v0 }
 0x40f   :  { %4424 = vmatprep.subr.bf16.mxu0 %v6667_v57  ;;  %4488 = vmatprep.subr.bf16.mxu1 %v6687_v5 }
 0x412   :  { %4426 = vmatpush1.bf16.msra.mxu0 %v6683_v4  ;;  %4490 = vmatpush1.bf16.msra.mxu1 %v6698_v2 }
 0x413   :  { %4428 = vmatprep.subr.bf16.mxu0 %v6692_v3  ;;  %4492 = vmatprep.subr.bf16.mxu1 %v6703_v6 }
 0x416   :  { %4430 = vmatpush1.bf16.msra.mxu0 %v6708_v7  ;;  %4494 = vmatpush1.bf16.msra.mxu1 %v6718_v9 }
 0x417   :  { %4432 = vmatprep.subr.bf16.mxu0 %v6713_v8  ;;  %4496 = vmatprep.subr.bf16.mxu1 %v6723_v10 }
 0x41a   :  { %4434 = vmatpush1.bf16.msra.mxu0 %v6728_v11  ;;  %4498 = vmatpush1.bf16.msra.mxu1 %v6738_v13  ;;  %v8621_v13 = vld [vmem:[#allocation18_spill] sm:$0xff]  ;;  %v8661_v11 = vld [vmem:[#allocation93_spill] sm:$0xff] }
 0x41b   :  { %4436 = vmatprep.subr.bf16.mxu0 %v8611_v38  ;;  %4500 = vmatprep.subr.bf16.mxu1 %v8612_v43  ;;  %v8622_v38 = vld [vmem:[#allocation11_spill] sm:$0xff]  ;;  %v8623_v43 = vld [vmem:[#allocation8_spill] sm:$0xff] }
 0x41e   :  { %4438 = vmatpush1.bf16.msra.mxu0 %v8613_v61  ;;  %4502 = vmatpush1.bf16.msra.mxu1 %v8614_v14  ;;  %v8624_v61 = vld [vmem:[#allocation16_spill] sm:$0xff] }
 0x41f   :  { %4440 = vmatprep.subr.bf16.mxu0 %v8615_v15  ;;  %4504 = vmatprep.subr.bf16.mxu1 %v8616_v54  ;;  %v8625_v14 = vld [vmem:[#allocation20_spill] sm:$0xff]  ;;  %v8626_v15 = vld [vmem:[#allocation17_spill] sm:$0xff] }
 0x420   :  { %v8627_v54 = vld [vmem:[#allocation13_spill] sm:$0xff] }
 0x422   :  { %4442 = vmatpush1.bf16.msra.mxu0 %v8617_v29  ;;  %4506 = vmatpush1.bf16.msra.mxu1 %v8618_v23  ;;  %v8628_v29 = vld [vmem:[#allocation22_spill] sm:$0xff] }
 0x423   :  { %4444 = vmatprep.subr.bf16.mxu0 %v8619_v26  ;;  %4508 = vmatprep.subr.bf16.mxu1 %v8620_v45  ;;  %v8629_v23 = vld [vmem:[#allocation26_spill] sm:$0xff]  ;;  %v8630_v26 = vld [vmem:[#allocation19_spill] sm:$0xff] }
 0x424   :  { %v8631_v45 = vld [vmem:[#allocation15_spill] sm:$0xff] }
 0x426   :  { %4446 = vmatpush1.bf16.msra.mxu0 %v8621_v13  ;;  %4510 = vmatpush1.bf16.msra.mxu1 %v8622_v38  ;;  %v8632_v13 = vld [vmem:[#allocation24_spill] sm:$0xff] }
 0x427   :  { %4448 = vmatprep.subr.bf16.mxu0 %v8623_v43  ;;  %4512 = vmatprep.subr.bf16.mxu1 %v8624_v61  ;;  %v8633_v38 = vld [vmem:[#allocation28_spill] sm:$0xff]  ;;  %v8634_v43 = vld [vmem:[#allocation25_spill] sm:$0xff] }
 0x428   :  { %v8635_v61 = vld [vmem:[#allocation21_spill] sm:$0xff] }
 0x42a   :  { %4450 = vmatpush1.bf16.msra.mxu0 %v8625_v14  ;;  %4514 = vmatpush1.bf16.msra.mxu1 %v8626_v15  ;;  %v8636_v14 = vld [vmem:[#allocation30_spill] sm:$0xff] }
 0x42b   :  { %4452 = vmatprep.subr.bf16.mxu0 %v8627_v54  ;;  %4516 = vmatprep.subr.bf16.mxu1 %v8628_v29  ;;  %v8637_v15 = vld [vmem:[#allocation34_spill] sm:$0xff]  ;;  %v8638_v54 = vld [vmem:[#allocation27_spill] sm:$0xff] }
 0x42c   :  { %v8639_v29 = vld [vmem:[#allocation23_spill] sm:$0xff] }
 0x42e   :  { %4454 = vmatpush1.bf16.msra.mxu0 %v8629_v23  ;;  %4518 = vmatpush1.bf16.msra.mxu1 %v8630_v26  ;;  %v8640_v23 = vld [vmem:[#allocation32_spill] sm:$0xff] }
 0x42f   :  { %4456 = vmatprep.subr.bf16.mxu0 %v8631_v45  ;;  %4520 = vmatprep.subr.bf16.mxu1 %v8632_v13  ;;  %v8641_v26 = vld [vmem:[#allocation36_spill] sm:$0xff]  ;;  %v8642_v45 = vld [vmem:[#allocation33_spill] sm:$0xff] }
 0x430   :  { %v8643_v13 = vld [vmem:[#allocation29_spill] sm:$0xff] }
 0x432   :  { %4458 = vmatpush1.bf16.msra.mxu0 %v8633_v38  ;;  %4522 = vmatpush1.bf16.msra.mxu1 %v8634_v43  ;;  %v8644_v38 = vld [vmem:[#allocation38_spill] sm:$0xff] }
 0x433   :  { %4460 = vmatprep.subr.bf16.mxu0 %v8635_v61  ;;  %4524 = vmatprep.subr.bf16.mxu1 %v8636_v14  ;;  %v8645_v43 = vld [vmem:[#allocation42_spill] sm:$0xff]  ;;  %v8646_v61 = vld [vmem:[#allocation35_spill] sm:$0xff] }
 0x434   :  { %v8647_v14 = vld [vmem:[#allocation31_spill] sm:$0xff] }
 0x436   :  { %4462 = vmatpush1.bf16.msra.mxu0 %v8637_v15  ;;  %4526 = vmatpush1.bf16.msra.mxu1 %v8638_v54  ;;  %v8648_v15 = vld [vmem:[#allocation40_spill] sm:$0xff] }
 0x437   :  { %4464 = vmatprep.subr.bf16.mxu0 %v8639_v29  ;;  %4528 = vmatprep.subr.bf16.mxu1 %v8640_v23  ;;  %v8649_v54 = vld [vmem:[#allocation44_spill] sm:$0xff]  ;;  %v8650_v29 = vld [vmem:[#allocation41_spill] sm:$0xff] }
 0x438   :  { %v8651_v23 = vld [vmem:[#allocation37_spill] sm:$0xff] }
 0x43a   :  { %4466 = vmatpush1.bf16.msra.mxu0 %v8641_v26  ;;  %4530 = vmatpush1.bf16.msra.mxu1 %v8642_v45  ;;  %v8652_v26 = vld [vmem:[#allocation46_spill] sm:$0xff] }
 0x43b   :  { %4468 = vmatprep.subr.bf16.mxu0 %v8643_v13  ;;  %4532 = vmatprep.subr.bf16.mxu1 %v8644_v38  ;;  %v8653_v45 = vld [vmem:[#allocation50_spill] sm:$0xff]  ;;  %v8654_v13 = vld [vmem:[#allocation43_spill] sm:$0xff] }
 0x43c   :  { %v8655_v38 = vld [vmem:[#allocation39_spill] sm:$0xff] }
 0x43e   :  { %4470 = vmatpush1.bf16.msra.mxu0 %v8645_v43  ;;  %4534 = vmatpush1.bf16.msra.mxu1 %v8646_v61  ;;  %v8656_v43 = vld [vmem:[#allocation48_spill] sm:$0xff] }
 0x43f   :  { %4472 = vmatprep.subr.bf16.mxu0 %v8647_v14  ;;  %4536 = vmatprep.subr.bf16.mxu1 %v8648_v15  ;;  %v8657_v61 = vld [vmem:[#allocation52_spill] sm:$0xff]  ;;  %v8658_v14 = vld [vmem:[#allocation49_spill] sm:$0xff] }
 0x440   :  { %v8659_v15 = vld [vmem:[#allocation45_spill] sm:$0xff] }
 0x442   :  { %4474 = vmatpush1.bf16.msra.mxu0 %v8649_v54  ;;  %4538 = vmatpush1.bf16.msra.mxu1 %v8650_v29  ;;  %v8660_v54 = vld [vmem:[#allocation54_spill] sm:$0xff] }
 0x443   :  { %4476 = vmatprep.subr.bf16.mxu0 %v8651_v23  ;;  %4540 = vmatprep.subr.bf16.mxu1 %v8652_v26 }
 0x446   :  { %4478 = vmatpush1.bf16.msra.mxu0 %v8653_v45  ;;  %4542 = vmatpush1.bf16.msra.mxu1 %v8654_v13 }
 0x447   :  { %4480 = vmatprep.subr.bf16.mxu0 %v8655_v38  ;;  %4544 = vmatprep.subr.bf16.mxu1 %v8656_v43  ;;  %v8662_v43 = vld [vmem:[#allocation94_spill] sm:$0xff] }
 0x44a   :  { %4482 = vmatpush1.bf16.msra.mxu0 %v8657_v61  ;;  %4546 = vmatpush1.bf16.msra.mxu1 %v8658_v14 }
 0x44b   :  { %4548 = vmatprep.subr.bf16.mxu0 %v8659_v15  ;;  %4580 = vmatprep.subr.bf16.mxu1 %v8660_v54 }
 0x4c0   :  { %v1860_v29 = vpop.f32.mrb[20].mxu0  ;;  %v1931_v23 = vpop.f32.mrb[20].mxu1 }
 0x4c1   :  { %v1861_v26 = vadd.f32 %v1860_v29, %v8661_v11  ;;  %v1862_v10 = vpop.f32.mrb[21].mxu0  ;;  %v1933_v45 = vpop.f32.mrb[21].mxu1  ;;  %v1932_v61 = vadd.f32 %v1931_v23, %v8662_v43 }
 0x4c2   :  { %v1863_v13 = vadd.f32 %v1862_v10, %v8600_v20  ;;  %v1934_v14 = vadd.f32 %v1933_v45, %v8602_v17 }
 0x4c3   :  { %v3735_v8 = vmul.f32 -1.442695, %v1861_v26  ;;  %v3737_v9 = vmul.f32 -1.442695, %v1932_v61  ;;  %v8663_v61 = vld [vmem:[#allocation97_spill] sm:$0xff] }
 0x4c4   :  { %v3736_v38 = vmul.f32 -1.442695, %v1863_v13 }
 0x4c5   :  { %5460 = vpow2.f32 %v3735_v8 }
 0x4c6   :  { %5462 = vpow2.f32 %v3736_v38 }
 0x4c7   :  { %5464 = vtanh.f32 %v1934_v14 }
 0x4c8   :  { %5466 = vpow2.f32 %v3737_v9 }
 0x4cf   :  { %v5461_v15 = vpop.eup %5460 }
 0x4d0   :  { %v1945_v7 = vadd.f32 1.0, %v5461_v15  ;;  %v5463_v54 = vpop.eup %5462 }
 0x4d1   :  { %v1946_v29 = vadd.f32 1.0, %v5463_v54  ;;  %v5465_v11 = vpop.eup %5464 }
 0x4d2   :  { %5468 = vrcp.f32 %v1945_v7  ;;  %v5467_v6 = vpop.eup %5466 }
 0x4d3   :  { %5470 = vrcp.f32 %v1946_v29  ;;  %v1947_v8 = vadd.f32 1.0, %v5467_v6 }
 0x4d5   :  { %5472 = vrcp.f32 %v1947_v8 }
 0x4dc   :  { %v5469_v10 = vpop.eup %5468 }
 0x4dd   :  { %v1956_v26 = vmul.f32 %v5469_v10, %v5465_v11  ;;  %v5471_v13 = vpop.eup %5470 }
 0x4de   :  { %v1955_v38 = vmul.f32 %v5471_v13, %v7460_v32 }
 0x4df   :  { %v5473_v11 = vpop.eup %5472 }
 0x4e0   :  { %v2030_v23 = vpop.f32.mrb[6].mxu0  ;;  %v2101_v43 = vpop.f32.mrb[6].mxu1  ;;  %v7577_v45 = vadd.f32 %v1956_v26, %v1955_v38 }
 0x4e1   :  { %v5321_v15 = vadd.f32 %v2030_v23, %v8663_v61  ;;  %v2032_v14 = vpop.f32.mrb[7].mxu0  ;;  %v2103_v17 = vpop.f32.mrb[7].mxu1  ;;  %v5337_v6 = vadd.f32 %v2101_v43, %v8603_v12 }
 0x4e2   :  { %v5322_v7 = vadd.f32 %v2032_v14, %v8543_v33  ;;  %5474 = vtanh.f32 %v7577_v45  ;;  %v5338_v32 = vadd.f32 %v2103_v17, %v8604_v21 }
 0x4e3   :  { %v3738_v9 = vmul.f32 -1.442695, %v5321_v15  ;;  %v3740_v10 = vmul.f32 -1.442695, %v5337_v6 }
 0x4e4   :  { %v3739_v54 = vmul.f32 -1.442695, %v5322_v7 }
 0x4e5   :  { %5476 = vpow2.f32 %v3738_v9 }
 0x4e6   :  { %5478 = vpow2.f32 %v3739_v54 }
 0x4e7   :  { %5480 = vtanh.f32 %v5338_v32 }
 0x4e8   :  { %5482 = vpow2.f32 %v3740_v10  ;;  %v8665_v10 = vld [vmem:[#allocation104_spill] sm:$0xff] }
 0x4ec   :  { %v5475_v29 = vpop.eup %5474 }
 0x4ed   :  { %v1959_v26 = vmul.f32 %v5475_v29, %v5473_v11 }
 0x4ef   :  { %v5477_v13 = vpop.eup %5476  ;;  %2198 = vmatprep.mubr.f32.mxu0 %v1959_v26  ;;  %3662 = vst [vmem:[%s8080_s6 + $0x10] sm:$0xff] %v1959_v26  ;;  %2269 = vmatprep.mubr.f32.mxu1 %v1959_v26  ;;  %v8666_v26 = vld [vmem:[#allocation106_spill] sm:$0xff] }
 0x4f0   :  { %v2119_v38 = vadd.f32 1.0, %v5477_v13  ;;  %v5479_v8 = vpop.eup %5478  ;;  %v8667_v13 = vld [vmem:[#allocation105_spill] sm:$0xff] }
 0x4f1   :  { %v2120_v23 = vadd.f32 1.0, %v5479_v8  ;;  %v5481_v43 = vpop.eup %5480  ;;  %v8669_v8 = vld [vmem:[#allocation108_spill] sm:$0xff] }
 0x4f2   :  { %5484 = vrcp.f32 %v2119_v38  ;;  %v5483_v15 = vpop.eup %5482  ;;  %v8668_v38 = vld [vmem:[#allocation107_spill] sm:$0xff] }
 0x4f3   :  { %5486 = vrcp.f32 %v2120_v23  ;;  %v2121_v9 = vadd.f32 1.0, %v5483_v15  ;;  %v8670_v23 = vld [vmem:[#allocation110_spill] sm:$0xff]  ;;  %v8672_v15 = vld [vmem:[#allocation111_spill] sm:$0xff] }
 0x4f5   :  { %5488 = vrcp.f32 %v2121_v9  ;;  %v8676_v9 = vld [vmem:[#allocation9_spill] sm:$0xff] }
 0x4fc   :  { %v5485_v17 = vpop.eup %5484 }
 0x4fd   :  { %v2130_v14 = vmul.f32 %v5485_v17, %v5481_v43  ;;  %v5487_v7 = vpop.eup %5486  ;;  %v8671_v43 = vld [vmem:[#allocation109_spill] sm:$0xff]  ;;  %v8673_v17 = vld [vmem:[#allocation112_spill] sm:$0xff] }
 0x4fe   :  { %v2129_v54 = vmul.f32 %v5487_v7, %v7471_v60  ;;  %v8664_v60 = vld [vmem:[#allocation103_spill] sm:$0xff]  ;;  %v8675_v7 = vld [vmem:[#allocation113_spill] sm:$0xff] }
 0x4ff   :  { %v5489_v11 = vpop.eup %5488 }
 0x500   :  { %v7588_v6 = vadd.f32 %v2130_v14, %v2129_v54  ;;  %v8674_v14 = vld [vmem:[#allocation114_spill] sm:$0xff]  ;;  %v8677_v54 = vld [vmem:[#allocation12_spill] sm:$0xff] }
 0x502   :  { %5490 = vtanh.f32 %v7588_v6 }
 0x50c   :  { %v5491_v32 = vpop.eup %5490 }
 0x50d   :  { %v2133_v29 = vmul.f32 %v5491_v32, %v5489_v11  ;;  %v8678_v11 = vld [vmem:[#allocation10_spill] sm:$0xff]  ;;  %v8679_v32 = vld [vmem:[#allocation7_spill] sm:$0xff] }
 0x50f   :  { %2199 = vmatmul.mubr.f32.vlgmr.msra.gmra.mrb[22].mxu0 %v2133_v29  ;;  %2270 = vmatmul.mubr.f32.vlgmr.msra.gmra.mrb[22].mxu1 %v2133_v29 }
 0x510   :  { %4550 = vmatpush1.bf16.msra.mxu0 %v8547_v49  ;;  %4582 = vmatpush1.bf16.msra.mxu1 %v7036_v18 }
 0x511   :  { %4552 = vmatprep.subr.bf16.mxu0 %v8548_v48  ;;  %4584 = vmatprep.subr.bf16.mxu1 %v8549_v39 }
 0x512   :  { %2368 = vmatprep.mubr.f32.mxu0 %v8605_v40  ;;  %2439 = vmatprep.mubr.f32.mxu1 %v8605_v40 }
 0x514   :  { %4554 = vmatpush1.bf16.msra.mxu0 %v8606_v24  ;;  %4586 = vmatpush1.bf16.msra.mxu1 %v8607_v35 }
 0x515   :  { %4556 = vmatprep.subr.bf16.mxu0 %v8553_v50  ;;  %4588 = vmatprep.subr.bf16.mxu1 %v8608_v46 }
 0x518   :  { %4558 = vmatpush1.bf16.msra.mxu0 %v8555_v51  ;;  %4590 = vmatpush1.bf16.msra.mxu1 %v8609_v16 }
 0x519   :  { %4560 = vmatprep.subr.bf16.mxu0 %v8557_v22  ;;  %4592 = vmatprep.subr.bf16.mxu1 %v8610_v63 }
 0x51c   :  { %4562 = vmatpush1.bf16.msra.mxu0 %v8559_v44  ;;  %4594 = vmatpush1.bf16.msra.mxu1 %v8560_v25 }
 0x51d   :  { %4564 = vmatprep.subr.bf16.mxu0 %v8561_v28  ;;  %4596 = vmatprep.subr.bf16.mxu1 %v8562_v30 }
 0x520   :  { %4566 = vmatpush1.bf16.msra.mxu0 %v8563_v34  ;;  %4598 = vmatpush1.bf16.msra.mxu1 %v7184_v58 }
 0x521   :  { %4568 = vmatprep.subr.bf16.mxu0 %v8564_v55  ;;  %4600 = vmatprep.subr.bf16.mxu1 %v7187_v59 }
 0x524   :  { %4570 = vmatpush1.bf16.msra.mxu0 %v8565_v36  ;;  %4602 = vmatpush1.bf16.msra.mxu1 %v7220_v27 }
 0x525   :  { %4572 = vmatprep.subr.bf16.mxu0 %v8566_v41  ;;  %4604 = vmatprep.subr.bf16.mxu1 %v7223_v19 }
 0x528   :  { %4574 = vmatpush1.bf16.msra.mxu0 %v7232_v62  ;;  %4606 = vmatpush1.bf16.msra.mxu1 %v7250_v56 }
 0x529   :  { %4576 = vmatprep.subr.bf16.mxu0 %v7241_v31  ;;  %4608 = vmatprep.subr.bf16.mxu1 %v7253_v52 }
 0x52c   :  { %4578 = vmatpush1.bf16.msra.mxu0 %v7262_v53  ;;  %4610 = vmatpush1.bf16.msra.mxu1 %v7266_v37 }
 0x52d   :  { %4612 = vmatprep.subr.bf16.mxu0 %v6659_v42  ;;  %4676 = vmatprep.subr.bf16.mxu1 %v6674_v1 }
 0x52f   :  { %2369 = vmatmul.mubr.f32.vlgmr.msra.gmra.mrb[8].mxu0 %v2133_v29  ;;  %2440 = vmatmul.mubr.f32.vlgmr.msra.gmra.mrb[8].mxu1 %v2133_v29  ;;  %v8680_v29 = vld [vmem:[#allocation14_spill] sm:$0xff] }
 0x530   :  { %4614 = vmatpush1.bf16.msra.mxu0 %v6663_v47  ;;  %4678 = vmatpush1.bf16.msra.mxu1 %v6678_v0 }
 0x531   :  { %4616 = vmatprep.subr.bf16.mxu0 %v6667_v57  ;;  %4680 = vmatprep.subr.bf16.mxu1 %v6687_v5 }
 0x534   :  { %4618 = vmatpush1.bf16.msra.mxu0 %v6683_v4  ;;  %4682 = vmatpush1.bf16.msra.mxu1 %v6698_v2 }
 0x535   :  { %4620 = vmatprep.subr.bf16.mxu0 %v6692_v3  ;;  %4684 = vmatprep.subr.bf16.mxu1 %v8664_v60 }
 0x538   :  { %4622 = vmatpush1.bf16.msra.mxu0 %v8665_v10  ;;  %4686 = vmatpush1.bf16.msra.mxu1 %v8666_v26  ;;  %v8723_v26 = vld [vmem:[#allocation96_spill] sm:$0xff] }
 0x539   :  { %4624 = vmatprep.subr.bf16.mxu0 %v8667_v13  ;;  %4688 = vmatprep.subr.bf16.mxu1 %v8668_v38 }
 0x53c   :  { %4626 = vmatpush1.bf16.msra.mxu0 %v8669_v8  ;;  %4690 = vmatpush1.bf16.msra.mxu1 %v8670_v23  ;;  %v8681_v23 = vld [vmem:[#allocation18_spill] sm:$0xff]  ;;  %v8721_v8 = vld [vmem:[#allocation93_spill] sm:$0xff] }
 0x53d   :  { %4628 = vmatprep.subr.bf16.mxu0 %v8671_v43  ;;  %4692 = vmatprep.subr.bf16.mxu1 %v8672_v15  ;;  %v8682_v43 = vld [vmem:[#allocation11_spill] sm:$0xff]  ;;  %v8683_v15 = vld [vmem:[#allocation8_spill] sm:$0xff] }
 0x540   :  { %4630 = vmatpush1.bf16.msra.mxu0 %v8673_v17  ;;  %4694 = vmatpush1.bf16.msra.mxu1 %v8674_v14  ;;  %v8684_v17 = vld [vmem:[#allocation16_spill] sm:$0xff] }
 0x541   :  { %4632 = vmatprep.subr.bf16.mxu0 %v8675_v7  ;;  %4696 = vmatprep.subr.bf16.mxu1 %v8676_v9  ;;  %v8685_v14 = vld [vmem:[#allocation20_spill] sm:$0xff]  ;;  %v8686_v7 = vld [vmem:[#allocation17_spill] sm:$0xff] }
 0x542   :  { %v8687_v9 = vld [vmem:[#allocation13_spill] sm:$0xff] }
 0x544   :  { %4634 = vmatpush1.bf16.msra.mxu0 %v8677_v54  ;;  %4698 = vmatpush1.bf16.msra.mxu1 %v8678_v11  ;;  %v8688_v54 = vld [vmem:[#allocation22_spill] sm:$0xff] }
 0x545   :  { %4636 = vmatprep.subr.bf16.mxu0 %v8679_v32  ;;  %4700 = vmatprep.subr.bf16.mxu1 %v8680_v29  ;;  %v8689_v11 = vld [vmem:[#allocation26_spill] sm:$0xff]  ;;  %v8690_v32 = vld [vmem:[#allocation19_spill] sm:$0xff] }
 0x546   :  { %v8691_v29 = vld [vmem:[#allocation15_spill] sm:$0xff] }
 0x548   :  { %4638 = vmatpush1.bf16.msra.mxu0 %v8681_v23  ;;  %4702 = vmatpush1.bf16.msra.mxu1 %v8682_v43  ;;  %v8692_v23 = vld [vmem:[#allocation24_spill] sm:$0xff] }
 0x549   :  { %4640 = vmatprep.subr.bf16.mxu0 %v8683_v15  ;;  %4704 = vmatprep.subr.bf16.mxu1 %v8684_v17  ;;  %v8693_v43 = vld [vmem:[#allocation28_spill] sm:$0xff]  ;;  %v8694_v15 = vld [vmem:[#allocation25_spill] sm:$0xff] }
 0x54a   :  { %v8695_v17 = vld [vmem:[#allocation21_spill] sm:$0xff] }
 0x54c   :  { %4642 = vmatpush1.bf16.msra.mxu0 %v8685_v14  ;;  %4706 = vmatpush1.bf16.msra.mxu1 %v8686_v7  ;;  %v8696_v14 = vld [vmem:[#allocation30_spill] sm:$0xff] }
 0x54d   :  { %4644 = vmatprep.subr.bf16.mxu0 %v8687_v9  ;;  %4708 = vmatprep.subr.bf16.mxu1 %v8688_v54  ;;  %v8697_v7 = vld [vmem:[#allocation34_spill] sm:$0xff]  ;;  %v8698_v9 = vld [vmem:[#allocation27_spill] sm:$0xff] }
 0x54e   :  { %v8699_v54 = vld [vmem:[#allocation23_spill] sm:$0xff] }
 0x550   :  { %4646 = vmatpush1.bf16.msra.mxu0 %v8689_v11  ;;  %4710 = vmatpush1.bf16.msra.mxu1 %v8690_v32  ;;  %v8700_v11 = vld [vmem:[#allocation32_spill] sm:$0xff] }
 0x551   :  { %4648 = vmatprep.subr.bf16.mxu0 %v8691_v29  ;;  %4712 = vmatprep.subr.bf16.mxu1 %v8692_v23  ;;  %v8701_v32 = vld [vmem:[#allocation36_spill] sm:$0xff]  ;;  %v8702_v29 = vld [vmem:[#allocation33_spill] sm:$0xff] }
 0x552   :  { %v8703_v23 = vld [vmem:[#allocation29_spill] sm:$0xff] }
 0x554   :  { %4650 = vmatpush1.bf16.msra.mxu0 %v8693_v43  ;;  %4714 = vmatpush1.bf16.msra.mxu1 %v8694_v15  ;;  %v8704_v43 = vld [vmem:[#allocation38_spill] sm:$0xff] }
 0x555   :  { %4652 = vmatprep.subr.bf16.mxu0 %v8695_v17  ;;  %4716 = vmatprep.subr.bf16.mxu1 %v8696_v14  ;;  %v8705_v15 = vld [vmem:[#allocation42_spill] sm:$0xff]  ;;  %v8706_v17 = vld [vmem:[#allocation35_spill] sm:$0xff] }
 0x556   :  { %v8707_v14 = vld [vmem:[#allocation31_spill] sm:$0xff] }
 0x558   :  { %4654 = vmatpush1.bf16.msra.mxu0 %v8697_v7  ;;  %4718 = vmatpush1.bf16.msra.mxu1 %v8698_v9  ;;  %v8708_v7 = vld [vmem:[#allocation40_spill] sm:$0xff] }
 0x559   :  { %4656 = vmatprep.subr.bf16.mxu0 %v8699_v54  ;;  %4720 = vmatprep.subr.bf16.mxu1 %v8700_v11  ;;  %v8709_v9 = vld [vmem:[#allocation44_spill] sm:$0xff]  ;;  %v8710_v54 = vld [vmem:[#allocation41_spill] sm:$0xff] }
 0x55a   :  { %v8711_v11 = vld [vmem:[#allocation37_spill] sm:$0xff] }
 0x55c   :  { %4658 = vmatpush1.bf16.msra.mxu0 %v8701_v32  ;;  %4722 = vmatpush1.bf16.msra.mxu1 %v8702_v29  ;;  %v8712_v32 = vld [vmem:[#allocation46_spill] sm:$0xff] }
 0x55d   :  { %4660 = vmatprep.subr.bf16.mxu0 %v8703_v23  ;;  %4724 = vmatprep.subr.bf16.mxu1 %v8704_v43  ;;  %v8713_v29 = vld [vmem:[#allocation50_spill] sm:$0xff]  ;;  %v8714_v23 = vld [vmem:[#allocation43_spill] sm:$0xff] }
 0x55e   :  { %v8715_v43 = vld [vmem:[#allocation39_spill] sm:$0xff] }
 0x560   :  { %4662 = vmatpush1.bf16.msra.mxu0 %v8705_v15  ;;  %4726 = vmatpush1.bf16.msra.mxu1 %v8706_v17  ;;  %v8716_v15 = vld [vmem:[#allocation48_spill] sm:$0xff] }
 0x561   :  { %4664 = vmatprep.subr.bf16.mxu0 %v8707_v14  ;;  %4728 = vmatprep.subr.bf16.mxu1 %v8708_v7  ;;  %v8717_v17 = vld [vmem:[#allocation52_spill] sm:$0xff]  ;;  %v8718_v14 = vld [vmem:[#allocation49_spill] sm:$0xff] }
 0x562   :  { %v8719_v7 = vld [vmem:[#allocation45_spill] sm:$0xff] }
 0x564   :  { %4666 = vmatpush1.bf16.msra.mxu0 %v8709_v9  ;;  %4730 = vmatpush1.bf16.msra.mxu1 %v8710_v54  ;;  %v8720_v9 = vld [vmem:[#allocation54_spill] sm:$0xff] }
 0x565   :  { %4668 = vmatprep.subr.bf16.mxu0 %v8711_v11  ;;  %4732 = vmatprep.subr.bf16.mxu1 %v8712_v32 }
 0x568   :  { %4670 = vmatpush1.bf16.msra.mxu0 %v8713_v29  ;;  %4734 = vmatpush1.bf16.msra.mxu1 %v8714_v23 }
 0x569   :  { %4672 = vmatprep.subr.bf16.mxu0 %v8715_v43  ;;  %4736 = vmatprep.subr.bf16.mxu1 %v8716_v15  ;;  %v8722_v15 = vld [vmem:[#allocation94_spill] sm:$0xff] }
 0x56c   :  { %4674 = vmatpush1.bf16.msra.mxu0 %v8717_v17  ;;  %4738 = vmatpush1.bf16.msra.mxu1 %v8718_v14 }
 0x56d   :  { %4740 = vmatprep.subr.bf16.mxu0 %v8719_v7  ;;  %4772 = vmatprep.subr.bf16.mxu1 %v8720_v9 }
 0x5e2   :  { %v2200_v54 = vpop.f32.mrb[22].mxu0  ;;  %v2271_v11 = vpop.f32.mrb[22].mxu1 }
 0x5e3   :  { %v2201_v32 = vadd.f32 %v2200_v54, %v8721_v8  ;;  %v2202_v38 = vpop.f32.mrb[23].mxu0  ;;  %v2273_v29 = vpop.f32.mrb[23].mxu1  ;;  %v2272_v17 = vadd.f32 %v2271_v11, %v8722_v15 }
 0x5e4   :  { %v2203_v23 = vadd.f32 %v2202_v38, %v8600_v20  ;;  %v2274_v14 = vadd.f32 %v2273_v29, %v8723_v26 }
 0x5e5   :  { %v3741_v13 = vmul.f32 -1.442695, %v2201_v32  ;;  %v3743_v10 = vmul.f32 -1.442695, %v2272_v17 }
 0x5e6   :  { %v3742_v43 = vmul.f32 -1.442695, %v2203_v23 }
 0x5e7   :  { %5492 = vpow2.f32 %v3741_v13 }
 0x5e8   :  { %5494 = vpow2.f32 %v3742_v43 }
 0x5e9   :  { %5496 = vtanh.f32 %v2274_v14 }
 0x5ea   :  { %5498 = vpow2.f32 %v3743_v10 }
 0x5f1   :  { %v5493_v7 = vpop.eup %5492 }
 0x5f2   :  { %v2285_v60 = vadd.f32 1.0, %v5493_v7  ;;  %v5495_v9 = vpop.eup %5494 }
 0x5f3   :  { %v2286_v54 = vadd.f32 1.0, %v5495_v9  ;;  %v5497_v8 = vpop.eup %5496 }
 0x5f4   :  { %5500 = vrcp.f32 %v2285_v60  ;;  %v5499_v3 = vpop.eup %5498 }
 0x5f5   :  { %5502 = vrcp.f32 %v2286_v54  ;;  %v2287_v13 = vadd.f32 1.0, %v5499_v3 }
 0x5f7   :  { %5504 = vrcp.f32 %v2287_v13 }
 0x5fe   :  { %v5501_v38 = vpop.eup %5500 }
 0x5ff   :  { %v2296_v32 = vmul.f32 %v5501_v38, %v5497_v8  ;;  %v5503_v23 = vpop.eup %5502 }
 0x600   :  { %v2295_v43 = vmul.f32 %v5503_v23, %v7577_v45 }
 0x601   :  { %v5505_v45 = vpop.eup %5504 }
 0x602   :  { %v2370_v11 = vpop.f32.mrb[8].mxu0  ;;  %v2441_v15 = vpop.f32.mrb[8].mxu1  ;;  %v7694_v29 = vadd.f32 %v2296_v32, %v2295_v43 }
 0x603   :  { %v5323_v17 = vadd.f32 %v2370_v11, %v8663_v61  ;;  %v2372_v14 = vpop.f32.mrb[9].mxu0  ;;  %v2443_v7 = vpop.f32.mrb[9].mxu1  ;;  %v5339_v3 = vadd.f32 %v2441_v15, %v8603_v12 }
 0x604   :  { %v5324_v60 = vadd.f32 %v2372_v14, %v8543_v33  ;;  %5506 = vtanh.f32 %v7694_v29  ;;  %v5340_v8 = vadd.f32 %v2443_v7, %v8604_v21 }
 0x605   :  { %v3744_v10 = vmul.f32 -1.442695, %v5323_v17  ;;  %v3746_v38 = vmul.f32 -1.442695, %v5339_v3 }
 0x606   :  { %v3745_v9 = vmul.f32 -1.442695, %v5324_v60 }
 0x607   :  { %5508 = vpow2.f32 %v3744_v10 }
 0x608   :  { %5510 = vpow2.f32 %v3745_v9 }
 0x609   :  { %5512 = vtanh.f32 %v5340_v8 }
 0x60a   :  { %5514 = vpow2.f32 %v3746_v38  ;;  %v8725_v38 = vld [vmem:[#allocation103_spill] sm:$0xff] }
 0x60e   :  { %v5507_v54 = vpop.eup %5506 }
 0x60f   :  { %v2299_v32 = vmul.f32 %v5507_v54, %v5505_v45 }
 0x611   :  { %v5509_v23 = vpop.eup %5508  ;;  %2538 = vmatprep.mubr.f32.mxu0 %v2299_v32  ;;  %3663 = vst [vmem:[%s8080_s6 + $0x18] sm:$0xff] %v2299_v32  ;;  %2609 = vmatprep.mubr.f32.mxu1 %v2299_v32  ;;  %v8726_v32 = vld [vmem:[#allocation104_spill] sm:$0xff] }
 0x612   :  { %v2459_v43 = vadd.f32 1.0, %v5509_v23  ;;  %v5511_v13 = vpop.eup %5510  ;;  %v8727_v23 = vld [vmem:[#allocation106_spill] sm:$0xff] }
 0x613   :  { %v2460_v11 = vadd.f32 1.0, %v5511_v13  ;;  %v5513_v15 = vpop.eup %5512  ;;  %v8729_v13 = vld [vmem:[#allocation107_spill] sm:$0xff] }
 0x614   :  { %5516 = vrcp.f32 %v2459_v43  ;;  %v5515_v17 = vpop.eup %5514  ;;  %v8728_v43 = vld [vmem:[#allocation105_spill] sm:$0xff] }
 0x615   :  { %5518 = vrcp.f32 %v2460_v11  ;;  %v2461_v10 = vadd.f32 1.0, %v5515_v17  ;;  %v8730_v11 = vld [vmem:[#allocation108_spill] sm:$0xff]  ;;  %v8732_v17 = vld [vmem:[#allocation109_spill] sm:$0xff] }
 0x617   :  { %5520 = vrcp.f32 %v2461_v10  ;;  %v8736_v10 = vld [vmem:[#allocation113_spill] sm:$0xff] }
 0x61e   :  { %v5517_v14 = vpop.eup %5516 }
 0x61f   :  { %v2470_v7 = vmul.f32 %v5517_v14, %v5513_v15  ;;  %v5519_v60 = vpop.eup %5518  ;;  %v8731_v15 = vld [vmem:[#allocation110_spill] sm:$0xff]  ;;  %v8733_v14 = vld [vmem:[#allocation111_spill] sm:$0xff] }
 0x620   :  { %v2469_v9 = vmul.f32 %v5519_v60, %v7588_v6  ;;  %v8724_v6 = vld [vmem:[#allocation102_spill] sm:$0xff] }
 0x621   :  { %v5521_v45 = vpop.eup %5520  ;;  %v8735_v60 = vld [vmem:[#allocation114_spill] sm:$0xff] }
 0x622   :  { %v7705_v3 = vadd.f32 %v2470_v7, %v2469_v9  ;;  %v8734_v7 = vld [vmem:[#allocation112_spill] sm:$0xff]  ;;  %v8737_v9 = vld [vmem:[#allocation9_spill] sm:$0xff] }
 0x624   :  { %5522 = vtanh.f32 %v7705_v3 }
 0x62e   :  { %v5523_v8 = vpop.eup %5522 }
 0x62f   :  { %v2473_v54 = vmul.f32 %v5523_v8, %v5521_v45  ;;  %v8738_v45 = vld [vmem:[#allocation12_spill] sm:$0xff]  ;;  %v8739_v8 = vld [vmem:[#allocation10_spill] sm:$0xff] }
 0x631   :  { %2539 = vmatmul.mubr.f32.vlgmr.msra.gmra.mrb[24].mxu0 %v2473_v54  ;;  %2610 = vmatmul.mubr.f32.vlgmr.msra.gmra.mrb[24].mxu1 %v2473_v54 }
 0x632   :  { %4742 = vmatpush1.bf16.msra.mxu0 %v8547_v49  ;;  %4774 = vmatpush1.bf16.msra.mxu1 %v7036_v18 }
 0x633   :  { %4744 = vmatprep.subr.bf16.mxu0 %v8548_v48  ;;  %4776 = vmatprep.subr.bf16.mxu1 %v8549_v39 }
 0x634   :  { %2708 = vmatprep.mubr.f32.mxu0 %v8605_v40  ;;  %2779 = vmatprep.mubr.f32.mxu1 %v8605_v40 }
 0x636   :  { %4746 = vmatpush1.bf16.msra.mxu0 %v8606_v24  ;;  %4778 = vmatpush1.bf16.msra.mxu1 %v8607_v35 }
 0x637   :  { %4748 = vmatprep.subr.bf16.mxu0 %v8553_v50  ;;  %4780 = vmatprep.subr.bf16.mxu1 %v8608_v46 }
 0x63a   :  { %4750 = vmatpush1.bf16.msra.mxu0 %v8555_v51  ;;  %4782 = vmatpush1.bf16.msra.mxu1 %v8609_v16 }
 0x63b   :  { %4752 = vmatprep.subr.bf16.mxu0 %v8557_v22  ;;  %4784 = vmatprep.subr.bf16.mxu1 %v8610_v63 }
 0x63e   :  { %4754 = vmatpush1.bf16.msra.mxu0 %v8559_v44  ;;  %4786 = vmatpush1.bf16.msra.mxu1 %v8560_v25 }
 0x63f   :  { %4756 = vmatprep.subr.bf16.mxu0 %v8561_v28  ;;  %4788 = vmatprep.subr.bf16.mxu1 %v8562_v30 }
 0x642   :  { %4758 = vmatpush1.bf16.msra.mxu0 %v8563_v34  ;;  %4790 = vmatpush1.bf16.msra.mxu1 %v7184_v58 }
 0x643   :  { %4760 = vmatprep.subr.bf16.mxu0 %v8564_v55  ;;  %4792 = vmatprep.subr.bf16.mxu1 %v7187_v59 }
 0x646   :  { %4762 = vmatpush1.bf16.msra.mxu0 %v8565_v36  ;;  %4794 = vmatpush1.bf16.msra.mxu1 %v7220_v27 }
 0x647   :  { %4764 = vmatprep.subr.bf16.mxu0 %v8566_v41  ;;  %4796 = vmatprep.subr.bf16.mxu1 %v7223_v19 }
 0x64a   :  { %4766 = vmatpush1.bf16.msra.mxu0 %v7232_v62  ;;  %4798 = vmatpush1.bf16.msra.mxu1 %v7250_v56 }
 0x64b   :  { %4768 = vmatprep.subr.bf16.mxu0 %v7241_v31  ;;  %4800 = vmatprep.subr.bf16.mxu1 %v7253_v52 }
 0x64e   :  { %4770 = vmatpush1.bf16.msra.mxu0 %v7262_v53  ;;  %4802 = vmatpush1.bf16.msra.mxu1 %v7266_v37 }
 0x64f   :  { %4804 = vmatprep.subr.bf16.mxu0 %v6659_v42  ;;  %4868 = vmatprep.subr.bf16.mxu1 %v6674_v1 }
 0x651   :  { %2709 = vmatmul.mubr.f32.vlgmr.msra.gmra.mrb[10].mxu0 %v2473_v54  ;;  %2780 = vmatmul.mubr.f32.vlgmr.msra.gmra.mrb[10].mxu1 %v2473_v54  ;;  %v8740_v54 = vld [vmem:[#allocation7_spill] sm:$0xff] }
 0x652   :  { %4806 = vmatpush1.bf16.msra.mxu0 %v6663_v47  ;;  %4870 = vmatpush1.bf16.msra.mxu1 %v6678_v0 }
 0x653   :  { %4808 = vmatprep.subr.bf16.mxu0 %v6667_v57  ;;  %4872 = vmatprep.subr.bf16.mxu1 %v6687_v5 }
 0x656   :  { %4810 = vmatpush1.bf16.msra.mxu0 %v6683_v4  ;;  %4874 = vmatpush1.bf16.msra.mxu1 %v6698_v2 }
 0x657   :  { %4812 = vmatprep.subr.bf16.mxu0 %v8724_v6  ;;  %4876 = vmatprep.subr.bf16.mxu1 %v8725_v38 }
 0x65a   :  { %4814 = vmatpush1.bf16.msra.mxu0 %v8726_v32  ;;  %4878 = vmatpush1.bf16.msra.mxu1 %v8727_v23 }
 0x65b   :  { %4816 = vmatprep.subr.bf16.mxu0 %v8728_v43  ;;  %4880 = vmatprep.subr.bf16.mxu1 %v8729_v13  ;;  %v8782_v13 = vld [vmem:[#allocation93_spill] sm:$0xff] }
 0x65e   :  { %4818 = vmatpush1.bf16.msra.mxu0 %v8730_v11  ;;  %4882 = vmatpush1.bf16.msra.mxu1 %v8731_v15  ;;  %v8741_v11 = vld [vmem:[#allocation14_spill] sm:$0xff] }
 0x65f   :  { %4820 = vmatprep.subr.bf16.mxu0 %v8732_v17  ;;  %4884 = vmatprep.subr.bf16.mxu1 %v8733_v14  ;;  %v8742_v15 = vld [vmem:[#allocation18_spill] sm:$0xff]  ;;  %v8743_v17 = vld [vmem:[#allocation11_spill] sm:$0xff]  ;;  %v8744_v14 = vld [vmem:[#allocation8_spill] sm:$0xff] }
 0x662   :  { %4822 = vmatpush1.bf16.msra.mxu0 %v8734_v7  ;;  %4886 = vmatpush1.bf16.msra.mxu1 %v8735_v60  ;;  %v8745_v7 = vld [vmem:[#allocation16_spill] sm:$0xff] }
 0x663   :  { %4824 = vmatprep.subr.bf16.mxu0 %v8736_v10  ;;  %4888 = vmatprep.subr.bf16.mxu1 %v8737_v9  ;;  %v8746_v60 = vld [vmem:[#allocation20_spill] sm:$0xff]  ;;  %v8747_v10 = vld [vmem:[#allocation17_spill] sm:$0xff] }
 0x664   :  { %v8748_v9 = vld [vmem:[#allocation13_spill] sm:$0xff] }
 0x666   :  { %4826 = vmatpush1.bf16.msra.mxu0 %v8738_v45  ;;  %4890 = vmatpush1.bf16.msra.mxu1 %v8739_v8  ;;  %v8749_v45 = vld [vmem:[#allocation22_spill] sm:$0xff] }
 0x667   :  { %4828 = vmatprep.subr.bf16.mxu0 %v8740_v54  ;;  %4892 = vmatprep.subr.bf16.mxu1 %v8741_v11  ;;  %v8750_v8 = vld [vmem:[#allocation26_spill] sm:$0xff]  ;;  %v8751_v54 = vld [vmem:[#allocation19_spill] sm:$0xff] }
 0x668   :  { %v8752_v11 = vld [vmem:[#allocation15_spill] sm:$0xff] }
 0x66a   :  { %4830 = vmatpush1.bf16.msra.mxu0 %v8742_v15  ;;  %4894 = vmatpush1.bf16.msra.mxu1 %v8743_v17  ;;  %v8753_v15 = vld [vmem:[#allocation24_spill] sm:$0xff] }
 0x66b   :  { %4832 = vmatprep.subr.bf16.mxu0 %v8744_v14  ;;  %4896 = vmatprep.subr.bf16.mxu1 %v8745_v7  ;;  %v8754_v17 = vld [vmem:[#allocation28_spill] sm:$0xff]  ;;  %v8755_v14 = vld [vmem:[#allocation25_spill] sm:$0xff] }
 0x66c   :  { %v8756_v7 = vld [vmem:[#allocation21_spill] sm:$0xff] }
 0x66e   :  { %4834 = vmatpush1.bf16.msra.mxu0 %v8746_v60  ;;  %4898 = vmatpush1.bf16.msra.mxu1 %v8747_v10  ;;  %v8757_v60 = vld [vmem:[#allocation30_spill] sm:$0xff] }
 0x66f   :  { %4836 = vmatprep.subr.bf16.mxu0 %v8748_v9  ;;  %4900 = vmatprep.subr.bf16.mxu1 %v8749_v45  ;;  %v8758_v10 = vld [vmem:[#allocation34_spill] sm:$0xff]  ;;  %v8759_v9 = vld [vmem:[#allocation27_spill] sm:$0xff] }
 0x670   :  { %v8760_v45 = vld [vmem:[#allocation23_spill] sm:$0xff] }
 0x672   :  { %4838 = vmatpush1.bf16.msra.mxu0 %v8750_v8  ;;  %4902 = vmatpush1.bf16.msra.mxu1 %v8751_v54  ;;  %v8761_v8 = vld [vmem:[#allocation32_spill] sm:$0xff] }
 0x673   :  { %4840 = vmatprep.subr.bf16.mxu0 %v8752_v11  ;;  %4904 = vmatprep.subr.bf16.mxu1 %v8753_v15  ;;  %v8762_v54 = vld [vmem:[#allocation36_spill] sm:$0xff]  ;;  %v8763_v11 = vld [vmem:[#allocation33_spill] sm:$0xff] }
 0x674   :  { %v8764_v15 = vld [vmem:[#allocation29_spill] sm:$0xff] }
 0x676   :  { %4842 = vmatpush1.bf16.msra.mxu0 %v8754_v17  ;;  %4906 = vmatpush1.bf16.msra.mxu1 %v8755_v14  ;;  %v8765_v17 = vld [vmem:[#allocation38_spill] sm:$0xff] }
 0x677   :  { %4844 = vmatprep.subr.bf16.mxu0 %v8756_v7  ;;  %4908 = vmatprep.subr.bf16.mxu1 %v8757_v60  ;;  %v8766_v14 = vld [vmem:[#allocation42_spill] sm:$0xff]  ;;  %v8767_v7 = vld [vmem:[#allocation35_spill] sm:$0xff] }
 0x678   :  { %v8768_v60 = vld [vmem:[#allocation31_spill] sm:$0xff] }
 0x67a   :  { %4846 = vmatpush1.bf16.msra.mxu0 %v8758_v10  ;;  %4910 = vmatpush1.bf16.msra.mxu1 %v8759_v9  ;;  %v8769_v10 = vld [vmem:[#allocation40_spill] sm:$0xff] }
 0x67b   :  { %4848 = vmatprep.subr.bf16.mxu0 %v8760_v45  ;;  %4912 = vmatprep.subr.bf16.mxu1 %v8761_v8  ;;  %v8770_v9 = vld [vmem:[#allocation44_spill] sm:$0xff]  ;;  %v8771_v45 = vld [vmem:[#allocation41_spill] sm:$0xff] }
 0x67c   :  { %v8772_v8 = vld [vmem:[#allocation37_spill] sm:$0xff] }
 0x67e   :  { %4850 = vmatpush1.bf16.msra.mxu0 %v8762_v54  ;;  %4914 = vmatpush1.bf16.msra.mxu1 %v8763_v11  ;;  %v8773_v54 = vld [vmem:[#allocation46_spill] sm:$0xff] }
 0x67f   :  { %4852 = vmatprep.subr.bf16.mxu0 %v8764_v15  ;;  %4916 = vmatprep.subr.bf16.mxu1 %v8765_v17  ;;  %v8774_v11 = vld [vmem:[#allocation50_spill] sm:$0xff]  ;;  %v8775_v15 = vld [vmem:[#allocation43_spill] sm:$0xff] }
 0x680   :  { %v8776_v17 = vld [vmem:[#allocation39_spill] sm:$0xff] }
 0x682   :  { %4854 = vmatpush1.bf16.msra.mxu0 %v8766_v14  ;;  %4918 = vmatpush1.bf16.msra.mxu1 %v8767_v7  ;;  %v8777_v14 = vld [vmem:[#allocation48_spill] sm:$0xff] }
 0x683   :  { %4856 = vmatprep.subr.bf16.mxu0 %v8768_v60  ;;  %4920 = vmatprep.subr.bf16.mxu1 %v8769_v10  ;;  %v8778_v7 = vld [vmem:[#allocation52_spill] sm:$0xff]  ;;  %v8779_v60 = vld [vmem:[#allocation49_spill] sm:$0xff] }
 0x684   :  { %v8780_v10 = vld [vmem:[#allocation45_spill] sm:$0xff] }
 0x686   :  { %4858 = vmatpush1.bf16.msra.mxu0 %v8770_v9  ;;  %4922 = vmatpush1.bf16.msra.mxu1 %v8771_v45  ;;  %v8781_v9 = vld [vmem:[#allocation54_spill] sm:$0xff] }
 0x687   :  { %4860 = vmatprep.subr.bf16.mxu0 %v8772_v8  ;;  %4924 = vmatprep.subr.bf16.mxu1 %v8773_v54 }
 0x68a   :  { %4862 = vmatpush1.bf16.msra.mxu0 %v8774_v11  ;;  %4926 = vmatpush1.bf16.msra.mxu1 %v8775_v15 }
 0x68b   :  { %4864 = vmatprep.subr.bf16.mxu0 %v8776_v17  ;;  %4928 = vmatprep.subr.bf16.mxu1 %v8777_v14  ;;  %v8783_v14 = vld [vmem:[#allocation94_spill] sm:$0xff] }
 0x68e   :  { %4866 = vmatpush1.bf16.msra.mxu0 %v8778_v7  ;;  %4930 = vmatpush1.bf16.msra.mxu1 %v8779_v60 }
 0x68f   :  { %4932 = vmatprep.subr.bf16.mxu0 %v8780_v10  ;;  %4964 = vmatprep.subr.bf16.mxu1 %v8781_v9 }
 0x704   :  { %v2540_v45 = vpop.f32.mrb[24].mxu0  ;;  %v2611_v8 = vpop.f32.mrb[24].mxu1 }
 0x705   :  { %v2541_v54 = vadd.f32 %v2540_v45, %v8782_v13  ;;  %v2542_v43 = vpop.f32.mrb[25].mxu0  ;;  %v2613_v11 = vpop.f32.mrb[25].mxu1  ;;  %v2612_v7 = vadd.f32 %v2611_v8, %v8783_v14 }
 0x706   :  { %v2543_v15 = vadd.f32 %v2542_v43, %v8600_v20  ;;  %v2614_v60 = vadd.f32 %v2613_v11, %v8723_v26 }
 0x707   :  { %v3747_v23 = vmul.f32 -1.442695, %v2541_v54  ;;  %v3749_v32 = vmul.f32 -1.442695, %v2612_v7 }
 0x708   :  { %v3748_v17 = vmul.f32 -1.442695, %v2543_v15 }
 0x709   :  { %5524 = vpow2.f32 %v3747_v23 }
 0x70a   :  { %5526 = vpow2.f32 %v3748_v17 }
 0x70b   :  { %5528 = vtanh.f32 %v2614_v60 }
 0x70c   :  { %5530 = vpow2.f32 %v3749_v32 }
 0x713   :  { %v5525_v10 = vpop.eup %5524 }
 0x714   :  { %v2625_v38 = vadd.f32 1.0, %v5525_v10  ;;  %v5527_v9 = vpop.eup %5526 }
 0x715   :  { %v2626_v45 = vadd.f32 1.0, %v5527_v9  ;;  %v5529_v13 = vpop.eup %5528 }
 0x716   :  { %5532 = vrcp.f32 %v2625_v38  ;;  %v5531_v6 = vpop.eup %5530 }
 0x717   :  { %5534 = vrcp.f32 %v2626_v45  ;;  %v2627_v23 = vadd.f32 1.0, %v5531_v6 }
 0x719   :  { %5536 = vrcp.f32 %v2627_v23 }
 0x720   :  { %v5533_v43 = vpop.eup %5532 }
 0x721   :  { %v2636_v54 = vmul.f32 %v5533_v43, %v5529_v13  ;;  %v5535_v15 = vpop.eup %5534 }
 0x722   :  { %v2635_v17 = vmul.f32 %v5535_v15, %v7694_v29 }
 0x723   :  { %v5537_v29 = vpop.eup %5536 }
 0x724   :  { %v2710_v8 = vpop.f32.mrb[10].mxu0  ;;  %v2781_v14 = vpop.f32.mrb[10].mxu1  ;;  %v7811_v11 = vadd.f32 %v2636_v54, %v2635_v17 }
 0x725   :  { %v5325_v7 = vadd.f32 %v2710_v8, %v8663_v61  ;;  %v2712_v60 = vpop.f32.mrb[11].mxu0  ;;  %v2783_v10 = vpop.f32.mrb[11].mxu1  ;;  %v5341_v6 = vadd.f32 %v2781_v14, %v8603_v12 }
 0x726   :  { %v5326_v38 = vadd.f32 %v2712_v60, %v8543_v33  ;;  %5538 = vtanh.f32 %v7811_v11  ;;  %v5342_v13 = vadd.f32 %v2783_v10, %v8604_v21 }
 0x727   :  { %v3750_v32 = vmul.f32 -1.442695, %v5325_v7  ;;  %v3752_v43 = vmul.f32 -1.442695, %v5341_v6 }
 0x728   :  { %v3751_v9 = vmul.f32 -1.442695, %v5326_v38 }
 0x729   :  { %5540 = vpow2.f32 %v3750_v32 }
 0x72a   :  { %5542 = vpow2.f32 %v3751_v9 }
 0x72b   :  { %5544 = vtanh.f32 %v5342_v13 }
 0x72c   :  { %5546 = vpow2.f32 %v3752_v43  ;;  %v8785_v43 = vld [vmem:[#allocation103_spill] sm:$0xff] }
 0x730   :  { %v5539_v45 = vpop.eup %5538 }
 0x731   :  { %v2639_v54 = vmul.f32 %v5539_v45, %v5537_v29 }
 0x733   :  { %v5541_v15 = vpop.eup %5540  ;;  %2878 = vmatprep.mubr.f32.mxu0 %v2639_v54  ;;  %3664 = vst [vmem:[%s8080_s6 + $0x20] sm:$0xff] %v2639_v54  ;;  %2949 = vmatprep.mubr.f32.mxu1 %v2639_v54  ;;  %v8786_v54 = vld [vmem:[#allocation104_spill] sm:$0xff] }
 0x734   :  { %v2799_v17 = vadd.f32 1.0, %v5541_v15  ;;  %v5543_v23 = vpop.eup %5542  ;;  %v8787_v15 = vld [vmem:[#allocation106_spill] sm:$0xff] }
 0x735   :  { %v2800_v8 = vadd.f32 1.0, %v5543_v23  ;;  %v5545_v14 = vpop.eup %5544  ;;  %v8789_v23 = vld [vmem:[#allocation107_spill] sm:$0xff] }
 0x736   :  { %5548 = vrcp.f32 %v2799_v17  ;;  %v5547_v7 = vpop.eup %5546  ;;  %v8788_v17 = vld [vmem:[#allocation105_spill] sm:$0xff] }
 0x737   :  { %5550 = vrcp.f32 %v2800_v8  ;;  %v2801_v32 = vadd.f32 1.0, %v5547_v7  ;;  %v8790_v8 = vld [vmem:[#allocation108_spill] sm:$0xff]  ;;  %v8792_v7 = vld [vmem:[#allocation109_spill] sm:$0xff] }
 0x739   :  { %5552 = vrcp.f32 %v2801_v32  ;;  %v8796_v32 = vld [vmem:[#allocation113_spill] sm:$0xff] }
 0x740   :  { %v5549_v60 = vpop.eup %5548 }
 0x741   :  { %v2810_v10 = vmul.f32 %v5549_v60, %v5545_v14  ;;  %v5551_v38 = vpop.eup %5550  ;;  %v8791_v14 = vld [vmem:[#allocation110_spill] sm:$0xff]  ;;  %v8793_v60 = vld [vmem:[#allocation111_spill] sm:$0xff] }
 0x742   :  { %v2809_v9 = vmul.f32 %v5551_v38, %v7705_v3  ;;  %v8784_v3 = vld [vmem:[#allocation102_spill] sm:$0xff] }
 0x743   :  { %v5553_v29 = vpop.eup %5552  ;;  %v8795_v38 = vld [vmem:[#allocation114_spill] sm:$0xff] }
 0x744   :  { %v7822_v6 = vadd.f32 %v2810_v10, %v2809_v9  ;;  %v8794_v10 = vld [vmem:[#allocation112_spill] sm:$0xff]  ;;  %v8797_v9 = vld [vmem:[#allocation9_spill] sm:$0xff] }
 0x746   :  { %5554 = vtanh.f32 %v7822_v6 }
 0x750   :  { %v5555_v13 = vpop.eup %5554 }
 0x751   :  { %v2813_v45 = vmul.f32 %v5555_v13, %v5553_v29  ;;  %v8798_v29 = vld [vmem:[#allocation12_spill] sm:$0xff]  ;;  %v8799_v13 = vld [vmem:[#allocation10_spill] sm:$0xff] }
 0x753   :  { %2879 = vmatmul.mubr.f32.vlgmr.msra.gmra.mrb[26].mxu0 %v2813_v45  ;;  %2950 = vmatmul.mubr.f32.vlgmr.msra.gmra.mrb[26].mxu1 %v2813_v45 }
 0x754   :  { %4934 = vmatpush1.bf16.msra.mxu0 %v8547_v49  ;;  %4966 = vmatpush1.bf16.msra.mxu1 %v7036_v18 }
 0x755   :  { %4936 = vmatprep.subr.bf16.mxu0 %v8548_v48  ;;  %4968 = vmatprep.subr.bf16.mxu1 %v8549_v39 }
 0x756   :  { %3048 = vmatprep.mubr.f32.mxu0 %v8605_v40  ;;  %3119 = vmatprep.mubr.f32.mxu1 %v8605_v40 }
 0x758   :  { %4938 = vmatpush1.bf16.msra.mxu0 %v8606_v24  ;;  %4970 = vmatpush1.bf16.msra.mxu1 %v8607_v35 }
 0x759   :  { %4940 = vmatprep.subr.bf16.mxu0 %v8553_v50  ;;  %4972 = vmatprep.subr.bf16.mxu1 %v8608_v46 }
 0x75c   :  { %4942 = vmatpush1.bf16.msra.mxu0 %v8555_v51  ;;  %4974 = vmatpush1.bf16.msra.mxu1 %v8609_v16 }
 0x75d   :  { %4944 = vmatprep.subr.bf16.mxu0 %v8557_v22  ;;  %4976 = vmatprep.subr.bf16.mxu1 %v8610_v63 }
 0x760   :  { %4946 = vmatpush1.bf16.msra.mxu0 %v8559_v44  ;;  %4978 = vmatpush1.bf16.msra.mxu1 %v8560_v25 }
 0x761   :  { %4948 = vmatprep.subr.bf16.mxu0 %v8561_v28  ;;  %4980 = vmatprep.subr.bf16.mxu1 %v8562_v30 }
 0x764   :  { %4950 = vmatpush1.bf16.msra.mxu0 %v8563_v34  ;;  %4982 = vmatpush1.bf16.msra.mxu1 %v7184_v58 }
 0x765   :  { %4952 = vmatprep.subr.bf16.mxu0 %v8564_v55  ;;  %4984 = vmatprep.subr.bf16.mxu1 %v7187_v59 }
 0x768   :  { %4954 = vmatpush1.bf16.msra.mxu0 %v8565_v36  ;;  %4986 = vmatpush1.bf16.msra.mxu1 %v7220_v27 }
 0x769   :  { %4956 = vmatprep.subr.bf16.mxu0 %v8566_v41  ;;  %4988 = vmatprep.subr.bf16.mxu1 %v7223_v19 }
 0x76c   :  { %4958 = vmatpush1.bf16.msra.mxu0 %v7232_v62  ;;  %4990 = vmatpush1.bf16.msra.mxu1 %v7250_v56 }
 0x76d   :  { %4960 = vmatprep.subr.bf16.mxu0 %v7241_v31  ;;  %4992 = vmatprep.subr.bf16.mxu1 %v7253_v52 }
 0x770   :  { %4962 = vmatpush1.bf16.msra.mxu0 %v7262_v53  ;;  %4994 = vmatpush1.bf16.msra.mxu1 %v7266_v37 }
 0x771   :  { %4996 = vmatprep.subr.bf16.mxu0 %v6659_v42  ;;  %5060 = vmatprep.subr.bf16.mxu1 %v6674_v1 }
 0x773   :  { %3049 = vmatmul.mubr.f32.vlgmr.msra.gmra.mrb[12].mxu0 %v2813_v45  ;;  %3120 = vmatmul.mubr.f32.vlgmr.msra.gmra.mrb[12].mxu1 %v2813_v45  ;;  %v8800_v45 = vld [vmem:[#allocation7_spill] sm:$0xff] }
 0x774   :  { %4998 = vmatpush1.bf16.msra.mxu0 %v6663_v47  ;;  %5062 = vmatpush1.bf16.msra.mxu1 %v6678_v0 }
 0x775   :  { %5000 = vmatprep.subr.bf16.mxu0 %v6667_v57  ;;  %5064 = vmatprep.subr.bf16.mxu1 %v6687_v5 }
 0x778   :  { %5002 = vmatpush1.bf16.msra.mxu0 %v6683_v4  ;;  %5066 = vmatpush1.bf16.msra.mxu1 %v6698_v2 }
 0x779   :  { %5004 = vmatprep.subr.bf16.mxu0 %v8784_v3  ;;  %5068 = vmatprep.subr.bf16.mxu1 %v8785_v43 }
 0x77c   :  { %5006 = vmatpush1.bf16.msra.mxu0 %v8786_v54  ;;  %5070 = vmatpush1.bf16.msra.mxu1 %v8787_v15 }
 0x77d   :  { %5008 = vmatprep.subr.bf16.mxu0 %v8788_v17  ;;  %5072 = vmatprep.subr.bf16.mxu1 %v8789_v23  ;;  %v8842_v23 = vld [vmem:[#allocation93_spill] sm:$0xff] }
 0x780   :  { %5010 = vmatpush1.bf16.msra.mxu0 %v8790_v8  ;;  %5074 = vmatpush1.bf16.msra.mxu1 %v8791_v14  ;;  %v8801_v8 = vld [vmem:[#allocation14_spill] sm:$0xff] }
 0x781   :  { %5012 = vmatprep.subr.bf16.mxu0 %v8792_v7  ;;  %5076 = vmatprep.subr.bf16.mxu1 %v8793_v60  ;;  %v8802_v14 = vld [vmem:[#allocation18_spill] sm:$0xff]  ;;  %v8803_v7 = vld [vmem:[#allocation11_spill] sm:$0xff]  ;;  %v8804_v60 = vld [vmem:[#allocation8_spill] sm:$0xff] }
 0x784   :  { %5014 = vmatpush1.bf16.msra.mxu0 %v8794_v10  ;;  %5078 = vmatpush1.bf16.msra.mxu1 %v8795_v38  ;;  %v8805_v10 = vld [vmem:[#allocation16_spill] sm:$0xff] }
 0x785   :  { %5016 = vmatprep.subr.bf16.mxu0 %v8796_v32  ;;  %5080 = vmatprep.subr.bf16.mxu1 %v8797_v9  ;;  %v8806_v38 = vld [vmem:[#allocation20_spill] sm:$0xff]  ;;  %v8807_v32 = vld [vmem:[#allocation17_spill] sm:$0xff] }
 0x786   :  { %v8808_v9 = vld [vmem:[#allocation13_spill] sm:$0xff] }
 0x788   :  { %5018 = vmatpush1.bf16.msra.mxu0 %v8798_v29  ;;  %5082 = vmatpush1.bf16.msra.mxu1 %v8799_v13  ;;  %v8809_v29 = vld [vmem:[#allocation22_spill] sm:$0xff] }
 0x789   :  { %5020 = vmatprep.subr.bf16.mxu0 %v8800_v45  ;;  %5084 = vmatprep.subr.bf16.mxu1 %v8801_v8  ;;  %v8810_v13 = vld [vmem:[#allocation26_spill] sm:$0xff]  ;;  %v8811_v45 = vld [vmem:[#allocation19_spill] sm:$0xff] }
 0x78a   :  { %v8812_v8 = vld [vmem:[#allocation15_spill] sm:$0xff] }
 0x78c   :  { %5022 = vmatpush1.bf16.msra.mxu0 %v8802_v14  ;;  %5086 = vmatpush1.bf16.msra.mxu1 %v8803_v7  ;;  %v8813_v14 = vld [vmem:[#allocation24_spill] sm:$0xff] }
 0x78d   :  { %5024 = vmatprep.subr.bf16.mxu0 %v8804_v60  ;;  %5088 = vmatprep.subr.bf16.mxu1 %v8805_v10  ;;  %v8814_v7 = vld [vmem:[#allocation28_spill] sm:$0xff]  ;;  %v8815_v60 = vld [vmem:[#allocation25_spill] sm:$0xff] }
 0x78e   :  { %v8816_v10 = vld [vmem:[#allocation21_spill] sm:$0xff] }
 0x790   :  { %5026 = vmatpush1.bf16.msra.mxu0 %v8806_v38  ;;  %5090 = vmatpush1.bf16.msra.mxu1 %v8807_v32  ;;  %v8817_v38 = vld [vmem:[#allocation30_spill] sm:$0xff] }
 0x791   :  { %5028 = vmatprep.subr.bf16.mxu0 %v8808_v9  ;;  %5092 = vmatprep.subr.bf16.mxu1 %v8809_v29  ;;  %v8818_v32 = vld [vmem:[#allocation34_spill] sm:$0xff]  ;;  %v8819_v9 = vld [vmem:[#allocation27_spill] sm:$0xff] }
 0x792   :  { %v8820_v29 = vld [vmem:[#allocation23_spill] sm:$0xff] }
 0x794   :  { %5030 = vmatpush1.bf16.msra.mxu0 %v8810_v13  ;;  %5094 = vmatpush1.bf16.msra.mxu1 %v8811_v45  ;;  %v8821_v13 = vld [vmem:[#allocation32_spill] sm:$0xff] }
 0x795   :  { %5032 = vmatprep.subr.bf16.mxu0 %v8812_v8  ;;  %5096 = vmatprep.subr.bf16.mxu1 %v8813_v14  ;;  %v8822_v45 = vld [vmem:[#allocation36_spill] sm:$0xff]  ;;  %v8823_v8 = vld [vmem:[#allocation33_spill] sm:$0xff] }
 0x796   :  { %v8824_v14 = vld [vmem:[#allocation29_spill] sm:$0xff] }
 0x798   :  { %5034 = vmatpush1.bf16.msra.mxu0 %v8814_v7  ;;  %5098 = vmatpush1.bf16.msra.mxu1 %v8815_v60  ;;  %v8825_v7 = vld [vmem:[#allocation38_spill] sm:$0xff] }
 0x799   :  { %5036 = vmatprep.subr.bf16.mxu0 %v8816_v10  ;;  %5100 = vmatprep.subr.bf16.mxu1 %v8817_v38  ;;  %v8826_v60 = vld [vmem:[#allocation42_spill] sm:$0xff]  ;;  %v8827_v10 = vld [vmem:[#allocation35_spill] sm:$0xff] }
 0x79a   :  { %v8828_v38 = vld [vmem:[#allocation31_spill] sm:$0xff] }
 0x79c   :  { %5038 = vmatpush1.bf16.msra.mxu0 %v8818_v32  ;;  %5102 = vmatpush1.bf16.msra.mxu1 %v8819_v9  ;;  %v8829_v32 = vld [vmem:[#allocation40_spill] sm:$0xff] }
 0x79d   :  { %5040 = vmatprep.subr.bf16.mxu0 %v8820_v29  ;;  %5104 = vmatprep.subr.bf16.mxu1 %v8821_v13  ;;  %v8830_v9 = vld [vmem:[#allocation44_spill] sm:$0xff]  ;;  %v8831_v29 = vld [vmem:[#allocation41_spill] sm:$0xff] }
 0x79e   :  { %v8832_v13 = vld [vmem:[#allocation37_spill] sm:$0xff] }
 0x7a0   :  { %5042 = vmatpush1.bf16.msra.mxu0 %v8822_v45  ;;  %5106 = vmatpush1.bf16.msra.mxu1 %v8823_v8  ;;  %v8833_v45 = vld [vmem:[#allocation46_spill] sm:$0xff] }
 0x7a1   :  { %5044 = vmatprep.subr.bf16.mxu0 %v8824_v14  ;;  %5108 = vmatprep.subr.bf16.mxu1 %v8825_v7  ;;  %v8834_v8 = vld [vmem:[#allocation50_spill] sm:$0xff]  ;;  %v8835_v14 = vld [vmem:[#allocation43_spill] sm:$0xff] }
 0x7a2   :  { %v8836_v7 = vld [vmem:[#allocation39_spill] sm:$0xff] }
 0x7a4   :  { %5046 = vmatpush1.bf16.msra.mxu0 %v8826_v60  ;;  %5110 = vmatpush1.bf16.msra.mxu1 %v8827_v10  ;;  %v8837_v60 = vld [vmem:[#allocation48_spill] sm:$0xff] }
 0x7a5   :  { %5048 = vmatprep.subr.bf16.mxu0 %v8828_v38  ;;  %5112 = vmatprep.subr.bf16.mxu1 %v8829_v32  ;;  %v8838_v10 = vld [vmem:[#allocation52_spill] sm:$0xff]  ;;  %v8839_v38 = vld [vmem:[#allocation49_spill] sm:$0xff] }
 0x7a6   :  { %v8840_v32 = vld [vmem:[#allocation45_spill] sm:$0xff] }
 0x7a8   :  { %5050 = vmatpush1.bf16.msra.mxu0 %v8830_v9  ;;  %5114 = vmatpush1.bf16.msra.mxu1 %v8831_v29  ;;  %v8841_v9 = vld [vmem:[#allocation54_spill] sm:$0xff] }
 0x7a9   :  { %5052 = vmatprep.subr.bf16.mxu0 %v8832_v13  ;;  %5116 = vmatprep.subr.bf16.mxu1 %v8833_v45 }
 0x7ac   :  { %5054 = vmatpush1.bf16.msra.mxu0 %v8834_v8  ;;  %5118 = vmatpush1.bf16.msra.mxu1 %v8835_v14 }
 0x7ad   :  { %5056 = vmatprep.subr.bf16.mxu0 %v8836_v7  ;;  %5120 = vmatprep.subr.bf16.mxu1 %v8837_v60  ;;  %v8843_v60 = vld [vmem:[#allocation94_spill] sm:$0xff] }
 0x7b0   :  { %5058 = vmatpush1.bf16.msra.mxu0 %v8838_v10  ;;  %5122 = vmatpush1.bf16.msra.mxu1 %v8839_v38 }
 0x7b1   :  { %5124 = vmatprep.subr.bf16.mxu0 %v8840_v32  ;;  %5156 = vmatprep.subr.bf16.mxu1 %v8841_v9 }
 0x826   :  { %v2880_v29 = vpop.f32.mrb[26].mxu0  ;;  %v2951_v13 = vpop.f32.mrb[26].mxu1 }
 0x827   :  { %v2881_v45 = vadd.f32 %v2880_v29, %v8842_v23  ;;  %v2882_v17 = vpop.f32.mrb[27].mxu0  ;;  %v2953_v8 = vpop.f32.mrb[27].mxu1  ;;  %v2952_v10 = vadd.f32 %v2951_v13, %v8843_v60 }
 0x828   :  { %v2883_v14 = vadd.f32 %v2882_v17, %v8600_v20  ;;  %v2954_v38 = vadd.f32 %v2953_v8, %v8723_v26 }
 0x829   :  { %v3753_v15 = vmul.f32 -1.442695, %v2881_v45  ;;  %v3755_v54 = vmul.f32 -1.442695, %v2952_v10 }
 0x82a   :  { %v3754_v7 = vmul.f32 -1.442695, %v2883_v14 }
 0x82b   :  { %5556 = vpow2.f32 %v3753_v15 }
 0x82c   :  { %5558 = vpow2.f32 %v3754_v7 }
 0x82d   :  { %5560 = vtanh.f32 %v2954_v38 }
 0x82e   :  { %5562 = vpow2.f32 %v3755_v54 }
 0x835   :  { %v5557_v32 = vpop.eup %5556 }
 0x836   :  { %v2965_v43 = vadd.f32 1.0, %v5557_v32  ;;  %v5559_v9 = vpop.eup %5558 }
 0x837   :  { %v2966_v29 = vadd.f32 1.0, %v5559_v9  ;;  %v5561_v23 = vpop.eup %5560 }
 0x838   :  { %5564 = vrcp.f32 %v2965_v43  ;;  %v5563_v3 = vpop.eup %5562 }
 0x839   :  { %5566 = vrcp.f32 %v2966_v29  ;;  %v2967_v15 = vadd.f32 1.0, %v5563_v3 }
 0x83b   :  { %5568 = vrcp.f32 %v2967_v15 }
 0x842   :  { %v5565_v17 = vpop.eup %5564 }
 0x843   :  { %v2976_v45 = vmul.f32 %v5565_v17, %v5561_v23  ;;  %v5567_v14 = vpop.eup %5566 }
 0x844   :  { %v2975_v7 = vmul.f32 %v5567_v14, %v7811_v11 }
 0x845   :  { %v5569_v11 = vpop.eup %5568 }
 0x846   :  { %v3050_v13 = vpop.f32.mrb[12].mxu0  ;;  %v3121_v60 = vpop.f32.mrb[12].mxu1  ;;  %v7928_v8 = vadd.f32 %v2976_v45, %v2975_v7 }
 0x847   :  { %v5327_v10 = vadd.f32 %v3050_v13, %v8663_v61  ;;  %v3052_v38 = vpop.f32.mrb[13].mxu0  ;;  %v3123_v32 = vpop.f32.mrb[13].mxu1  ;;  %v5343_v3 = vadd.f32 %v3121_v60, %v8603_v12 }
 0x848   :  { %v5328_v43 = vadd.f32 %v3052_v38, %v8543_v33  ;;  %5570 = vtanh.f32 %v7928_v8  ;;  %v5344_v23 = vadd.f32 %v3123_v32, %v8604_v21 }
 0x849   :  { %v3756_v54 = vmul.f32 -1.442695, %v5327_v10  ;;  %v3758_v17 = vmul.f32 -1.442695, %v5343_v3 }
 0x84a   :  { %v3757_v9 = vmul.f32 -1.442695, %v5328_v43 }
 0x84b   :  { %5572 = vpow2.f32 %v3756_v54 }
 0x84c   :  { %5574 = vpow2.f32 %v3757_v9 }
 0x84d   :  { %5576 = vtanh.f32 %v5344_v23 }
 0x84e   :  { %5578 = vpow2.f32 %v3758_v17  ;;  %v8884_v17 = vld [vmem:[#allocation29_spill] sm:$0xff] }
 0x852   :  { %v5571_v29 = vpop.eup %5570 }
 0x853   :  { %v2979_v45 = vmul.f32 %v5571_v29, %v5569_v11 }
 0x855   :  { %v5573_v14 = vpop.eup %5572  ;;  %3218 = vmatprep.mubr.f32.mxu0 %v2979_v45  ;;  %3665 = vst [vmem:[%s8080_s6 + $0x28] sm:$0xff] %v2979_v45  ;;  %3289 = vmatprep.mubr.f32.mxu1 %v2979_v45  ;;  %v8885_v45 = vld [vmem:[#allocation38_spill] sm:$0xff] }
 0x856   :  { %v3139_v7 = vadd.f32 1.0, %v5573_v14  ;;  %v5575_v15 = vpop.eup %5574  ;;  %v8886_v14 = vld [vmem:[#allocation42_spill] sm:$0xff] }
 0x857   :  { %v3140_v13 = vadd.f32 1.0, %v5575_v15  ;;  %v5577_v60 = vpop.eup %5576  ;;  %v8888_v15 = vld [vmem:[#allocation31_spill] sm:$0xff] }
 0x858   :  { %5580 = vrcp.f32 %v3139_v7  ;;  %v5579_v10 = vpop.eup %5578  ;;  %v8887_v7 = vld [vmem:[#allocation35_spill] sm:$0xff] }
 0x859   :  { %5582 = vrcp.f32 %v3140_v13  ;;  %v3141_v54 = vadd.f32 1.0, %v5579_v10  ;;  %v8889_v13 = vld [vmem:[#allocation40_spill] sm:$0xff]  ;;  %v8891_v10 = vld [vmem:[#allocation41_spill] sm:$0xff] }
 0x85b   :  { %5584 = vrcp.f32 %v3141_v54  ;;  %v8895_v54 = vld [vmem:[#allocation43_spill] sm:$0xff] }
 0x862   :  { %v5581_v38 = vpop.eup %5580 }
 0x863   :  { %v3150_v32 = vmul.f32 %v5581_v38, %v5577_v60  ;;  %v5583_v43 = vpop.eup %5582  ;;  %v8890_v60 = vld [vmem:[#allocation44_spill] sm:$0xff]  ;;  %v8892_v38 = vld [vmem:[#allocation37_spill] sm:$0xff] }
 0x864   :  { %v3149_v9 = vmul.f32 %v5583_v43, %v7822_v6  ;;  %v8883_v6 = vld [vmem:[#allocation33_spill] sm:$0xff]  ;;  %v8894_v43 = vld [vmem:[#allocation50_spill] sm:$0xff] }
 0x865   :  { %v5585_v11 = vpop.eup %5584 }
 0x866   :  { %v7939_v3 = vadd.f32 %v3150_v32, %v3149_v9  ;;  %v8893_v32 = vld [vmem:[#allocation46_spill] sm:$0xff]  ;;  %v8896_v9 = vld [vmem:[#allocation39_spill] sm:$0xff] }
 0x868   :  { %5586 = vtanh.f32 %v7939_v3 }
 0x872   :  { %v5587_v23 = vpop.eup %5586 }
 0x873   :  { %v3153_v29 = vmul.f32 %v5587_v23, %v5585_v11  ;;  %v8897_v11 = vld [vmem:[#allocation48_spill] sm:$0xff] }
 0x874   :  { %v8898_v23 = vld [vmem:[#allocation52_spill] sm:$0xff] }
 0x875   :  { %3219 = vmatmul.mubr.f32.vlgmr.msra.gmra.mrb[28].mxu0 %v3153_v29  ;;  %3290 = vmatmul.mubr.f32.vlgmr.msra.gmra.mrb[28].mxu1 %v3153_v29 }
 0x876   :  { %5126 = vmatpush1.bf16.msra.mxu0 %v8547_v49  ;;  %5158 = vmatpush1.bf16.msra.mxu1 %v7036_v18  ;;  %v8844_v18 = vld [vmem:[#allocation102_spill] sm:$0xff]  ;;  %v8863_v49 = vld [vmem:[#allocation11_spill] sm:$0xff] }
 0x877   :  { %5128 = vmatprep.subr.bf16.mxu0 %v8548_v48  ;;  %5160 = vmatprep.subr.bf16.mxu1 %v8549_v39  ;;  %v8864_v48 = vld [vmem:[#allocation8_spill] sm:$0xff] }
 0x878   :  { %3388 = vmatprep.mubr.f32.mxu0 %v8605_v40  ;;  %3459 = vmatprep.mubr.f32.mxu1 %v8605_v40  ;;  %v8865_v39 = vld [vmem:[#allocation16_spill] sm:$0xff]  ;;  %v8877_v40 = vld [vmem:[#allocation30_spill] sm:$0xff] }
 0x87a   :  { %5130 = vmatpush1.bf16.msra.mxu0 %v8606_v24  ;;  %5162 = vmatpush1.bf16.msra.mxu1 %v8607_v35  ;;  %v8878_v24 = vld [vmem:[#allocation34_spill] sm:$0xff]  ;;  %v8879_v35 = vld [vmem:[#allocation27_spill] sm:$0xff] }
 0x87b   :  { %5132 = vmatprep.subr.bf16.mxu0 %v8553_v50  ;;  %5164 = vmatprep.subr.bf16.mxu1 %v8608_v46  ;;  %v8869_v50 = vld [vmem:[#allocation22_spill] sm:$0xff]  ;;  %v8880_v46 = vld [vmem:[#allocation23_spill] sm:$0xff] }
 0x87e   :  { %5134 = vmatpush1.bf16.msra.mxu0 %v8555_v51  ;;  %5166 = vmatpush1.bf16.msra.mxu1 %v8609_v16  ;;  %v8871_v51 = vld [vmem:[#allocation19_spill] sm:$0xff]  ;;  %v8881_v16 = vld [vmem:[#allocation32_spill] sm:$0xff] }
 0x87f   :  { %5136 = vmatprep.subr.bf16.mxu0 %v8557_v22  ;;  %5168 = vmatprep.subr.bf16.mxu1 %v8610_v63  ;;  %v8873_v22 = vld [vmem:[#allocation24_spill] sm:$0xff] }
 0x880   :  { %v8882_v63 = vld [vmem:[#allocation36_spill] sm:$0xff] }
 0x882   :  { %5138 = vmatpush1.bf16.msra.mxu0 %v8559_v44  ;;  %5170 = vmatpush1.bf16.msra.mxu1 %v8560_v25  ;;  %v8875_v44 = vld [vmem:[#allocation25_spill] sm:$0xff] }
 0x883   :  { %5140 = vmatprep.subr.bf16.mxu0 %v8561_v28  ;;  %5172 = vmatprep.subr.bf16.mxu1 %v8562_v30  ;;  %v8866_v28 = vld [vmem:[#allocation20_spill] sm:$0xff]  ;;  %v8867_v30 = vld [vmem:[#allocation17_spill] sm:$0xff] }
 0x884   :  { %v8876_v25 = vld [vmem:[#allocation21_spill] sm:$0xff] }
 0x886   :  { %5142 = vmatpush1.bf16.msra.mxu0 %v8563_v34  ;;  %5174 = vmatpush1.bf16.msra.mxu1 %v7184_v58  ;;  %v8855_v58 = vld [vmem:[#allocation114_spill] sm:$0xff]  ;;  %v8868_v34 = vld [vmem:[#allocation13_spill] sm:$0xff] }
 0x887   :  { %5144 = vmatprep.subr.bf16.mxu0 %v8564_v55  ;;  %5176 = vmatprep.subr.bf16.mxu1 %v7187_v59  ;;  %v8856_v59 = vld [vmem:[#allocation113_spill] sm:$0xff]  ;;  %v8870_v55 = vld [vmem:[#allocation26_spill] sm:$0xff] }
 0x88a   :  { %5146 = vmatpush1.bf16.msra.mxu0 %v8565_v36  ;;  %5178 = vmatpush1.bf16.msra.mxu1 %v7220_v27  ;;  %v8858_v27 = vld [vmem:[#allocation12_spill] sm:$0xff]  ;;  %v8872_v36 = vld [vmem:[#allocation15_spill] sm:$0xff] }
 0x88b   :  { %5148 = vmatprep.subr.bf16.mxu0 %v8566_v41  ;;  %5180 = vmatprep.subr.bf16.mxu1 %v7223_v19  ;;  %v8859_v19 = vld [vmem:[#allocation10_spill] sm:$0xff]  ;;  %v8874_v41 = vld [vmem:[#allocation28_spill] sm:$0xff] }
 0x88e   :  { %5150 = vmatpush1.bf16.msra.mxu0 %v7232_v62  ;;  %5182 = vmatpush1.bf16.msra.mxu1 %v7250_v56  ;;  %v8848_v62 = vld [vmem:[#allocation105_spill] sm:$0xff]  ;;  %v8861_v56 = vld [vmem:[#allocation14_spill] sm:$0xff] }
 0x88f   :  { %5152 = vmatprep.subr.bf16.mxu0 %v7241_v31  ;;  %5184 = vmatprep.subr.bf16.mxu1 %v7253_v52  ;;  %v8845_v52 = vld [vmem:[#allocation103_spill] sm:$0xff] }
 0x890   :  { %v8860_v31 = vld [vmem:[#allocation7_spill] sm:$0xff] }
 0x892   :  { %5154 = vmatpush1.bf16.msra.mxu0 %v7262_v53  ;;  %5186 = vmatpush1.bf16.msra.mxu1 %v7266_v37  ;;  %v8857_v53 = vld [vmem:[#allocation9_spill] sm:$0xff]  ;;  %v8862_v37 = vld [vmem:[#allocation18_spill] sm:$0xff] }
 0x893   :  { %5188 = vmatprep.subr.bf16.mxu0 %v6659_v42  ;;  %5252 = vmatprep.subr.bf16.mxu1 %v6674_v1  ;;  %v8846_v42 = vld [vmem:[#allocation104_spill] sm:$0xff]  ;;  %v8847_v1 = vld [vmem:[#allocation106_spill] sm:$0xff] }
 0x895   :  { %3389 = vmatmul.mubr.f32.vlgmr.msra.gmra.mrb[14].mxu0 %v3153_v29  ;;  %3460 = vmatmul.mubr.f32.vlgmr.msra.gmra.mrb[14].mxu1 %v3153_v29  ;;  %v8899_v29 = vld [vmem:[#allocation49_spill] sm:$0xff] }
 0x896   :  { %5190 = vmatpush1.bf16.msra.mxu0 %v6663_v47  ;;  %5254 = vmatpush1.bf16.msra.mxu1 %v6678_v0  ;;  %v8849_v47 = vld [vmem:[#allocation107_spill] sm:$0xff]  ;;  %v8850_v0 = vld [vmem:[#allocation108_spill] sm:$0xff] }
 0x897   :  { %5192 = vmatprep.subr.bf16.mxu0 %v6667_v57  ;;  %5256 = vmatprep.subr.bf16.mxu1 %v6687_v5  ;;  %v8851_v57 = vld [vmem:[#allocation110_spill] sm:$0xff]  ;;  %v8852_v5 = vld [vmem:[#allocation109_spill] sm:$0xff] }
 0x89a   :  { %5194 = vmatpush1.bf16.msra.mxu0 %v6683_v4  ;;  %5258 = vmatpush1.bf16.msra.mxu1 %v6698_v2  ;;  %v8853_v4 = vld [vmem:[#allocation111_spill] sm:$0xff]  ;;  %v8854_v2 = vld [vmem:[#allocation112_spill] sm:$0xff] }
 0x89b   :  { %5196 = vmatprep.subr.bf16.mxu0 %v8844_v18  ;;  %5260 = vmatprep.subr.bf16.mxu1 %v8845_v52 }
 0x89e   :  { %5198 = vmatpush1.bf16.msra.mxu0 %v8846_v42  ;;  %5262 = vmatpush1.bf16.msra.mxu1 %v8847_v1  ;;  %v8900_v42 = vld [vmem:[#allocation93_spill] sm:$0xff] }
 0x89f   :  { %5200 = vmatprep.subr.bf16.mxu0 %v8848_v62  ;;  %5264 = vmatprep.subr.bf16.mxu1 %v8849_v47 }
 0x8a2   :  { %5202 = vmatpush1.bf16.msra.mxu0 %v8850_v0  ;;  %5266 = vmatpush1.bf16.msra.mxu1 %v8851_v57 }
 0x8a3   :  { %5204 = vmatprep.subr.bf16.mxu0 %v8852_v5  ;;  %5268 = vmatprep.subr.bf16.mxu1 %v8853_v4  ;;  %v8901_v4 = vld [vmem:[#allocation94_spill] sm:$0xff] }
 0x8a6   :  { %5206 = vmatpush1.bf16.msra.mxu0 %v8854_v2  ;;  %5270 = vmatpush1.bf16.msra.mxu1 %v8855_v58 }
 0x8a7   :  { %5208 = vmatprep.subr.bf16.mxu0 %v8856_v59  ;;  %5272 = vmatprep.subr.bf16.mxu1 %v8857_v53 }
 0x8aa   :  { %5210 = vmatpush1.bf16.msra.mxu0 %v8858_v27  ;;  %5274 = vmatpush1.bf16.msra.mxu1 %v8859_v19 }
 0x8ab   :  { %5212 = vmatprep.subr.bf16.mxu0 %v8860_v31  ;;  %5276 = vmatprep.subr.bf16.mxu1 %v8861_v56 }
 0x8ae   :  { %5214 = vmatpush1.bf16.msra.mxu0 %v8862_v37  ;;  %5278 = vmatpush1.bf16.msra.mxu1 %v8863_v49 }
 0x8af   :  { %5216 = vmatprep.subr.bf16.mxu0 %v8864_v48  ;;  %5280 = vmatprep.subr.bf16.mxu1 %v8865_v39 }
 0x8b2   :  { %5218 = vmatpush1.bf16.msra.mxu0 %v8866_v28  ;;  %5282 = vmatpush1.bf16.msra.mxu1 %v8867_v30 }
 0x8b3   :  { %5220 = vmatprep.subr.bf16.mxu0 %v8868_v34  ;;  %5284 = vmatprep.subr.bf16.mxu1 %v8869_v50 }
 0x8b6   :  { %5222 = vmatpush1.bf16.msra.mxu0 %v8870_v55  ;;  %5286 = vmatpush1.bf16.msra.mxu1 %v8871_v51 }
 0x8b7   :  { %5224 = vmatprep.subr.bf16.mxu0 %v8872_v36  ;;  %5288 = vmatprep.subr.bf16.mxu1 %v8873_v22 }
 0x8ba   :  { %5226 = vmatpush1.bf16.msra.mxu0 %v8874_v41  ;;  %5290 = vmatpush1.bf16.msra.mxu1 %v8875_v44 }
 0x8bb   :  { %5228 = vmatprep.subr.bf16.mxu0 %v8876_v25  ;;  %5292 = vmatprep.subr.bf16.mxu1 %v8877_v40 }
 0x8be   :  { %5230 = vmatpush1.bf16.msra.mxu0 %v8878_v24  ;;  %5294 = vmatpush1.bf16.msra.mxu1 %v8879_v35 }
 0x8bf   :  { %5232 = vmatprep.subr.bf16.mxu0 %v8880_v46  ;;  %5296 = vmatprep.subr.bf16.mxu1 %v8881_v16 }
 0x8c2   :  { %5234 = vmatpush1.bf16.msra.mxu0 %v8882_v63  ;;  %5298 = vmatpush1.bf16.msra.mxu1 %v8883_v6 }
 0x8c3   :  { %5236 = vmatprep.subr.bf16.mxu0 %v8884_v17  ;;  %5300 = vmatprep.subr.bf16.mxu1 %v8885_v45 }
 0x8c6   :  { %5238 = vmatpush1.bf16.msra.mxu0 %v8886_v14  ;;  %5302 = vmatpush1.bf16.msra.mxu1 %v8887_v7 }
 0x8c7   :  { %5240 = vmatprep.subr.bf16.mxu0 %v8888_v15  ;;  %5304 = vmatprep.subr.bf16.mxu1 %v8889_v13 }
 0x8ca   :  { %5242 = vmatpush1.bf16.msra.mxu0 %v8890_v60  ;;  %5306 = vmatpush1.bf16.msra.mxu1 %v8891_v10 }
 0x8cb   :  { %5244 = vmatprep.subr.bf16.mxu0 %v8892_v38  ;;  %5308 = vmatprep.subr.bf16.mxu1 %v8893_v32 }
 0x8ce   :  { %5246 = vmatpush1.bf16.msra.mxu0 %v8894_v43  ;;  %5310 = vmatpush1.bf16.msra.mxu1 %v8895_v54 }
 0x8cf   :  { %5248 = vmatprep.subr.bf16.mxu0 %v8896_v9  ;;  %5312 = vmatprep.subr.bf16.mxu1 %v8897_v11 }
 0x8d2   :  { %5250 = vmatpush1.bf16.msra.mxu0 %v8898_v23  ;;  %5314 = vmatpush1.bf16.msra.mxu1 %v8899_v29 }
 0x948   :  { %v3220_v18 = vpop.f32.mrb[28].mxu0  ;;  %v3291_v52 = vpop.f32.mrb[28].mxu1 }
 0x949   :  { %v3221_v1 = vadd.f32 %v3220_v18, %v8900_v42  ;;  %v3222_v62 = vpop.f32.mrb[29].mxu0  ;;  %v3293_v47 = vpop.f32.mrb[29].mxu1  ;;  %v3292_v2 = vadd.f32 %v3291_v52, %v8901_v4 }
 0x94a   :  { %v3223_v0 = vadd.f32 %v3222_v62, %v8600_v20  ;;  %v3294_v58 = vadd.f32 %v3293_v47, %v8723_v26 }
 0x94b   :  { %v3759_v57 = vmul.f32 -1.442695, %v3221_v1  ;;  %v3761_v59 = vmul.f32 -1.442695, %v3292_v2 }
 0x94c   :  { %v3760_v5 = vmul.f32 -1.442695, %v3223_v0 }
 0x94d   :  { %5588 = vpow2.f32 %v3759_v57 }
 0x94e   :  { %5590 = vpow2.f32 %v3760_v5 }
 0x94f   :  { %5592 = vtanh.f32 %v3294_v58 }
 0x950   :  { %5594 = vpow2.f32 %v3761_v59 }
 0x957   :  { %v5589_v53 = vpop.eup %5588 }
 0x958   :  { %v3305_v27 = vadd.f32 1.0, %v5589_v53  ;;  %v5591_v19 = vpop.eup %5590 }
 0x959   :  { %v3306_v31 = vadd.f32 1.0, %v5591_v19  ;;  %v5593_v56 = vpop.eup %5592 }
 0x95a   :  { %5596 = vrcp.f32 %v3305_v27  ;;  %v5595_v37 = vpop.eup %5594 }
 0x95b   :  { %5598 = vrcp.f32 %v3306_v31  ;;  %v3307_v28 = vadd.f32 1.0, %v5595_v37 }
 0x95d   :  { %5600 = vrcp.f32 %v3307_v28 }
 0x964   :  { %v5597_v49 = vpop.eup %5596 }
 0x965   :  { %v3316_v48 = vmul.f32 %v5597_v49, %v5593_v56  ;;  %v5599_v39 = vpop.eup %5598 }
 0x966   :  { %v3315_v30 = vmul.f32 %v5599_v39, %v7928_v8 }
 0x967   :  { %v5601_v8 = vpop.eup %5600 }
 0x968   :  { %v3390_v34 = vpop.f32.mrb[14].mxu0  ;;  %v3461_v50 = vpop.f32.mrb[14].mxu1  ;;  %v8043_v55 = vadd.f32 %v3316_v48, %v3315_v30 }
 0x969   :  { %v5329_v51 = vadd.f32 %v3390_v34, %v8663_v61  ;;  %v3392_v36 = vpop.f32.mrb[15].mxu0  ;;  %v3463_v22 = vpop.f32.mrb[15].mxu1  ;;  %v5345_v40 = vadd.f32 %v3461_v50, %v8603_v12 }
 0x96a   :  { %v5330_v41 = vadd.f32 %v3392_v36, %v8543_v33  ;;  %5602 = vtanh.f32 %v8043_v55  ;;  %v5346_v24 = vadd.f32 %v3463_v22, %v8604_v21 }
 0x96b   :  { %v3762_v44 = vmul.f32 -1.442695, %v5329_v51  ;;  %v3764_v46 = vmul.f32 -1.442695, %v5345_v40 }
 0x96c   :  { %v3763_v25 = vmul.f32 -1.442695, %v5330_v41 }
 0x96d   :  { %5604 = vpow2.f32 %v3762_v44 }
 0x96e   :  { %5606 = vpow2.f32 %v3763_v25 }
 0x96f   :  { %5608 = vtanh.f32 %v5346_v24 }
 0x970   :  { %5610 = vpow2.f32 %v3764_v46 }
 0x974   :  { %v5603_v35 = vpop.eup %5602 }
 0x975   :  { %v3319_v16 = vmul.f32 %v5603_v35, %v5601_v8 }
 0x977   :  { %v5605_v61 = vpop.eup %5604  ;;  %3558 = vmatprep.mubr.f32.mxu0 %v3319_v16  ;;  %3666 = vst [vmem:[%s8080_s6 + $0x30] sm:$0xff] %v3319_v16  ;;  %3629 = vmatprep.mubr.f32.mxu1 %v3319_v16 }
 0x978   :  { %v3479_v63 = vadd.f32 1.0, %v5605_v61  ;;  %v5607_v33 = vpop.eup %5606 }
 0x979   :  { %v3480_v6 = vadd.f32 1.0, %v5607_v33  ;;  %v5609_v12 = vpop.eup %5608 }
 0x97a   :  { %5612 = vrcp.f32 %v3479_v63  ;;  %v5611_v17 = vpop.eup %5610 }
 0x97b   :  { %5614 = vrcp.f32 %v3480_v6  ;;  %v3481_v7 = vadd.f32 1.0, %v5611_v17 }
 0x97d   :  { %5616 = vrcp.f32 %v3481_v7 }
 0x984   :  { %v5613_v21 = vpop.eup %5612 }
 0x985   :  { %v3490_v45 = vmul.f32 %v5613_v21, %v5609_v12  ;;  %v5615_v14 = vpop.eup %5614 }
 0x986   :  { %v3489_v15 = vmul.f32 %v5615_v14, %v7939_v3 }
 0x987   :  { %v5617_v60 = vpop.eup %5616 }
 0x988   :  { %v3491_v13 = vadd.f32 %v3490_v45, %v3489_v15 }
 0x98a   :  { %5618 = vtanh.f32 %v3491_v13  ;;  %3669 = vst [vmem:[%s8082_s8] sm:$0xff] %v3491_v13 }
 0x994   :  { %v5619_v10 = vpop.eup %5618 }
 0x995   :  { %v3493_v38 = vmul.f32 %v5619_v10, %v5617_v60 }
 0x997   :  { %3559 = vmatmul.mubr.f32.vlgmr.msra.gmra.mrb[30].mxu0 %v3493_v38  ;;  %3668 = vst [vmem:[%s8081_s7] sm:$0xff] %v3493_v38  ;;  %3630 = vmatmul.mubr.f32.vlgmr.msra.gmra.mrb[30].mxu1 %v3493_v38 }
 0xa6a   :  { %v3560_v32 = vpop.f32.mrb[30].mxu0  ;;  %v3631_v43 = vpop.f32.mrb[30].mxu1 }
 0xa6b   :  { %v3561_v3 = vadd.f32 %v3560_v32, %v8900_v42  ;;  %v3562_v54 = vpop.f32.mrb[31].mxu0  ;;  %v3633_v9 = vpop.f32.mrb[31].mxu1  ;;  %v3632_v18 = vadd.f32 %v3631_v43, %v8901_v4 }
 0xa6c   :  { %v3563_v11 = vadd.f32 %v3562_v54, %v8600_v20  ;;  %v3634_v52 = vadd.f32 %v3633_v9, %v8723_v26 }
 0xa6d   :  { %v3765_v23 = vmul.f32 -1.442695, %v3561_v3  ;;  %v3767_v1 = vmul.f32 -1.442695, %v3632_v18 }
 0xa6e   :  { %v3766_v29 = vmul.f32 -1.442695, %v3563_v11 }
 0xa6f   :  { %5620 = vpow2.f32 %v3765_v23 }
 0xa70   :  { %5622 = vpow2.f32 %v3766_v29 }
 0xa71   :  { %5624 = vtanh.f32 %v3634_v52 }
 0xa72   :  { %5626 = vpow2.f32 %v3767_v1 }
 0xa79   :  { %v5621_v62 = vpop.eup %5620 }
 0xa7a   :  { %v3645_v47 = vadd.f32 1.0, %v5621_v62  ;;  %v5623_v0 = vpop.eup %5622 }
 0xa7b   :  { %v3646_v42 = vadd.f32 1.0, %v5623_v0  ;;  %v5625_v57 = vpop.eup %5624 }
 0xa7c   :  { %5628 = vrcp.f32 %v3645_v47  ;;  %v5627_v5 = vpop.eup %5626 }
 0xa7d   :  { %5630 = vrcp.f32 %v3646_v42  ;;  %v3647_v59 = vadd.f32 1.0, %v5627_v5 }
 0xa7f   :  { %5632 = vrcp.f32 %v3647_v59 }
 0xa86   :  { %v5629_v20 = vpop.eup %5628 }
 0xa87   :  { %v3656_v2 = vmul.f32 %v5629_v20, %v5625_v57  ;;  %v5631_v58 = vpop.eup %5630 }
 0xa88   :  { %v3655_v53 = vmul.f32 %v5631_v58, %v8043_v55 }
 0xa89   :  { %v5633_v26 = vpop.eup %5632 }
 0xa8a   :  { %v3657_v4 = vadd.f32 %v3656_v2, %v3655_v53 }
 0xa8c   :  { %5634 = vtanh.f32 %v3657_v4  ;;  %3769 = vst [vmem:[%s8082_s8 + $0x8] sm:$0xff] %v3657_v4 }
 0xa96   :  { %v5635_v27 = vpop.eup %5634 }
 0xa97   :  { %v3659_v19 = vmul.f32 %v5635_v27, %v5633_v26 }
 0xa99   :  { %3667 = vst [vmem:[%s8080_s6 + $0x38] sm:$0xff] %v3659_v19  ;;  %3768 = vst [vmem:[%s8081_s7 + $0x8] sm:$0xff] %v3659_v19 }
 0xa9a   :  { %3686 = vsyncmov [#allocation4] }
 0xa9d   :  { %s3687_s12 = vpop.sfrf %3686 }
 0xa9e   :  { %p3770_p0 = scmp.ne.s32.totalorder %s3687_s12, 0 }
 0xaa0   :  { %3691 = shalt.err (%p3770_p0)  }

</bundles_post_ra>
